<compile_context>
chip_gen: v5e
topology: v5e:2x2
jax: 0.10.0
libtpu: 0.0.40
codegen_flags: <defaults>
</compile_context>

<pallas_src>
import functools
import math

import jax
import jax.numpy as jnp
from jax import lax
from jax.experimental import pallas as pl
from jax.experimental.pallas import tpu as pltpu

NEG_INF = -1e30


def _round_up(x, m):
    return (x + m - 1) // m * m


def _pow2_at_least(v, lo=128):
    p = lo
    while p < v:
        p *= 2
    return p


def _vmem_limit_bytes():
    # ~96 MiB on v5e/v6e (128 MiB physical), 48 MiB on v7x (64 MiB physical per TC).
    try:
        cap = int(pltpu.get_tpu_info().vmem_capacity_bytes)
    except Exception:
        cap = 64 << 20
    return min(cap * 3 // 4, 100 << 20)


def _const(shape):
    # Grid-invariant block: fetch once, keep a single buffer resident.
    return pl.BlockSpec(shape, lambda *_: (0, 0), pipeline_mode=pl.Buffered(1))


def _cparams(dims, vmem):
    return pltpu.CompilerParams(dimension_semantics=dims, vmem_limit_bytes=vmem)


# --------------------------------------------------------------------------------------
# GAT-1 projection:  hl = x @ W   plus per-node attention scores  hl.att_src / hl.att_dst
# --------------------------------------------------------------------------------------
def _proj_scores_kernel(x_ref, w_ref, asrc_ref, adst_ref, hl_ref, ssrc_ref, sdst_ref):
    hl = jnp.dot(x_ref[...], w_ref[...], preferred_element_type=jnp.float32)
    hlb = hl.astype(jnp.bfloat16)
    hl_ref[...] = hlb
    ssrc_ref[...] = jnp.dot(hlb, asrc_ref[...], preferred_element_type=jnp.float32)
    sdst_ref[...] = jnp.dot(hlb, adst_ref[...], preferred_element_type=jnp.float32)


def _proj_scores(x, w, att_src_col, att_dst_col, tile_m, vmem):
    npad, d = x.shape
    row = pl.BlockSpec((tile_m, d), lambda i: (i, 0))
    col = pl.BlockSpec((tile_m, 1), lambda i: (i, 0))
    return pl.pallas_call(
        _proj_scores_kernel,
        out_shape=(jax.ShapeDtypeStruct((npad, d), jnp.bfloat16),
                   jax.ShapeDtypeStruct((npad, 1), jnp.float32),
                   jax.ShapeDtypeStruct((npad, 1), jnp.float32)),
        grid=(npad // tile_m,),
        in_specs=[row, _const((d, d)), _const((d, 1)), _const((d, 1))],
        out_specs=(row, col, col),
        compiler_params=_cparams(("parallel",), vmem),
        cost_estimate=pl.CostEstimate(flops=2 * npad * d * (d + 2), transcendentals=0,
                                      bytes_accessed=4 * npad * d + 2 * d * d),
    )(x, w, att_src_col, att_dst_col)


# --------------------------------------------------------------------------------------
# GAT aggregation (heads=1, concat=False, leaky_relu 0.2, add_self_loops) with a
# flash-style online softmax over source-node tiles.
# --------------------------------------------------------------------------------------
def _gat_online_step(adj_ref, sdst_ref, ssrc_ref, hls_ref, acc_ref, m_ref, l_ref):
    k = pl.program_id(1)

    @pl.when(k == 0)
    def _():
        m_ref[...] = jnp.full_like(m_ref, NEG_INF)
        l_ref[...] = jnp.zeros_like(l_ref)
        acc_ref[...] = jnp.zeros_like(acc_ref)

    # e[i,j] = leaky_relu(sdst[i] + ssrc[j]) with non-edges pushed to ~-2e29 by the bf16
    # additive bias (folded in before the leaky-relu; still exp()==0 once a finite max exists).
    e = sdst_ref[...] + ssrc_ref[...] + adj_ref[...].astype(jnp.float32)
    e = jnp.maximum(e, 0.2 * e)

    m_prev = m_ref[...]
    m_new = jnp.maximum(m_prev, jnp.max(e, axis=-1, keepdims=True))
    alpha = jnp.exp(m_prev - m_new)
    p = jnp.exp(e - m_new)
    l_ref[...] = alpha * l_ref[...] + jnp.sum(p, axis=-1, keepdims=True)
    acc_ref[...] = alpha * acc_ref[...] + jnp.dot(
        p.astype(jnp.bfloat16), hls_ref[...], preferred_element_type=jnp.float32)
    m_ref[...] = m_new


def _gat1_kernel(adj_ref, sdst_ref, ssrc_ref, hls_ref, b_ref, w2_ref, asrc2_ref, adst2_ref,
                 hl2_ref, ssrc2_ref, sdst2_ref, acc_ref, m_ref, l_ref):
    _gat_online_step(adj_ref, sdst_ref, ssrc_ref, hls_ref, acc_ref, m_ref, l_ref)

    @pl.when(pl.program_id(1) == pl.num_programs(1) - 1)
    def _():
        # finalize layer 1 (+bias, relu) and fuse layer-2 projection & attention scores
        h1 = jnp.maximum(
            acc_ref[...] * pl.reciprocal(l_ref[...], approx=True) + b_ref[...], 0.0)
        hl2 = jnp.dot(h1.astype(jnp.bfloat16), w2_ref[...],
                      preferred_element_type=jnp.float32).astype(jnp.bfloat16)
        hl2_ref[...] = hl2
        ssrc2_ref[...] = jnp.dot(hl2, asrc2_ref[...], preferred_element_type=jnp.float32)
        sdst2_ref[...] = jnp.dot(hl2, adst2_ref[...], preferred_element_type=jnp.float32)


def _gat2_kernel(adj_ref, sdst_ref, ssrc_ref, hls_ref, b_ref, o_ref, acc_ref, m_ref, l_ref):
    _gat_online_step(adj_ref, sdst_ref, ssrc_ref, hls_ref, acc_ref, m_ref, l_ref)

    @pl.when(pl.program_id(1) == pl.num_programs(1) - 1)
    def _():
        o_ref[...] = (acc_ref[...] * pl.reciprocal(l_ref[...], approx=True)
                      + b_ref[...]).astype(o_ref.dtype)


def _gat_specs(d, tm, tk):
    return [
        pl.BlockSpec((tm, tk), lambda i, k: (i, k)),      # adjacency bias tile (dst, src)
        pl.BlockSpec((tm, 1), lambda i, k: (i, 0)),       # per-dst score
        pl.BlockSpec((1, tk), lambda i, k: (0, k)),       # per-src score
        pl.BlockSpec((tk, d), lambda i, k: (k, 0)),       # projected src features (bf16)
        _const((1, d)),                                    # GAT bias (finalize only)
    ]


def _gat_scratch(tm, d):
    return [pltpu.VMEM((tm, d), jnp.float32),             # running weighted sum
            pltpu.VMEM((tm, 1), jnp.float32),             # running max
            pltpu.VMEM((tm, 1), jnp.float32)]             # running denom


def _gat_cost(npad, d):
    return pl.CostEstimate(flops=2 * npad * npad * (d + 4),
                           transcendentals=npad * npad,
                           bytes_accessed=2 * npad * npad + 6 * npad * d)


def _gat_layer_fused(adjb, sdst, ssrc_row, hls, bias, w2, att_src2_col, att_dst2_col,
                     tm, tk, vmem):
    npad, d = hls.shape
    out_row = pl.BlockSpec((tm, d), lambda i, k: (i, 0))
    out_col = pl.BlockSpec((tm, 1), lambda i, k: (i, 0))
    return pl.pallas_call(
        _gat1_kernel,
        out_shape=(jax.ShapeDtypeStruct((npad, d), jnp.bfloat16),
                   jax.ShapeDtypeStruct((npad, 1), jnp.float32),
                   jax.ShapeDtypeStruct((npad, 1), jnp.float32)),
        grid=(npad // tm, npad // tk),
        in_specs=_gat_specs(d, tm, tk) + [_const((d, d)), _const((d, 1)), _const((d, 1))],
        out_specs=(out_row, out_col, out_col),
        scratch_shapes=_gat_scratch(tm, d),
        compiler_params=_cparams(("parallel", "arbitrary"), vmem),
        cost_estimate=_gat_cost(npad, d),
    )(adjb, sdst, ssrc_row, hls, bias, w2, att_src2_col, att_dst2_col)


def _gat_layer_final(adjb, sdst, ssrc_row, hls, bias, tm, tk, vmem):
    npad, d = hls.shape
    out_row = pl.BlockSpec((tm, d), lambda i, k: (i, 0))
    return pl.pallas_call(
        _gat2_kernel,
        out_shape=jax.ShapeDtypeStruct((npad, d), jnp.bfloat16),
        grid=(npad // tm, npad // tk),
        in_specs=_gat_specs(d, tm, tk),
        out_specs=out_row,
        scratch_shapes=_gat_scratch(tm, d),
        compiler_params=_cparams(("parallel", "arbitrary"), vmem),
        cost_estimate=_gat_cost(npad, d),
    )(adjb, sdst, ssrc_row, hls, bias)


# --------------------------------------------------------------------------------------
# Cross attention: per-tile softmax partials over nodes ("parallel" grid -> both v7x TCs),
# combined into the global softmax in the wrapper.
# --------------------------------------------------------------------------------------
def _attn_pool_kernel(x_ref, h_ref, wq_ref, wk_ref, wv_ref, bq_ref, bk_ref, bv_ref,
                      acc_ref, m_ref, l_ref, *, n_real, inv_sqrt_d, tile_rows):
    i = pl.program_id(0)
    x = x_ref[...]
    h = h_ref[...]
    q = jnp.dot(x, wq_ref[...], preferred_element_type=jnp.float32) + bq_ref[...]
    kk = jnp.dot(h, wk_ref[...], preferred_element_type=jnp.float32) + bk_ref[...]
    v = jnp.dot(h, wv_ref[...], preferred_element_type=jnp.float32) + bv_ref[...]

    s = jnp.sum(q * kk, axis=-1, keepdims=True) * inv_sqrt_d            # [TL, 1]
    row = i * tile_rows + lax.broadcasted_iota(jnp.int32, s.shape, 0)
    valid = row < n_real
    s = jnp.where(valid, s, NEG_INF)

    m = jnp.max(s, axis=0, keepdims=True)                               # [1, 1]
    p = jnp.where(valid, jnp.exp(s - m), 0.0)                           # [TL, 1]
    l = jnp.sum(p, axis=0, keepdims=True)                               # [1, 1]
    acc = jnp.sum(p * v, axis=0, keepdims=True)                         # [1, D]

    acc_ref[...] = jnp.broadcast_to(acc, (8,) + acc.shape[1:])
    m_ref[...] = jnp.broadcast_to(m, (8, 128))
    l_ref[...] = jnp.broadcast_to(l, (8, 128))


def _attn_pool_partials(x, h2, wq, wk, wv, bq, bk, bv, tile_rows, n_real, d_real, vmem):
    npad, d = x.shape
    nt = npad // tile_rows
    kernel = functools.partial(_attn_pool_kernel, n_real=n_real,
                               inv_sqrt_d=1.0 / math.sqrt(d_real), tile_rows=tile_rows)
    row = pl.BlockSpec((tile_rows, d), lambda i: (i, 0))
    return pl.pallas_call(
        kernel,
        out_shape=(jax.ShapeDtypeStruct((nt * 8, d), jnp.float32),
                   jax.ShapeDtypeStruct((nt * 8, 128), jnp.float32),
                   jax.ShapeDtypeStruct((nt * 8, 128), jnp.float32)),
        grid=(nt,),
        in_specs=[row, row, _const((d, d)), _const((d, d)), _const((d, d)),
                  _const((1, d)), _const((1, d)), _const((1, d))],
        out_specs=(pl.BlockSpec((8, d), lambda i: (i, 0)),
                   pl.BlockSpec((8, 128), lambda i: (i, 0)),
                   pl.BlockSpec((8, 128), lambda i: (i, 0))),
        compiler_params=_cparams(("parallel",), vmem),
        cost_estimate=pl.CostEstimate(flops=6 * npad * d * d, transcendentals=npad,
                                      bytes_accessed=4 * npad * d + 6 * d * d),
    )(x, h2, wq, wk, wv, bq, bk, bv)


# --------------------------------------------------------------------------------------
# final linear: h_final = x @ Wm + (bm + g)  (g folded into the bias row)
# --------------------------------------------------------------------------------------
def _linear_bias_kernel(x_ref, w_ref, b_ref, o_ref):
    o_ref[...] = (jnp.dot(x_ref[...], w_ref[...], preferred_element_type=jnp.float32)
                  + b_ref[...]).astype(o_ref.dtype)


def _linear(x, w, b, tile_m, vmem):
    npad, d = x.shape
    row = pl.BlockSpec((tile_m, d), lambda i: (i, 0))
    return pl.pallas_call(
        _linear_bias_kernel,
        out_shape=jax.ShapeDtypeStruct((npad, d), jnp.float32),
        grid=(npad // tile_m,),
        in_specs=[row, _const((d, d)), _const((1, d))],
        out_specs=row,
        compiler_params=_cparams(("parallel",), vmem),
        cost_estimate=pl.CostEstimate(flops=2 * npad * d * d, transcendentals=0,
                                      bytes_accessed=6 * npad * d + 2 * d * d),
    )(x, w, b)


# --------------------------------------------------------------------------------------
# forward wrapper
# --------------------------------------------------------------------------------------
def caugramer_forward(x, edge_index, params):
    """x: [N, D] float32, edge_index: [2, E] int32.  Returns (h_final [N, D], g [D])."""
    n, d = x.shape
    dpad = _round_up(d, 128)

    cap = _pow2_at_least(n)              # power-of-two >= max(n, 128)
    tk = min(1024, cap)                  # GAT source tile (long DMAs, fewer grid steps)
    tm = min(256, tk)                    # GAT destination tile
    tl = min(512, tk)                    # row tile for proj / pool / linear kernels
    npad = _round_up(n, tk)              # tk is the largest tile; tm, tl divide it
    vmem = _vmem_limit_bytes()

    # Adjacency as an additive bf16 bias, built directly in its final dtype:
    # 0.0 on edges (dst receives from src) and on the diagonal (add_self_loops; also keeps
    # padded / edgeless rows finite -> the self-loop invariant of the online softmax),
    # NEG_INF elsewhere.  NOTE: duplicate edges collapse to a single edge (binary mask).
    src, dst = edge_index[0], edge_index[1]
    adjb = jnp.full((npad, npad), NEG_INF, jnp.bfloat16)
    adjb = adjb.at[dst, src].set(0.0)
    diag = jnp.arange(npad)
    adjb = adjb.at[diag, diag].set(0.0)

    def pad_w(w):      # [d, d] -> [dpad, dpad] bf16
        return jnp.zeros((dpad, dpad), jnp.bfloat16).at[:d, :d].set(w.astype(jnp.bfloat16))

    def pad_col(v):    # [1, d] -> [dpad, 1] bf16 (attention vector as a column)
        return jnp.zeros((dpad, 1), jnp.bfloat16).at[:d, 0].set(v[0].astype(jnp.bfloat16))

    def pad_brow(v):   # [1, d] -> [1, dpad] f32 bias row
        return jnp.zeros((1, dpad), jnp.float32).at[:, :d].set(v)

    xp = jnp.zeros((npad, dpad), jnp.bfloat16).at[:n, :d].set(x.astype(jnp.bfloat16))

    # ---- GAT layer 1 projection + per-node attention scores ----
    hl1, ssrc1, sdst1 = _proj_scores(
        xp, pad_w(params["gat1_w"]),
        pad_col(params["gat1_att_src"]), pad_col(params["gat1_att_dst"]), tl, vmem)

    # ---- GAT layer 1 aggregation (+ fused layer-2 projection & scores in the finalize) ----
    hl2, ssrc2, sdst2 = _gat_layer_fused(
        adjb, sdst1, ssrc1.reshape(1, npad), hl1, pad_brow(params["gat1_b"]),
        pad_w(params["gat2_w"]),
        pad_col(params["gat2_att_src"]), pad_col(params["gat2_att_dst"]), tm, tk, vmem)

    # ---- GAT layer 2 aggregation -> neighbor_h (pre-relu) ----
    h2 = _gat_layer_final(adjb, sdst2, ssrc2.reshape(1, npad), hl2,
                          pad_brow(params["gat2_b"]), tm, tk, vmem)

    # ---- cross attention: per-tile softmax partials, combined here (tiny XLA) ----
    part_acc, part_m, part_l = _attn_pool_partials(
        xp, h2, pad_w(params["wq_w"]), pad_w(params["wk_w"]), pad_w(params["wv_w"]),
        pad_brow(params["wq_b"]), pad_brow(params["wk_b"]), pad_brow(params["wv_b"]),
        tl, n, d, vmem)

    nt = npad // tl
    m_part = part_m[::8, 0]                                   # [nt]
    l_part = part_l[::8, 0]                                   # [nt]
    acc_part = part_acc.reshape(nt, 8, dpad)[:, 0, :]         # [nt, dpad]
    m_g = jnp.max(m_part)
    wgt = jnp.exp(m_part - m_g)
    g_pool = jnp.sum(wgt[:, None] * acc_part, axis=0) / jnp.sum(wgt * l_part)   # [dpad]

    # neighbor_effect on the pooled vector (1 x d x d matmul -> plain XLA, keeps Wn out of VMEM)
    g = g_pool[:d] @ params["wn_w"] + params["wn_b"][0]       # [d]

    # ---- h_final = main_effect(x) + g ; g folded into the linear's bias row ----
    bias_final = jnp.zeros((1, dpad), jnp.float32).at[0, :d].set(params["wm_b"][0] + g)
    h_final = _linear(xp, pad_w(params["wm_w"]), bias_final, tl, vmem)
    return h_final[:n, :d], g


def init_params(key, d):
    """Deterministic synthetic parameters; shapes follow CauGramerLayer(in=out=d, num_layers=2)."""
    ks = jax.random.split(key, 22)
    it = iter(range(22))

    def lin(din, dout):
        kw, kb = ks[next(it)], ks[next(it)]
        w = jax.random.normal(kw, (din, dout), jnp.float32) / jnp.sqrt(jnp.float32(din))
        b = jax.random.normal(kb, (1, dout), jnp.float32) * 0.01
        return w, b

    p = {}
    for name in ("gat1", "gat2"):
        w, b = lin(d, d)                                  # GATConv.lin (bias=False) + GATConv.bias
        p[f"{name}_w"] = w
        p[f"{name}_b"] = b
        p[f"{name}_att_src"] = jax.random.normal(ks[next(it)], (1, d), jnp.float32) / jnp.sqrt(jnp.float32(d))
        p[f"{name}_att_dst"] = jax.random.normal(ks[next(it)], (1, d), jnp.float32) / jnp.sqrt(jnp.float32(d))
    for name in ("wq", "wk", "wv", "wm", "wn"):           # W_q, W_k, W_v, main_effect, neighbor_effect
        w, b = lin(d, d)
        p[f"{name}_w"] = w
        p[f"{name}_b"] = b
    return p


if __name__ == "__main__":
    N, D = 8, 32                                          # in_channels == out_channels (required by module)
    key = jax.random.PRNGKey(0)
    kx, kp = jax.random.split(key)
    x = jax.random.normal(kx, (N, D), jnp.float32)

    # small deterministic directed graph (bidirectional ring)
    src = jnp.array([0, 1, 2, 3, 4, 5, 6, 7, 1, 2, 3, 4, 5, 6, 7, 0], jnp.int32)
    dst = jnp.array([1, 2, 3, 4, 5, 6, 7, 0, 0, 1, 2, 3, 4, 5, 6, 7], jnp.int32)
    edge_index = jnp.stack([src, dst])

    params = init_params(kp, D)
    h_final, g = jax.jit(caugramer_forward)(x, edge_index, params)
    jax.block_until_ready((h_final, g))

    assert h_final.shape == (N, D) and g.shape == (D,)
    assert bool(jnp.all(jnp.isfinite(h_final))) and bool(jnp.all(jnp.isfinite(g)))
    print("KERNEL_OK")
</pallas_src>

<mosaic_0001>
module attributes {stable_mosaic.version = 11 : i64} {
  func.func @_proj_scores_kernel(%arg0: i32, %arg1: memref<128x128xbf16, #tpu.memory_space<vmem>>, %arg2: memref<128x128xbf16, #tpu.memory_space<vmem>>, %arg3: memref<128x1xbf16, #tpu.memory_space<vmem>>, %arg4: memref<128x1xbf16, #tpu.memory_space<vmem>>, %arg5: memref<128x128xbf16, #tpu.memory_space<vmem>>, %arg6: memref<128x1xf32, #tpu.memory_space<vmem>>, %arg7: memref<128x1xf32, #tpu.memory_space<vmem>>) attributes {dimension_semantics = [#tpu.dimension_semantics<parallel>], iteration_bounds = array<i64: 1>, scalar_prefetch = 0 : i64, scratch_operands = 0 : i64, tpu.core_type = #tpu.core_type<tc>, window_params = [{transform_indices = @transform_0, window_bounds = array<i64: 128, 128>}, {pipeline_mode = #tpu.pipeline_mode<synchronous>, transform_indices = @transform_1, window_bounds = array<i64: 128, 128>}, {pipeline_mode = #tpu.pipeline_mode<synchronous>, transform_indices = @transform_2, window_bounds = array<i64: 128, 1>}, {pipeline_mode = #tpu.pipeline_mode<synchronous>, transform_indices = @transform_3, window_bounds = array<i64: 128, 1>}, {transform_indices = @transform_4, window_bounds = array<i64: 128, 128>}, {transform_indices = @transform_5, window_bounds = array<i64: 128, 1>}, {transform_indices = @transform_6, window_bounds = array<i64: 128, 1>}]} {
    %c0 = arith.constant 0 : index
    %c0_0 = arith.constant 0 : index
    %0 = vector.load %arg1[%c0, %c0_0] : memref<128x128xbf16, #tpu.memory_space<vmem>>, vector<128x128xbf16>
    %c0_1 = arith.constant 0 : index
    %c0_2 = arith.constant 0 : index
    %1 = vector.load %arg2[%c0_1, %c0_2] : memref<128x128xbf16, #tpu.memory_space<vmem>>, vector<128x128xbf16>
    %cst = arith.constant dense<0.000000e+00> : vector<128x128xf32>
    %2 = tpu.matmul %0, %1, %cst {dimension_numbers = #tpu.dot_dimension_numbers<[1], [0], [0], [1], [0, 0, 1, 1], [], []>} : vector<128x128xbf16>, vector<128x128xbf16>, vector<128x128xf32> -> vector<128x128xf32>
    %3 = arith.truncf %2 : vector<128x128xf32> to vector<128x128xbf16>
    %c0_3 = arith.constant 0 : index
    %c0_4 = arith.constant 0 : index
    %4 = vector.load %arg5[%c0_3, %c0_4] : memref<128x128xbf16, #tpu.memory_space<vmem>>, vector<128x128xbf16>
    tpu.vector_store %arg5[%c0_3, %c0_4], %3 {strides = array<i32>} : memref<128x128xbf16, #tpu.memory_space<vmem>>, vector<128x128xbf16>,
    %c0_5 = arith.constant 0 : index
    %c0_6 = arith.constant 0 : index
    %5 = vector.load %arg3[%c0_5, %c0_6] : memref<128x1xbf16, #tpu.memory_space<vmem>>, vector<128x1xbf16>
    %cst_7 = arith.constant dense<0.000000e+00> : vector<128x1xf32>
    %6 = tpu.matmul %3, %5, %cst_7 {dimension_numbers = #tpu.dot_dimension_numbers<[1], [0], [0], [1], [0, 0, 1, 1], [], []>} : vector<128x128xbf16>, vector<128x1xbf16>, vector<128x1xf32> -> vector<128x1xf32>
    %c0_8 = arith.constant 0 : index
    %c0_9 = arith.constant 0 : index
    %7 = vector.load %arg6[%c0_8, %c0_9] : memref<128x1xf32, #tpu.memory_space<vmem>>, vector<128x1xf32>
    tpu.vector_store %arg6[%c0_8, %c0_9], %6 {strides = array<i32>} : memref<128x1xf32, #tpu.memory_space<vmem>>, vector<128x1xf32>,
    %c0_10 = arith.constant 0 : index
    %c0_11 = arith.constant 0 : index
    %8 = vector.load %arg4[%c0_10, %c0_11] : memref<128x1xbf16, #tpu.memory_space<vmem>>, vector<128x1xbf16>
    %cst_12 = arith.constant dense<0.000000e+00> : vector<128x1xf32>
    %9 = tpu.matmul %3, %8, %cst_12 {dimension_numbers = #tpu.dot_dimension_numbers<[1], [0], [0], [1], [0, 0, 1, 1], [], []>} : vector<128x128xbf16>, vector<128x1xbf16>, vector<128x1xf32> -> vector<128x1xf32>
    %c0_13 = arith.constant 0 : index
    %c0_14 = arith.constant 0 : index
    %10 = vector.load %arg7[%c0_13, %c0_14] : memref<128x1xf32, #tpu.memory_space<vmem>>, vector<128x1xf32>
    tpu.vector_store %arg7[%c0_13, %c0_14], %9 {strides = array<i32>} : memref<128x1xf32, #tpu.memory_space<vmem>>, vector<128x1xf32>,
    return
  }
  func.func @transform_0(%arg0: i32) -> (i32, i32) {
    %c0_i32 = arith.constant 0 : i32
    %c0_i32_0 = arith.constant 0 : i32
    return %arg0, %c0_i32 : i32, i32
  }
  func.func @transform_1(%arg0: i32) -> (i32, i32) {
    %c0_i32 = arith.constant 0 : i32
    %c0_i32_0 = arith.constant 0 : i32
    %c0_i32_1 = arith.constant 0 : i32
    return %c0_i32, %c0_i32_0 : i32, i32
  }
  func.func @transform_2(%arg0: i32) -> (i32, i32) {
    %c0_i32 = arith.constant 0 : i32
    %c0_i32_0 = arith.constant 0 : i32
    %c0_i32_1 = arith.constant 0 : i32
    return %c0_i32, %c0_i32_0 : i32, i32
  }
  func.func @transform_3(%arg0: i32) -> (i32, i32) {
    %c0_i32 = arith.constant 0 : i32
    %c0_i32_0 = arith.constant 0 : i32
    %c0_i32_1 = arith.constant 0 : i32
    return %c0_i32, %c0_i32_0 : i32, i32
  }
  func.func @transform_4(%arg0: i32) -> (i32, i32) {
    %c0_i32 = arith.constant 0 : i32
    %c0_i32_0 = arith.constant 0 : i32
    return %arg0, %c0_i32 : i32, i32
  }
  func.func @transform_5(%arg0: i32) -> (i32, i32) {
    %c0_i32 = arith.constant 0 : i32
    %c0_i32_0 = arith.constant 0 : i32
    return %arg0, %c0_i32 : i32, i32
  }
  func.func @transform_6(%arg0: i32) -> (i32, i32) {
    %c0_i32 = arith.constant 0 : i32
    %c0_i32_0 = arith.constant 0 : i32
    return %arg0, %c0_i32 : i32, i32
  }
}

module attributes {stable_mosaic.version = 11 : i64} {
  func.func @_gat1_kernel(%arg0: i32, %arg1: i32, %arg2: memref<128x128xbf16, #tpu.memory_space<vmem>>, %arg3: memref<128x1xf32, #tpu.memory_space<vmem>>, %arg4: memref<1x128xf32, #tpu.memory_space<vmem>>, %arg5: memref<128x128xbf16, #tpu.memory_space<vmem>>, %arg6: memref<1x128xf32, #tpu.memory_space<vmem>>, %arg7: memref<128x128xbf16, #tpu.memory_space<vmem>>, %arg8: memref<128x1xbf16, #tpu.memory_space<vmem>>, %arg9: memref<128x1xbf16, #tpu.memory_space<vmem>>, %arg10: memref<128x128xbf16, #tpu.memory_space<vmem>>, %arg11: memref<128x1xf32, #tpu.memory_space<vmem>>, %arg12: memref<128x1xf32, #tpu.memory_space<vmem>>, %arg13: memref<128x128xf32, #tpu.memory_space<vmem>>, %arg14: memref<128x1xf32, #tpu.memory_space<vmem>>, %arg15: memref<128x1xf32, #tpu.memory_space<vmem>>) attributes {dimension_semantics = [#tpu.dimension_semantics<parallel>, #tpu.dimension_semantics<arbitrary>], iteration_bounds = array<i64: 1, 1>, scalar_prefetch = 0 : i64, scratch_operands = 3 : i64, tpu.core_type = #tpu.core_type<tc>, window_params = [{transform_indices = @transform_0, window_bounds = array<i64: 128, 128>}, {transform_indices = @transform_1, window_bounds = array<i64: 128, 1>}, {transform_indices = @transform_2, window_bounds = array<i64: 1, 128>}, {transform_indices = @transform_3, window_bounds = array<i64: 128, 128>}, {pipeline_mode = #tpu.pipeline_mode<synchronous>, transform_indices = @transform_4, window_bounds = array<i64: 1, 128>}, {pipeline_mode = #tpu.pipeline_mode<synchronous>, transform_indices = @transform_5, window_bounds = array<i64: 128, 128>}, {pipeline_mode = #tpu.pipeline_mode<synchronous>, transform_indices = @transform_6, window_bounds = array<i64: 128, 1>}, {pipeline_mode = #tpu.pipeline_mode<synchronous>, transform_indices = @transform_7, window_bounds = array<i64: 128, 1>}, {transform_indices = @transform_8, window_bounds = array<i64: 128, 128>}, {transform_indices = @transform_9, window_bounds = array<i64: 128, 1>}, {transform_indices = @transform_10, window_bounds = array<i64: 128, 1>}]} {
    %c0_i32 = arith.constant 0 : i32
    %0 = arith.cmpi eq, %arg1, %c0_i32 : i32
    %1 = arith.extui %0 : i1 to i32
    %c0_i32_0 = arith.constant 0 : i32
    %2 = arith.cmpi ne, %1, %c0_i32_0 : i32
    scf.if %2 {
      %cst_25 = arith.constant -1.000000e+30 : f32
      %41 = vector.broadcast %cst_25 : f32 to vector<128x1xf32>
      %c0_26 = arith.constant 0 : index
      %c0_27 = arith.constant 0 : index
      %42 = vector.load %arg14[%c0_26, %c0_27] : memref<128x1xf32, #tpu.memory_space<vmem>>, vector<128x1xf32>
      tpu.vector_store %arg14[%c0_26, %c0_27], %41 {strides = array<i32>} : memref<128x1xf32, #tpu.memory_space<vmem>>, vector<128x1xf32>,
      %cst_28 = arith.constant 0.000000e+00 : f32
      %43 = vector.broadcast %cst_28 : f32 to vector<128x1xf32>
      %c0_29 = arith.constant 0 : index
      %c0_30 = arith.constant 0 : index
      %44 = vector.load %arg15[%c0_29, %c0_30] : memref<128x1xf32, #tpu.memory_space<vmem>>, vector<128x1xf32>
      tpu.vector_store %arg15[%c0_29, %c0_30], %43 {strides = array<i32>} : memref<128x1xf32, #tpu.memory_space<vmem>>, vector<128x1xf32>,
      %cst_31 = arith.constant 0.000000e+00 : f32
      %45 = vector.broadcast %cst_31 : f32 to vector<128x128xf32>
      %c0_32 = arith.constant 0 : index
      %c0_33 = arith.constant 0 : index
      %46 = vector.load %arg13[%c0_32, %c0_33] : memref<128x128xf32, #tpu.memory_space<vmem>>, vector<128x128xf32>
      tpu.vector_store %arg13[%c0_32, %c0_33], %45 {strides = array<i32>} : memref<128x128xf32, #tpu.memory_space<vmem>>, vector<128x128xf32>,
    } else {
    }
    %c0 = arith.constant 0 : index
    %c0_1 = arith.constant 0 : index
    %3 = vector.load %arg3[%c0, %c0_1] : memref<128x1xf32, #tpu.memory_space<vmem>>, vector<128x1xf32>
    %c0_2 = arith.constant 0 : index
    %c0_3 = arith.constant 0 : index
    %4 = vector.load %arg4[%c0_2, %c0_3] : memref<1x128xf32, #tpu.memory_space<vmem>>, vector<1x128xf32>
    %5 = vector.broadcast %3 : vector<128x1xf32> to vector<128x128xf32>
    %6 = vector.broadcast %4 : vector<1x128xf32> to vector<128x128xf32>
    %7 = arith.addf %5, %6 : vector<128x128xf32>
    %c0_4 = arith.constant 0 : index
    %c0_5 = arith.constant 0 : index
    %8 = vector.load %arg2[%c0_4, %c0_5] : memref<128x128xbf16, #tpu.memory_space<vmem>>, vector<128x128xbf16>
    %9 = arith.extf %8 : vector<128x128xbf16> to vector<128x128xf32>
    %10 = arith.addf %7, %9 : vector<128x128xf32>
    %cst = arith.constant 2.000000e-01 : f32
    %11 = vector.broadcast %cst : f32 to vector<128x128xf32>
    %12 = arith.mulf %11, %10 : vector<128x128xf32>
    %13 = arith.maximumf %10, %12 : vector<128x128xf32>
    %c0_6 = arith.constant 0 : index
    %c0_7 = arith.constant 0 : index
    %14 = vector.load %arg14[%c0_6, %c0_7] : memref<128x1xf32, #tpu.memory_space<vmem>>, vector<128x1xf32>
    %cst_8 = arith.constant dense<0xFF800000> : vector<128xf32>
    %15 = vector.multi_reduction <maximumf>, %13, %cst_8 [1] : vector<128x128xf32> to vector<128xf32>
    %16 = vector.shape_cast %15 : vector<128xf32> to vector<128x1xf32>
    %17 = arith.maximumf %14, %16 : vector<128x1xf32>
    %18 = arith.subf %14, %17 : vector<128x1xf32>
    %19 = math.exp %18 : vector<128x1xf32>
    %20 = vector.broadcast %17 : vector<128x1xf32> to vector<128x128xf32>
    %21 = arith.subf %13, %20 : vector<128x128xf32>
    %22 = math.exp %21 : vector<128x128xf32>
    %c0_9 = arith.constant 0 : index
    %c0_10 = arith.constant 0 : index
    %23 = vector.load %arg15[%c0_9, %c0_10] : memref<128x1xf32, #tpu.memory_space<vmem>>, vector<128x1xf32>
    %24 = arith.mulf %19, %23 : vector<128x1xf32>
    %cst_11 = arith.constant dense<0.000000e+00> : vector<128xf32>
    %25 = vector.multi_reduction <add>, %22, %cst_11 [1] : vector<128x128xf32> to vector<128xf32>
    %26 = vector.shape_cast %25 : vector<128xf32> to vector<128x1xf32>
    %27 = arith.addf %24, %26 : vector<128x1xf32>
    %c0_12 = arith.constant 0 : index
    %c0_13 = arith.constant 0 : index
    %28 = vector.load %arg15[%c0_12, %c0_13] : memref<128x1xf32, #tpu.memory_space<vmem>>, vector<128x1xf32>
    tpu.vector_store %arg15[%c0_12, %c0_13], %27 {strides = array<i32>} : memref<128x1xf32, #tpu.memory_space<vmem>>, vector<128x1xf32>,
    %c0_14 = arith.constant 0 : index
    %c0_15 = arith.constant 0 : index
    %29 = vector.load %arg13[%c0_14, %c0_15] : memref<128x128xf32, #tpu.memory_space<vmem>>, vector<128x128xf32>
    %30 = vector.broadcast %19 : vector<128x1xf32> to vector<128x128xf32>
    %31 = arith.mulf %30, %29 : vector<128x128xf32>
    %32 = arith.truncf %22 : vector<128x128xf32> to vector<128x128xbf16>
    %c0_16 = arith.constant 0 : index
    %c0_17 = arith.constant 0 : index
    %33 = vector.load %arg5[%c0_16, %c0_17] : memref<128x128xbf16, #tpu.memory_space<vmem>>, vector<128x128xbf16>
    %cst_18 = arith.constant dense<0.000000e+00> : vector<128x128xf32>
    %34 = tpu.matmul %32, %33, %cst_18 {dimension_numbers = #tpu.dot_dimension_numbers<[1], [0], [0], [1], [0, 0, 1, 1], [], []>} : vector<128x128xbf16>, vector<128x128xbf16>, vector<128x128xf32> -> vector<128x128xf32>
    %35 = arith.addf %31, %34 : vector<128x128xf32>
    %c0_19 = arith.constant 0 : index
    %c0_20 = arith.constant 0 : index
    %36 = vector.load %arg13[%c0_19, %c0_20] : memref<128x128xf32, #tpu.memory_space<vmem>>, vector<128x128xf32>
    tpu.vector_store %arg13[%c0_19, %c0_20], %35 {strides = array<i32>} : memref<128x128xf32, #tpu.memory_space<vmem>>, vector<128x128xf32>,
    %c0_21 = arith.constant 0 : index
    %c0_22 = arith.constant 0 : index
    %37 = vector.load %arg14[%c0_21, %c0_22] : memref<128x1xf32, #tpu.memory_space<vmem>>, vector<128x1xf32>
    tpu.vector_store %arg14[%c0_21, %c0_22], %17 {strides = array<i32>} : memref<128x1xf32, #tpu.memory_space<vmem>>, vector<128x1xf32>,
    %c0_i32_23 = arith.constant 0 : i32
    %38 = arith.cmpi eq, %arg1, %c0_i32_23 : i32
    %39 = arith.extui %38 : i1 to i32
    %c0_i32_24 = arith.constant 0 : i32
    %40 = arith.cmpi ne, %39, %c0_i32_24 : i32
    scf.if %40 {
      %c0_25 = arith.constant 0 : index
      %c0_26 = arith.constant 0 : index
      %41 = vector.load %arg13[%c0_25, %c0_26] : memref<128x128xf32, #tpu.memory_space<vmem>>, vector<128x128xf32>
      %c0_27 = arith.constant 0 : index
      %c0_28 = arith.constant 0 : index
      %42 = vector.load %arg15[%c0_27, %c0_28] : memref<128x1xf32, #tpu.memory_space<vmem>>, vector<128x1xf32>
      %43 = tpu.reciprocal %42 {approx = true} : vector<128x1xf32> -> vector<128x1xf32>
      %44 = vector.broadcast %43 : vector<128x1xf32> to vector<128x128xf32>
      %45 = arith.mulf %41, %44 : vector<128x128xf32>
      %c0_29 = arith.constant 0 : index
      %c0_30 = arith.constant 0 : index
      %46 = vector.load %arg6[%c0_29, %c0_30] : memref<1x128xf32, #tpu.memory_space<vmem>>, vector<1x128xf32>
      %47 = vector.broadcast %46 : vector<1x128xf32> to vector<128x128xf32>
      %48 = arith.addf %45, %47 : vector<128x128xf32>
      %cst_31 = arith.constant 0.000000e+00 : f32
      %49 = vector.broadcast %cst_31 : f32 to vector<128x128xf32>
      %50 = arith.maximumf %48, %49 : vector<128x128xf32>
      %51 = arith.truncf %50 : vector<128x128xf32> to vector<128x128xbf16>
      %c0_32 = arith.constant 0 : index
      %c0_33 = arith.constant 0 : index
      %52 = vector.load %arg7[%c0_32, %c0_33] : memref<128x128xbf16, #tpu.memory_space<vmem>>, vector<128x128xbf16>
      %cst_34 = arith.constant dense<0.000000e+00> : vector<128x128xf32>
      %53 = tpu.matmul %51, %52, %cst_34 {dimension_numbers = #tpu.dot_dimension_numbers<[1], [0], [0], [1], [0, 0, 1, 1], [], []>} : vector<128x128xbf16>, vector<128x128xbf16>, vector<128x128xf32> -> vector<128x128xf32>
      %54 = arith.truncf %53 : vector<128x128xf32> to vector<128x128xbf16>
      %c0_35 = arith.constant 0 : index
      %c0_36 = arith.constant 0 : index
      %55 = vector.load %arg10[%c0_35, %c0_36] : memref<128x128xbf16, #tpu.memory_space<vmem>>, vector<128x128xbf16>
      tpu.vector_store %arg10[%c0_35, %c0_36], %54 {strides = array<i32>} : memref<128x128xbf16, #tpu.memory_space<vmem>>, vector<128x128xbf16>,
      %c0_37 = arith.constant 0 : index
      %c0_38 = arith.constant 0 : index
      %56 = vector.load %arg8[%c0_37, %c0_38] : memref<128x1xbf16, #tpu.memory_space<vmem>>, vector<128x1xbf16>
      %cst_39 = arith.constant dense<0.000000e+00> : vector<128x1xf32>
      %57 = tpu.matmul %54, %56, %cst_39 {dimension_numbers = #tpu.dot_dimension_numbers<[1], [0], [0], [1], [0, 0, 1, 1], [], []>} : vector<128x128xbf16>, vector<128x1xbf16>, vector<128x1xf32> -> vector<128x1xf32>
      %c0_40 = arith.constant 0 : index
      %c0_41 = arith.constant 0 : index
      %58 = vector.load %arg11[%c0_40, %c0_41] : memref<128x1xf32, #tpu.memory_space<vmem>>, vector<128x1xf32>
      tpu.vector_store %arg11[%c0_40, %c0_41], %57 {strides = array<i32>} : memref<128x1xf32, #tpu.memory_space<vmem>>, vector<128x1xf32>,
      %c0_42 = arith.constant 0 : index
      %c0_43 = arith.constant 0 : index
      %59 = vector.load %arg9[%c0_42, %c0_43] : memref<128x1xbf16, #tpu.memory_space<vmem>>, vector<128x1xbf16>
      %cst_44 = arith.constant dense<0.000000e+00> : vector<128x1xf32>
      %60 = tpu.matmul %54, %59, %cst_44 {dimension_numbers = #tpu.dot_dimension_numbers<[1], [0], [0], [1], [0, 0, 1, 1], [], []>} : vector<128x128xbf16>, vector<128x1xbf16>, vector<128x1xf32> -> vector<128x1xf32>
      %c0_45 = arith.constant 0 : index
      %c0_46 = arith.constant 0 : index
      %61 = vector.load %arg12[%c0_45, %c0_46] : memref<128x1xf32, #tpu.memory_space<vmem>>, vector<128x1xf32>
      tpu.vector_store %arg12[%c0_45, %c0_46], %60 {strides = array<i32>} : memref<128x1xf32, #tpu.memory_space<vmem>>, vector<128x1xf32>,
    } else {
    }
    return
  }
  func.func @transform_0(%arg0: i32, %arg1: i32) -> (i32, i32) {
    %c0_i32 = arith.constant 0 : i32
    return %arg0, %arg1 : i32, i32
  }
  func.func @transform_1(%arg0: i32, %arg1: i32) -> (i32, i32) {
    %c0_i32 = arith.constant 0 : i32
    %c0_i32_0 = arith.constant 0 : i32
    return %arg0, %c0_i32 : i32, i32
  }
  func.func @transform_2(%arg0: i32, %arg1: i32) -> (i32, i32) {
    %c0_i32 = arith.constant 0 : i32
    %c0_i32_0 = arith.constant 0 : i32
    return %c0_i32, %arg1 : i32, i32
  }
  func.func @transform_3(%arg0: i32, %arg1: i32) -> (i32, i32) {
    %c0_i32 = arith.constant 0 : i32
    %c0_i32_0 = arith.constant 0 : i32
    return %arg1, %c0_i32 : i32, i32
  }
  func.func @transform_4(%arg0: i32, %arg1: i32) -> (i32, i32) {
    %c0_i32 = arith.constant 0 : i32
    %c0_i32_0 = arith.constant 0 : i32
    %c0_i32_1 = arith.constant 0 : i32
    return %c0_i32, %c0_i32_0 : i32, i32
  }
  func.func @transform_5(%arg0: i32, %arg1: i32) -> (i32, i32) {
    %c0_i32 = arith.constant 0 : i32
    %c0_i32_0 = arith.constant 0 : i32
    %c0_i32_1 = arith.constant 0 : i32
    return %c0_i32, %c0_i32_0 : i32, i32
  }
  func.func @transform_6(%arg0: i32, %arg1: i32) -> (i32, i32) {
    %c0_i32 = arith.constant 0 : i32
    %c0_i32_0 = arith.constant 0 : i32
    %c0_i32_1 = arith.constant 0 : i32
    return %c0_i32, %c0_i32_0 : i32, i32
  }
  func.func @transform_7(%arg0: i32, %arg1: i32) -> (i32, i32) {
    %c0_i32 = arith.constant 0 : i32
    %c0_i32_0 = arith.constant 0 : i32
    %c0_i32_1 = arith.constant 0 : i32
    return %c0_i32, %c0_i32_0 : i32, i32
  }
  func.func @transform_8(%arg0: i32, %arg1: i32) -> (i32, i32) {
    %c0_i32 = arith.constant 0 : i32
    %c0_i32_0 = arith.constant 0 : i32
    return %arg0, %c0_i32 : i32, i32
  }
  func.func @transform_9(%arg0: i32, %arg1: i32) -> (i32, i32) {
    %c0_i32 = arith.constant 0 : i32
    %c0_i32_0 = arith.constant 0 : i32
    return %arg0, %c0_i32 : i32, i32
  }
  func.func @transform_10(%arg0: i32, %arg1: i32) -> (i32, i32) {
    %c0_i32 = arith.constant 0 : i32
    %c0_i32_0 = arith.constant 0 : i32
    return %arg0, %c0_i32 : i32, i32
  }
}

module attributes {stable_mosaic.version = 11 : i64} {
  func.func @_gat2_kernel(%arg0: i32, %arg1: i32, %arg2: memref<128x128xbf16, #tpu.memory_space<vmem>>, %arg3: memref<128x1xf32, #tpu.memory_space<vmem>>, %arg4: memref<1x128xf32, #tpu.memory_space<vmem>>, %arg5: memref<128x128xbf16, #tpu.memory_space<vmem>>, %arg6: memref<1x128xf32, #tpu.memory_space<vmem>>, %arg7: memref<128x128xbf16, #tpu.memory_space<vmem>>, %arg8: memref<128x128xf32, #tpu.memory_space<vmem>>, %arg9: memref<128x1xf32, #tpu.memory_space<vmem>>, %arg10: memref<128x1xf32, #tpu.memory_space<vmem>>) attributes {dimension_semantics = [#tpu.dimension_semantics<parallel>, #tpu.dimension_semantics<arbitrary>], iteration_bounds = array<i64: 1, 1>, scalar_prefetch = 0 : i64, scratch_operands = 3 : i64, tpu.core_type = #tpu.core_type<tc>, window_params = [{transform_indices = @transform_0, window_bounds = array<i64: 128, 128>}, {transform_indices = @transform_1, window_bounds = array<i64: 128, 1>}, {transform_indices = @transform_2, window_bounds = array<i64: 1, 128>}, {transform_indices = @transform_3, window_bounds = array<i64: 128, 128>}, {pipeline_mode = #tpu.pipeline_mode<synchronous>, transform_indices = @transform_4, window_bounds = array<i64: 1, 128>}, {transform_indices = @transform_5, window_bounds = array<i64: 128, 128>}]} {
    %c0_i32 = arith.constant 0 : i32
    %0 = arith.cmpi eq, %arg1, %c0_i32 : i32
    %1 = arith.extui %0 : i1 to i32
    %c0_i32_0 = arith.constant 0 : i32
    %2 = arith.cmpi ne, %1, %c0_i32_0 : i32
    scf.if %2 {
      %cst_25 = arith.constant -1.000000e+30 : f32
      %41 = vector.broadcast %cst_25 : f32 to vector<128x1xf32>
      %c0_26 = arith.constant 0 : index
      %c0_27 = arith.constant 0 : index
      %42 = vector.load %arg9[%c0_26, %c0_27] : memref<128x1xf32, #tpu.memory_space<vmem>>, vector<128x1xf32>
      tpu.vector_store %arg9[%c0_26, %c0_27], %41 {strides = array<i32>} : memref<128x1xf32, #tpu.memory_space<vmem>>, vector<128x1xf32>,
      %cst_28 = arith.constant 0.000000e+00 : f32
      %43 = vector.broadcast %cst_28 : f32 to vector<128x1xf32>
      %c0_29 = arith.constant 0 : index
      %c0_30 = arith.constant 0 : index
      %44 = vector.load %arg10[%c0_29, %c0_30] : memref<128x1xf32, #tpu.memory_space<vmem>>, vector<128x1xf32>
      tpu.vector_store %arg10[%c0_29, %c0_30], %43 {strides = array<i32>} : memref<128x1xf32, #tpu.memory_space<vmem>>, vector<128x1xf32>,
      %cst_31 = arith.constant 0.000000e+00 : f32
      %45 = vector.broadcast %cst_31 : f32 to vector<128x128xf32>
      %c0_32 = arith.constant 0 : index
      %c0_33 = arith.constant 0 : index
      %46 = vector.load %arg8[%c0_32, %c0_33] : memref<128x128xf32, #tpu.memory_space<vmem>>, vector<128x128xf32>
      tpu.vector_store %arg8[%c0_32, %c0_33], %45 {strides = array<i32>} : memref<128x128xf32, #tpu.memory_space<vmem>>, vector<128x128xf32>,
    } else {
    }
    %c0 = arith.constant 0 : index
    %c0_1 = arith.constant 0 : index
    %3 = vector.load %arg3[%c0, %c0_1] : memref<128x1xf32, #tpu.memory_space<vmem>>, vector<128x1xf32>
    %c0_2 = arith.constant 0 : index
    %c0_3 = arith.constant 0 : index
    %4 = vector.load %arg4[%c0_2, %c0_3] : memref<1x128xf32, #tpu.memory_space<vmem>>, vector<1x128xf32>
    %5 = vector.broadcast %3 : vector<128x1xf32> to vector<128x128xf32>
    %6 = vector.broadcast %4 : vector<1x128xf32> to vector<128x128xf32>
    %7 = arith.addf %5, %6 : vector<128x128xf32>
    %c0_4 = arith.constant 0 : index
    %c0_5 = arith.constant 0 : index
    %8 = vector.load %arg2[%c0_4, %c0_5] : memref<128x128xbf16, #tpu.memory_space<vmem>>, vector<128x128xbf16>
    %9 = arith.extf %8 : vector<128x128xbf16> to vector<128x128xf32>
    %10 = arith.addf %7, %9 : vector<128x128xf32>
    %cst = arith.constant 2.000000e-01 : f32
    %11 = vector.broadcast %cst : f32 to vector<128x128xf32>
    %12 = arith.mulf %11, %10 : vector<128x128xf32>
    %13 = arith.maximumf %10, %12 : vector<128x128xf32>
    %c0_6 = arith.constant 0 : index
    %c0_7 = arith.constant 0 : index
    %14 = vector.load %arg9[%c0_6, %c0_7] : memref<128x1xf32, #tpu.memory_space<vmem>>, vector<128x1xf32>
    %cst_8 = arith.constant dense<0xFF800000> : vector<128xf32>
    %15 = vector.multi_reduction <maximumf>, %13, %cst_8 [1] : vector<128x128xf32> to vector<128xf32>
    %16 = vector.shape_cast %15 : vector<128xf32> to vector<128x1xf32>
    %17 = arith.maximumf %14, %16 : vector<128x1xf32>
    %18 = arith.subf %14, %17 : vector<128x1xf32>
    %19 = math.exp %18 : vector<128x1xf32>
    %20 = vector.broadcast %17 : vector<128x1xf32> to vector<128x128xf32>
    %21 = arith.subf %13, %20 : vector<128x128xf32>
    %22 = math.exp %21 : vector<128x128xf32>
    %c0_9 = arith.constant 0 : index
    %c0_10 = arith.constant 0 : index
    %23 = vector.load %arg10[%c0_9, %c0_10] : memref<128x1xf32, #tpu.memory_space<vmem>>, vector<128x1xf32>
    %24 = arith.mulf %19, %23 : vector<128x1xf32>
    %cst_11 = arith.constant dense<0.000000e+00> : vector<128xf32>
    %25 = vector.multi_reduction <add>, %22, %cst_11 [1] : vector<128x128xf32> to vector<128xf32>
    %26 = vector.shape_cast %25 : vector<128xf32> to vector<128x1xf32>
    %27 = arith.addf %24, %26 : vector<128x1xf32>
    %c0_12 = arith.constant 0 : index
    %c0_13 = arith.constant 0 : index
    %28 = vector.load %arg10[%c0_12, %c0_13] : memref<128x1xf32, #tpu.memory_space<vmem>>, vector<128x1xf32>
    tpu.vector_store %arg10[%c0_12, %c0_13], %27 {strides = array<i32>} : memref<128x1xf32, #tpu.memory_space<vmem>>, vector<128x1xf32>,
    %c0_14 = arith.constant 0 : index
    %c0_15 = arith.constant 0 : index
    %29 = vector.load %arg8[%c0_14, %c0_15] : memref<128x128xf32, #tpu.memory_space<vmem>>, vector<128x128xf32>
    %30 = vector.broadcast %19 : vector<128x1xf32> to vector<128x128xf32>
    %31 = arith.mulf %30, %29 : vector<128x128xf32>
    %32 = arith.truncf %22 : vector<128x128xf32> to vector<128x128xbf16>
    %c0_16 = arith.constant 0 : index
    %c0_17 = arith.constant 0 : index
    %33 = vector.load %arg5[%c0_16, %c0_17] : memref<128x128xbf16, #tpu.memory_space<vmem>>, vector<128x128xbf16>
    %cst_18 = arith.constant dense<0.000000e+00> : vector<128x128xf32>
    %34 = tpu.matmul %32, %33, %cst_18 {dimension_numbers = #tpu.dot_dimension_numbers<[1], [0], [0], [1], [0, 0, 1, 1], [], []>} : vector<128x128xbf16>, vector<128x128xbf16>, vector<128x128xf32> -> vector<128x128xf32>
    %35 = arith.addf %31, %34 : vector<128x128xf32>
    %c0_19 = arith.constant 0 : index
    %c0_20 = arith.constant 0 : index
    %36 = vector.load %arg8[%c0_19, %c0_20] : memref<128x128xf32, #tpu.memory_space<vmem>>, vector<128x128xf32>
    tpu.vector_store %arg8[%c0_19, %c0_20], %35 {strides = array<i32>} : memref<128x128xf32, #tpu.memory_space<vmem>>, vector<128x128xf32>,
    %c0_21 = arith.constant 0 : index
    %c0_22 = arith.constant 0 : index
    %37 = vector.load %arg9[%c0_21, %c0_22] : memref<128x1xf32, #tpu.memory_space<vmem>>, vector<128x1xf32>
    tpu.vector_store %arg9[%c0_21, %c0_22], %17 {strides = array<i32>} : memref<128x1xf32, #tpu.memory_space<vmem>>, vector<128x1xf32>,
    %c0_i32_23 = arith.constant 0 : i32
    %38 = arith.cmpi eq, %arg1, %c0_i32_23 : i32
    %39 = arith.extui %38 : i1 to i32
    %c0_i32_24 = arith.constant 0 : i32
    %40 = arith.cmpi ne, %39, %c0_i32_24 : i32
    scf.if %40 {
      %c0_25 = arith.constant 0 : index
      %c0_26 = arith.constant 0 : index
      %41 = vector.load %arg8[%c0_25, %c0_26] : memref<128x128xf32, #tpu.memory_space<vmem>>, vector<128x128xf32>
      %c0_27 = arith.constant 0 : index
      %c0_28 = arith.constant 0 : index
      %42 = vector.load %arg10[%c0_27, %c0_28] : memref<128x1xf32, #tpu.memory_space<vmem>>, vector<128x1xf32>
      %43 = tpu.reciprocal %42 {approx = true} : vector<128x1xf32> -> vector<128x1xf32>
      %44 = vector.broadcast %43 : vector<128x1xf32> to vector<128x128xf32>
      %45 = arith.mulf %41, %44 : vector<128x128xf32>
      %c0_29 = arith.constant 0 : index
      %c0_30 = arith.constant 0 : index
      %46 = vector.load %arg6[%c0_29, %c0_30] : memref<1x128xf32, #tpu.memory_space<vmem>>, vector<1x128xf32>
      %47 = vector.broadcast %46 : vector<1x128xf32> to vector<128x128xf32>
      %48 = arith.addf %45, %47 : vector<128x128xf32>
      %49 = arith.truncf %48 : vector<128x128xf32> to vector<128x128xbf16>
      %c0_31 = arith.constant 0 : index
      %c0_32 = arith.constant 0 : index
      %50 = vector.load %arg7[%c0_31, %c0_32] : memref<128x128xbf16, #tpu.memory_space<vmem>>, vector<128x128xbf16>
      tpu.vector_store %arg7[%c0_31, %c0_32], %49 {strides = array<i32>} : memref<128x128xbf16, #tpu.memory_space<vmem>>, vector<128x128xbf16>,
    } else {
    }
    return
  }
  func.func @transform_0(%arg0: i32, %arg1: i32) -> (i32, i32) {
    %c0_i32 = arith.constant 0 : i32
    return %arg0, %arg1 : i32, i32
  }
  func.func @transform_1(%arg0: i32, %arg1: i32) -> (i32, i32) {
    %c0_i32 = arith.constant 0 : i32
    %c0_i32_0 = arith.constant 0 : i32
    return %arg0, %c0_i32 : i32, i32
  }
  func.func @transform_2(%arg0: i32, %arg1: i32) -> (i32, i32) {
    %c0_i32 = arith.constant 0 : i32
    %c0_i32_0 = arith.constant 0 : i32
    return %c0_i32, %arg1 : i32, i32
  }
  func.func @transform_3(%arg0: i32, %arg1: i32) -> (i32, i32) {
    %c0_i32 = arith.constant 0 : i32
    %c0_i32_0 = arith.constant 0 : i32
    return %arg1, %c0_i32 : i32, i32
  }
  func.func @transform_4(%arg0: i32, %arg1: i32) -> (i32, i32) {
    %c0_i32 = arith.constant 0 : i32
    %c0_i32_0 = arith.constant 0 : i32
    %c0_i32_1 = arith.constant 0 : i32
    return %c0_i32, %c0_i32_0 : i32, i32
  }
  func.func @transform_5(%arg0: i32, %arg1: i32) -> (i32, i32) {
    %c0_i32 = arith.constant 0 : i32
    %c0_i32_0 = arith.constant 0 : i32
    return %arg0, %c0_i32 : i32, i32
  }
}

module attributes {stable_mosaic.version = 11 : i64} {
  func.func @_attn_pool_kernel(%arg0: i32, %arg1: memref<128x128xbf16, #tpu.memory_space<vmem>>, %arg2: memref<128x128xbf16, #tpu.memory_space<vmem>>, %arg3: memref<128x128xbf16, #tpu.memory_space<vmem>>, %arg4: memref<128x128xbf16, #tpu.memory_space<vmem>>, %arg5: memref<128x128xbf16, #tpu.memory_space<vmem>>, %arg6: memref<1x128xf32, #tpu.memory_space<vmem>>, %arg7: memref<1x128xf32, #tpu.memory_space<vmem>>, %arg8: memref<1x128xf32, #tpu.memory_space<vmem>>, %arg9: memref<8x128xf32, #tpu.memory_space<vmem>>, %arg10: memref<8x128xf32, #tpu.memory_space<vmem>>, %arg11: memref<8x128xf32, #tpu.memory_space<vmem>>) attributes {dimension_semantics = [#tpu.dimension_semantics<parallel>], iteration_bounds = array<i64: 1>, scalar_prefetch = 0 : i64, scratch_operands = 0 : i64, tpu.core_type = #tpu.core_type<tc>, window_params = [{transform_indices = @transform_0, window_bounds = array<i64: 128, 128>}, {transform_indices = @transform_1, window_bounds = array<i64: 128, 128>}, {pipeline_mode = #tpu.pipeline_mode<synchronous>, transform_indices = @transform_2, window_bounds = array<i64: 128, 128>}, {pipeline_mode = #tpu.pipeline_mode<synchronous>, transform_indices = @transform_3, window_bounds = array<i64: 128, 128>}, {pipeline_mode = #tpu.pipeline_mode<synchronous>, transform_indices = @transform_4, window_bounds = array<i64: 128, 128>}, {pipeline_mode = #tpu.pipeline_mode<synchronous>, transform_indices = @transform_5, window_bounds = array<i64: 1, 128>}, {pipeline_mode = #tpu.pipeline_mode<synchronous>, transform_indices = @transform_6, window_bounds = array<i64: 1, 128>}, {pipeline_mode = #tpu.pipeline_mode<synchronous>, transform_indices = @transform_7, window_bounds = array<i64: 1, 128>}, {transform_indices = @transform_8, window_bounds = array<i64: 8, 128>}, {transform_indices = @transform_9, window_bounds = array<i64: 8, 128>}, {transform_indices = @transform_10, window_bounds = array<i64: 8, 128>}]} {
    %c0 = arith.constant 0 : index
    %c0_0 = arith.constant 0 : index
    %0 = vector.load %arg1[%c0, %c0_0] : memref<128x128xbf16, #tpu.memory_space<vmem>>, vector<128x128xbf16>
    %c0_1 = arith.constant 0 : index
    %c0_2 = arith.constant 0 : index
    %1 = vector.load %arg2[%c0_1, %c0_2] : memref<128x128xbf16, #tpu.memory_space<vmem>>, vector<128x128xbf16>
    %c0_3 = arith.constant 0 : index
    %c0_4 = arith.constant 0 : index
    %2 = vector.load %arg3[%c0_3, %c0_4] : memref<128x128xbf16, #tpu.memory_space<vmem>>, vector<128x128xbf16>
    %cst = arith.constant dense<0.000000e+00> : vector<128x128xf32>
    %3 = tpu.matmul %0, %2, %cst {dimension_numbers = #tpu.dot_dimension_numbers<[1], [0], [0], [1], [0, 0, 1, 1], [], []>} : vector<128x128xbf16>, vector<128x128xbf16>, vector<128x128xf32> -> vector<128x128xf32>
    %c0_5 = arith.constant 0 : index
    %c0_6 = arith.constant 0 : index
    %4 = vector.load %arg6[%c0_5, %c0_6] : memref<1x128xf32, #tpu.memory_space<vmem>>, vector<1x128xf32>
    %5 = vector.broadcast %4 : vector<1x128xf32> to vector<128x128xf32>
    %6 = arith.addf %3, %5 : vector<128x128xf32>
    %c0_7 = arith.constant 0 : index
    %c0_8 = arith.constant 0 : index
    %7 = vector.load %arg4[%c0_7, %c0_8] : memref<128x128xbf16, #tpu.memory_space<vmem>>, vector<128x128xbf16>
    %cst_9 = arith.constant dense<0.000000e+00> : vector<128x128xf32>
    %8 = tpu.matmul %1, %7, %cst_9 {dimension_numbers = #tpu.dot_dimension_numbers<[1], [0], [0], [1], [0, 0, 1, 1], [], []>} : vector<128x128xbf16>, vector<128x128xbf16>, vector<128x128xf32> -> vector<128x128xf32>
    %c0_10 = arith.constant 0 : index
    %c0_11 = arith.constant 0 : index
    %9 = vector.load %arg7[%c0_10, %c0_11] : memref<1x128xf32, #tpu.memory_space<vmem>>, vector<1x128xf32>
    %10 = vector.broadcast %9 : vector<1x128xf32> to vector<128x128xf32>
    %11 = arith.addf %8, %10 : vector<128x128xf32>
    %c0_12 = arith.constant 0 : index
    %c0_13 = arith.constant 0 : index
    %12 = vector.load %arg5[%c0_12, %c0_13] : memref<128x128xbf16, #tpu.memory_space<vmem>>, vector<128x128xbf16>
    %cst_14 = arith.constant dense<0.000000e+00> : vector<128x128xf32>
    %13 = tpu.matmul %1, %12, %cst_14 {dimension_numbers = #tpu.dot_dimension_numbers<[1], [0], [0], [1], [0, 0, 1, 1], [], []>} : vector<128x128xbf16>, vector<128x128xbf16>, vector<128x128xf32> -> vector<128x128xf32>
    %c0_15 = arith.constant 0 : index
    %c0_16 = arith.constant 0 : index
    %14 = vector.load %arg8[%c0_15, %c0_16] : memref<1x128xf32, #tpu.memory_space<vmem>>, vector<1x128xf32>
    %15 = vector.broadcast %14 : vector<1x128xf32> to vector<128x128xf32>
    %16 = arith.addf %13, %15 : vector<128x128xf32>
    %17 = arith.mulf %6, %11 : vector<128x128xf32>
    %cst_17 = arith.constant dense<0.000000e+00> : vector<128xf32>
    %18 = vector.multi_reduction <add>, %17, %cst_17 [1] : vector<128x128xf32> to vector<128xf32>
    %19 = vector.shape_cast %18 : vector<128xf32> to vector<128x1xf32>
    %cst_18 = arith.constant 0.176776692 : f32
    %20 = vector.broadcast %cst_18 : f32 to vector<128x1xf32>
    %21 = arith.mulf %19, %20 : vector<128x1xf32>
    %c128_i32 = arith.constant 128 : i32
    %22 = arith.muli %arg0, %c128_i32 : i32
    %23 = tpu.iota {dimensions = array<i32: 0>} : vector<128x1xi32>
    %24 = vector.broadcast %22 : i32 to vector<128x1xi32>
    %25 = arith.addi %24, %23 : vector<128x1xi32>
    %c8_i32 = arith.constant 8 : i32
    %26 = vector.broadcast %c8_i32 : i32 to vector<128x1xi32>
    %27 = arith.cmpi slt, %25, %26 : vector<128x1xi32>
    %cst_19 = arith.constant -1.000000e+30 : f32
    %28 = vector.broadcast %cst_19 : f32 to vector<128x1xf32>
    %29 = arith.select %27, %21, %28 : vector<128x1xi1>, vector<128x1xf32>
    %cst_20 = arith.constant dense<0xFF800000> : vector<1xf32>
    %30 = vector.multi_reduction <maximumf>, %29, %cst_20 [0] : vector<128x1xf32> to vector<1xf32>
    %31 = vector.shape_cast %30 : vector<1xf32> to vector<1x1xf32>
    %32 = vector.broadcast %31 : vector<1x1xf32> to vector<128x1xf32>
    %33 = arith.subf %29, %32 : vector<128x1xf32>
    %34 = math.exp %33 : vector<128x1xf32>
    %cst_21 = arith.constant 0.000000e+00 : f32
    %35 = vector.broadcast %cst_21 : f32 to vector<128x1xf32>
    %36 = arith.select %27, %34, %35 : vector<128x1xi1>, vector<128x1xf32>
    %cst_22 = arith.constant dense<0.000000e+00> : vector<1xf32>
    %37 = vector.multi_reduction <add>, %36, %cst_22 [0] : vector<128x1xf32> to vector<1xf32>
    %38 = vector.shape_cast %37 : vector<1xf32> to vector<1x1xf32>
    %39 = vector.broadcast %36 : vector<128x1xf32> to vector<128x128xf32>
    %40 = arith.mulf %39, %16 : vector<128x128xf32>
    %cst_23 = arith.constant dense<0.000000e+00> : vector<128xf32>
    %41 = vector.multi_reduction <add>, %40, %cst_23 [0] : vector<128x128xf32> to vector<128xf32>
    %42 = vector.shape_cast %41 : vector<128xf32> to vector<1x128xf32>
    %43 = vector.shape_cast %42 : vector<1x128xf32> to vector<1x128xf32>
    %44 = vector.broadcast %43 : vector<1x128xf32> to vector<8x128xf32>
    %c0_24 = arith.constant 0 : index
    %c0_25 = arith.constant 0 : index
    %45 = vector.load %arg9[%c0_24, %c0_25] : memref<8x128xf32, #tpu.memory_space<vmem>>, vector<8x128xf32>
    tpu.vector_store %arg9[%c0_24, %c0_25], %44 {strides = array<i32>} : memref<8x128xf32, #tpu.memory_space<vmem>>, vector<8x128xf32>,
    %46 = vector.shape_cast %31 : vector<1x1xf32> to vector<1x1xf32>
    %47 = vector.broadcast %46 : vector<1x1xf32> to vector<8x128xf32>
    %c0_26 = arith.constant 0 : index
    %c0_27 = arith.constant 0 : index
    %48 = vector.load %arg10[%c0_26, %c0_27] : memref<8x128xf32, #tpu.memory_space<vmem>>, vector<8x128xf32>
    tpu.vector_store %arg10[%c0_26, %c0_27], %47 {strides = array<i32>} : memref<8x128xf32, #tpu.memory_space<vmem>>, vector<8x128xf32>,
    %49 = vector.shape_cast %38 : vector<1x1xf32> to vector<1x1xf32>
    %50 = vector.broadcast %49 : vector<1x1xf32> to vector<8x128xf32>
    %c0_28 = arith.constant 0 : index
    %c0_29 = arith.constant 0 : index
    %51 = vector.load %arg11[%c0_28, %c0_29] : memref<8x128xf32, #tpu.memory_space<vmem>>, vector<8x128xf32>
    tpu.vector_store %arg11[%c0_28, %c0_29], %50 {strides = array<i32>} : memref<8x128xf32, #tpu.memory_space<vmem>>, vector<8x128xf32>,
    return
  }
  func.func @transform_0(%arg0: i32) -> (i32, i32) {
    %c0_i32 = arith.constant 0 : i32
    %c0_i32_0 = arith.constant 0 : i32
    return %arg0, %c0_i32 : i32, i32
  }
  func.func @transform_1(%arg0: i32) -> (i32, i32) {
    %c0_i32 = arith.constant 0 : i32
    %c0_i32_0 = arith.constant 0 : i32
    return %arg0, %c0_i32 : i32, i32
  }
  func.func @transform_2(%arg0: i32) -> (i32, i32) {
    %c0_i32 = arith.constant 0 : i32
    %c0_i32_0 = arith.constant 0 : i32
    %c0_i32_1 = arith.constant 0 : i32
    return %c0_i32, %c0_i32_0 : i32, i32
  }
  func.func @transform_3(%arg0: i32) -> (i32, i32) {
    %c0_i32 = arith.constant 0 : i32
    %c0_i32_0 = arith.constant 0 : i32
    %c0_i32_1 = arith.constant 0 : i32
    return %c0_i32, %c0_i32_0 : i32, i32
  }
  func.func @transform_4(%arg0: i32) -> (i32, i32) {
    %c0_i32 = arith.constant 0 : i32
    %c0_i32_0 = arith.constant 0 : i32
    %c0_i32_1 = arith.constant 0 : i32
    return %c0_i32, %c0_i32_0 : i32, i32
  }
  func.func @transform_5(%arg0: i32) -> (i32, i32) {
    %c0_i32 = arith.constant 0 : i32
    %c0_i32_0 = arith.constant 0 : i32
    %c0_i32_1 = arith.constant 0 : i32
    return %c0_i32, %c0_i32_0 : i32, i32
  }
  func.func @transform_6(%arg0: i32) -> (i32, i32) {
    %c0_i32 = arith.constant 0 : i32
    %c0_i32_0 = arith.constant 0 : i32
    %c0_i32_1 = arith.constant 0 : i32
    return %c0_i32, %c0_i32_0 : i32, i32
  }
  func.func @transform_7(%arg0: i32) -> (i32, i32) {
    %c0_i32 = arith.constant 0 : i32
    %c0_i32_0 = arith.constant 0 : i32
    %c0_i32_1 = arith.constant 0 : i32
    return %c0_i32, %c0_i32_0 : i32, i32
  }
  func.func @transform_8(%arg0: i32) -> (i32, i32) {
    %c0_i32 = arith.constant 0 : i32
    %c0_i32_0 = arith.constant 0 : i32
    return %arg0, %c0_i32 : i32, i32
  }
  func.func @transform_9(%arg0: i32) -> (i32, i32) {
    %c0_i32 = arith.constant 0 : i32
    %c0_i32_0 = arith.constant 0 : i32
    return %arg0, %c0_i32 : i32, i32
  }
  func.func @transform_10(%arg0: i32) -> (i32, i32) {
    %c0_i32 = arith.constant 0 : i32
    %c0_i32_0 = arith.constant 0 : i32
    return %arg0, %c0_i32 : i32, i32
  }
}

module attributes {stable_mosaic.version = 11 : i64} {
  func.func @_linear_bias_kernel(%arg0: i32, %arg1: memref<128x128xbf16, #tpu.memory_space<vmem>>, %arg2: memref<128x128xbf16, #tpu.memory_space<vmem>>, %arg3: memref<1x128xf32, #tpu.memory_space<vmem>>, %arg4: memref<128x128xf32, #tpu.memory_space<vmem>>) attributes {dimension_semantics = [#tpu.dimension_semantics<parallel>], iteration_bounds = array<i64: 1>, scalar_prefetch = 0 : i64, scratch_operands = 0 : i64, tpu.core_type = #tpu.core_type<tc>, window_params = [{transform_indices = @transform_0, window_bounds = array<i64: 128, 128>}, {pipeline_mode = #tpu.pipeline_mode<synchronous>, transform_indices = @transform_1, window_bounds = array<i64: 128, 128>}, {pipeline_mode = #tpu.pipeline_mode<synchronous>, transform_indices = @transform_2, window_bounds = array<i64: 1, 128>}, {transform_indices = @transform_3, window_bounds = array<i64: 128, 128>}]} {
    %c0 = arith.constant 0 : index
    %c0_0 = arith.constant 0 : index
    %0 = vector.load %arg1[%c0, %c0_0] : memref<128x128xbf16, #tpu.memory_space<vmem>>, vector<128x128xbf16>
    %c0_1 = arith.constant 0 : index
    %c0_2 = arith.constant 0 : index
    %1 = vector.load %arg2[%c0_1, %c0_2] : memref<128x128xbf16, #tpu.memory_space<vmem>>, vector<128x128xbf16>
    %cst = arith.constant dense<0.000000e+00> : vector<128x128xf32>
    %2 = tpu.matmul %0, %1, %cst {dimension_numbers = #tpu.dot_dimension_numbers<[1], [0], [0], [1], [0, 0, 1, 1], [], []>} : vector<128x128xbf16>, vector<128x128xbf16>, vector<128x128xf32> -> vector<128x128xf32>
    %c0_3 = arith.constant 0 : index
    %c0_4 = arith.constant 0 : index
    %3 = vector.load %arg3[%c0_3, %c0_4] : memref<1x128xf32, #tpu.memory_space<vmem>>, vector<1x128xf32>
    %4 = vector.broadcast %3 : vector<1x128xf32> to vector<128x128xf32>
    %5 = arith.addf %2, %4 : vector<128x128xf32>
    %c0_5 = arith.constant 0 : index
    %c0_6 = arith.constant 0 : index
    %6 = vector.load %arg4[%c0_5, %c0_6] : memref<128x128xf32, #tpu.memory_space<vmem>>, vector<128x128xf32>
    tpu.vector_store %arg4[%c0_5, %c0_6], %5 {strides = array<i32>} : memref<128x128xf32, #tpu.memory_space<vmem>>, vector<128x128xf32>,
    return
  }
  func.func @transform_0(%arg0: i32) -> (i32, i32) {
    %c0_i32 = arith.constant 0 : i32
    %c0_i32_0 = arith.constant 0 : i32
    return %arg0, %c0_i32 : i32, i32
  }
  func.func @transform_1(%arg0: i32) -> (i32, i32) {
    %c0_i32 = arith.constant 0 : i32
    %c0_i32_0 = arith.constant 0 : i32
    %c0_i32_1 = arith.constant 0 : i32
    return %c0_i32, %c0_i32_0 : i32, i32
  }
  func.func @transform_2(%arg0: i32) -> (i32, i32) {
    %c0_i32 = arith.constant 0 : i32
    %c0_i32_0 = arith.constant 0 : i32
    %c0_i32_1 = arith.constant 0 : i32
    return %c0_i32, %c0_i32_0 : i32, i32
  }
  func.func @transform_3(%arg0: i32) -> (i32, i32) {
    %c0_i32 = arith.constant 0 : i32
    %c0_i32_0 = arith.constant 0 : i32
    return %arg0, %c0_i32 : i32, i32
  }
}

</mosaic_0001>

<bundles_post_ra>
// kernel: caugramer_forward.5
= control target key start
LH: loop header
LB: loop body
LE: loop exit
PB: predicated region body
PF: predicated region fallthrough
CT: control target
= control target key end

     0   :  { %vm390_vm0 = vcmask 7168   ;;  %s1062_s1 = inlined_call_operand.vmem [shape: bf16[128,128], index: 1, kind: input, shape index: {}]   ;;  %s1063_s0 = inlined_call_operand.vmem [shape: bf16[128,128], index: 0, kind: input, shape index: {}]   ;;  %s1064_s2 = inlined_call_operand.vmem [shape: bf16[128,1], index: 2, kind: input, shape index: {}]   ;;  %s1065_s3 = inlined_call_operand.vmem [shape: bf16[128,1], index: 3, kind: input, shape index: {}]   ;;  %s1066_s4 = inlined_call_operand.vmem [shape: bf16[128,128], index: 4, kind: output, shape index: {0}]   ;;  %s1067_s5 = inlined_call_operand.vmem [shape: f32[128,1], index: 5, kind: output, shape index: {1}]   ;;  %s1068_s6 = inlined_call_operand.vmem [shape: f32[128,1], index: 6, kind: output, shape index: {2}]  }
   0x1   :  { %v691_v0 = vld [vmem:[%s1062_s1 + $0x38] sm:$0xff]  ;;  %v690_v1 = vld [vmem:[%s1062_s1 + $0x30] sm:$0xff]  ;;  %v689_v2 = vld [vmem:[%s1062_s1 + $0x28] sm:$0xff] }
   0x2   :  { %148 = vmatpush.bf16.msra.mxu0 %v691_v0  ;;  %755 = vmatpush.bf16.msra.mxu3 %v691_v0  ;;  %v688_v3 = vld [vmem:[%s1062_s1 + $0x20] sm:$0xff]  ;;  %v687_v4 = vld [vmem:[%s1062_s1 + $0x18] sm:$0xff]  ;;  %v686_v5 = vld [vmem:[%s1062_s1 + $0x10] sm:$0xff] }
   0x3   :  { %v685_v6 = vld [vmem:[%s1062_s1 + $0x8] sm:$0xff]  ;;  %v684_v7 = vld [vmem:[%s1062_s1] sm:$0xff]  ;;  %v682_v9 = vld [vmem:[%s1063_s0 + $0x30] sm:$0xff] }
   0x4   :  { %v676_v8 = vld [vmem:[%s1063_s0] sm:$0xff]  ;;  %v677_v10 = vld [vmem:[%s1063_s0 + $0x8] sm:$0xff]  ;;  %v683_v11 = vld [vmem:[%s1063_s0 + $0x38] sm:$0xff] }
   0x5   :  { %v678_v12 = vld [vmem:[%s1063_s0 + $0x10] sm:$0xff]  ;;  %v679_v13 = vld [vmem:[%s1063_s0 + $0x18] sm:$0xff]  ;;  %v697_v18 = vld [vmem:[%s1064_s2 + $0x28] sm:$0xff] }
   0x6   :  { %149 = vmatpush.bf16.msra.mxu0 %v690_v1  ;;  %756 = vmatpush.bf16.msra.mxu3 %v690_v1  ;;  %v699_v14 = vld [vmem:[%s1064_s2 + $0x38] sm:$0xff]  ;;  %v698_v16 = vld [vmem:[%s1064_s2 + $0x30] sm:$0xff]  ;;  %v705_v19 = vld [vmem:[%s1065_s3 + $0x28] sm:$0xff] }
   0x7   :  { %v707_v15 = vld [vmem:[%s1065_s3 + $0x38] sm:$0xff]  ;;  %341 = vmatpush.bf16.msra.mxu1 %v699_v14  ;;  %v706_v17 = vld [vmem:[%s1065_s3 + $0x30] sm:$0xff]  ;;  %v696_v20 = vld [vmem:[%s1064_s2 + $0x20] sm:$0xff] }
   0x8   :  { %471 = vmatpush.bf16.msra.mxu2 %v707_v15  ;;  %v704_v21 = vld [vmem:[%s1065_s3 + $0x20] sm:$0xff]  ;;  %v681_v23 = vld [vmem:[%s1063_s0 + $0x28] sm:$0xff]  ;;  %v695_v24 = vld [vmem:[%s1064_s2 + $0x18] sm:$0xff] }
   0x9   :  { %v680_v22 = vld [vmem:[%s1063_s0 + $0x20] sm:$0xff]  ;;  %v703_v25 = vld [vmem:[%s1065_s3 + $0x18] sm:$0xff]  ;;  %v694_v26 = vld [vmem:[%s1064_s2 + $0x10] sm:$0xff] }
   0xa   :  { %150 = vmatpush.bf16.msra.mxu0 %v689_v2  ;;  %757 = vmatpush.bf16.msra.mxu3 %v689_v2  ;;  %v702_v27 = vld [vmem:[%s1065_s3 + $0x10] sm:$0xff]  ;;  %v693_v28 = vld [vmem:[%s1064_s2 + $0x8] sm:$0xff]  ;;  %v692_v30 = vld [vmem:[%s1064_s2] sm:$0xff] }
   0xb   :  { %342 = vmatpush.bf16.msra.mxu1 %v698_v16  ;;  %v701_v29 = vld [vmem:[%s1065_s3 + $0x8] sm:$0xff]  ;;  %v700_v31 = vld [vmem:[%s1065_s3] sm:$0xff] }
   0xc   :  { %472 = vmatpush.bf16.msra.mxu2 %v706_v17 }
   0xe   :  { %151 = vmatpush.bf16.msra.mxu0 %v688_v3  ;;  %758 = vmatpush.bf16.msra.mxu3 %v688_v3 }
   0xf   :  { %343 = vmatpush.bf16.msra.mxu1 %v697_v18 }
  0x10   :  { %473 = vmatpush.bf16.msra.mxu2 %v705_v19 }
  0x12   :  { %152 = vmatpush.bf16.msra.mxu0 %v687_v4  ;;  %759 = vmatpush.bf16.msra.mxu3 %v687_v4 }
  0x13   :  { %344 = vmatpush.bf16.msra.mxu1 %v696_v20 }
  0x14   :  { %474 = vmatpush.bf16.msra.mxu2 %v704_v21 }
  0x16   :  { %153 = vmatpush.bf16.msra.mxu0 %v686_v5  ;;  %760 = vmatpush.bf16.msra.mxu3 %v686_v5 }
  0x17   :  { %345 = vmatpush.bf16.msra.mxu1 %v695_v24 }
  0x18   :  { %475 = vmatpush.bf16.msra.mxu2 %v703_v25 }
  0x1a   :  { %154 = vmatpush.bf16.msra.mxu0 %v685_v6  ;;  %761 = vmatpush.bf16.msra.mxu3 %v685_v6 }
  0x1b   :  { %346 = vmatpush.bf16.msra.mxu1 %v694_v26 }
  0x1c   :  { %476 = vmatpush.bf16.msra.mxu2 %v702_v27 }
  0x1e   :  { %155 = vmatpush.bf16.msra.mxu0 %v684_v7  ;;  %762 = vmatpush.bf16.msra.mxu3 %v684_v7 }
  0x1f   :  { %347 = vmatpush.bf16.msra.mxu1 %v693_v28 }
  0x20   :  { %477 = vmatpush.bf16.msra.mxu2 %v701_v29 }
  0x21   :  { %156 = vmatmul.bf16.vlgmr.msra.gmra.mxu0 %v676_v8  ;;  %186 = vmatmul.bf16.vlgmr.msra.gmra.mxu3 %v682_v9 }
  0x22   :  { %763 = vmatpush.bf16.msrb.mxu3 %v699_v14 }
  0x23   :  { %348 = vmatpush.bf16.msra.mxu1 %v692_v30 }
  0x24   :  { %478 = vmatpush.bf16.msra.mxu2 %v700_v31 }
  0x26   :  { %764 = vmatpush.bf16.msrb.mxu3 %v698_v16 }
  0x2a   :  { %765 = vmatpush.bf16.msrb.mxu3 %v697_v18 }
  0x2e   :  { %766 = vmatpush.bf16.msrb.mxu3 %v696_v20 }
  0x31   :  { %161 = vmatmul.bf16.gmra.mxu0 %v677_v10  ;;  %191 = vmatmul.bf16.gmra.mxu3 %v683_v11 }
  0x32   :  { %767 = vmatpush.bf16.msrb.mxu3 %v695_v24 }
  0x36   :  { %768 = vmatpush.bf16.msrb.mxu3 %v694_v26 }
  0x3a   :  { %769 = vmatpush.bf16.msrb.mxu3 %v693_v28 }
  0x3e   :  { %770 = vmatpush.bf16.msrb.mxu3 %v692_v30 }
  0x41   :  { %166 = vmatmul.bf16.gmra.mxu0 %v678_v12 }
  0x42   :  { %771 = vmatpush.bf16.msra.mxu3 %v707_v15 }
  0x46   :  { %772 = vmatpush.bf16.msra.mxu3 %v706_v17 }
  0x4a   :  { %773 = vmatpush.bf16.msra.mxu3 %v705_v19 }
  0x4e   :  { %774 = vmatpush.bf16.msra.mxu3 %v704_v21 }
  0x51   :  { %171 = vmatmul.bf16.gmra.mxu0 %v679_v13 }
  0x52   :  { %775 = vmatpush.bf16.msra.mxu3 %v703_v25 }
  0x56   :  { %776 = vmatpush.bf16.msra.mxu3 %v702_v27 }
  0x5a   :  { %777 = vmatpush.bf16.msra.mxu3 %v701_v29 }
  0x5e   :  { %778 = vmatpush.bf16.msra.mxu3 %v700_v31 }
  0x61   :  { %176 = vmatmul.bf16.gmra.mxu0 %v680_v22 }
  0x71   :  { %181 = vmatmul.bf16.gmra.mxu0 %v681_v23 }
  0x9e   :  { %v157_v32 = vpop.f32.mrf.mxu0 }
  0x9f   :  { %v197_v34 = vpack.c.bf16 %v157_v32, %v157_v32 }
  0xa1   :  { %v261_v38 = vunpack.c.l.b16 %v197_v34 }
  0xa4   :  { %v187_v33 = vpop.f32.mrf.mxu3 }
  0xa5   :  { %v209_v39 = vpack.c.bf16 %v187_v33, %v187_v33 }
  0xa6   :  { %v159_v35 = vpop.f32.mrf.mxu0 }
  0xa7   :  { %v198_v36 = vpack.c.bf16 %v159_v35, %v159_v35  ;;  %v711_v37 = vpack.c.bf16 %v159_v35, %v157_v32  ;;  %v273_v43 = vunpack.c.l.b16 %v209_v39 }
  0xa9   :  { %712 = vst [vmem:[%s1066_s4] sm:$0xff] %v711_v37   ;;  %v262_v40 = vunpack.c.l.b16 %v198_v36 }
  0xab   :  { %v277_v41 = vpack.c.b16 %v262_v40, %v261_v38 }
  0xac   :  { %v189_v42 = vpop.f32.mrf.mxu3 }
  0xad   :  { %v210_v44 = vpack.c.bf16 %v189_v42, %v189_v42  ;;  %v741_v45 = vpack.c.bf16 %v189_v42, %v187_v33  ;;  %349 = vmatmul.bf16.vlgmr.msra.gmra.mxu1 %v277_v41  ;;  %479 = vmatmul.bf16.vlgmr.msra.gmra.mxu2 %v277_v41 }
  0xae   :  { %v162_v46 = vpop.f32.mrf.mxu0 }
  0xaf   :  { %753 = vst [vmem:[%s1066_s4 + $0x30] sm:$0xff] %v741_v45   ;;  %v274_v47 = vunpack.c.l.b16 %v210_v44  ;;  %v199_v50 = vpack.c.bf16 %v162_v46, %v162_v46 }
  0xb1   :  { %v283_v48 = vpack.c.b16 %v274_v47, %v273_v43  ;;  %v263_v54 = vunpack.c.l.b16 %v199_v50 }
  0xb3   :  { %379 = vmatmul.bf16.vlgmr.msrb.gmra.mxu3 %v283_v48 }
  0xb4   :  { %v192_v49 = vpop.f32.mrf.mxu3 }
  0xb5   :  { %v211_v55 = vpack.c.bf16 %v192_v49, %v192_v49 }
  0xb6   :  { %v164_v51 = vpop.f32.mrf.mxu0 }
  0xb7   :  { %v200_v52 = vpack.c.bf16 %v164_v51, %v164_v51  ;;  %v716_v53 = vpack.c.bf16 %v164_v51, %v162_v46  ;;  %v275_v59 = vunpack.c.l.b16 %v211_v55 }
  0xb9   :  { %748 = vst [vmem:[%s1066_s4 + $0x8] sm:$0xff] %v716_v53   ;;  %v264_v56 = vunpack.c.l.b16 %v200_v52 }
  0xbb   :  { %v278_v57 = vpack.c.b16 %v264_v56, %v263_v54 }
  0xbc   :  { %v194_v58 = vpop.f32.mrf.mxu3 }
  0xbd   :  { %v212_v60 = vpack.c.bf16 %v194_v58, %v194_v58  ;;  %v746_v61 = vpack.c.bf16 %v194_v58, %v192_v49  ;;  %354 = vmatmul.bf16.gmra.mxu1 %v278_v57  ;;  %484 = vmatmul.bf16.gmra.mxu2 %v278_v57 }
  0xbe   :  { %v167_v62 = vpop.f32.mrf.mxu0 }
  0xbf   :  { %754 = vst [vmem:[%s1066_s4 + $0x38] sm:$0xff] %v746_v61   ;;  %v276_v63 = vunpack.c.l.b16 %v212_v60  ;;  %v201_v1 = vpack.c.bf16 %v167_v62, %v167_v62 }
  0xc1   :  { %v284_v0 = vpack.c.b16 %v276_v63, %v275_v59  ;;  %v265_v5 = vunpack.c.l.b16 %v201_v1 }
  0xc3   :  { %384 = vmatmul.bf16.gmra.mxu3 %v284_v0 }
  0xc6   :  { %v169_v2 = vpop.f32.mrf.mxu0 }
  0xc7   :  { %v202_v3 = vpack.c.bf16 %v169_v2, %v169_v2  ;;  %v721_v4 = vpack.c.bf16 %v169_v2, %v167_v62 }
  0xc9   :  { %749 = vst [vmem:[%s1066_s4 + $0x10] sm:$0xff] %v721_v4   ;;  %v266_v6 = vunpack.c.l.b16 %v202_v3 }
  0xcb   :  { %v279_v7 = vpack.c.b16 %v266_v6, %v265_v5 }
  0xcd   :  { %359 = vmatmul.bf16.gmra.mxu1 %v279_v7  ;;  %489 = vmatmul.bf16.gmra.mxu2 %v279_v7 }
  0xce   :  { %v172_v8 = vpop.f32.mrf.mxu0 }
  0xcf   :  { %v203_v9 = vpack.c.bf16 %v172_v8, %v172_v8 }
  0xd1   :  { %v267_v13 = vunpack.c.l.b16 %v203_v9 }
  0xd3   :  { %509 = vmatmul.bf16.vlgmr.msra.gmra.mxu3 %v283_v48 }
  0xd6   :  { %v174_v10 = vpop.f32.mrf.mxu0 }
  0xd7   :  { %v204_v11 = vpack.c.bf16 %v174_v10, %v174_v10  ;;  %v726_v12 = vpack.c.bf16 %v174_v10, %v172_v8 }
  0xd9   :  { %750 = vst [vmem:[%s1066_s4 + $0x18] sm:$0xff] %v726_v12   ;;  %v268_v14 = vunpack.c.l.b16 %v204_v11 }
  0xdb   :  { %v280_v15 = vpack.c.b16 %v268_v14, %v267_v13 }
  0xdd   :  { %364 = vmatmul.bf16.gmra.mxu1 %v280_v15  ;;  %494 = vmatmul.bf16.gmra.mxu2 %v280_v15 }
  0xde   :  { %v177_v16 = vpop.f32.mrf.mxu0 }
  0xdf   :  { %v205_v17 = vpack.c.bf16 %v177_v16, %v177_v16 }
  0xe1   :  { %v269_v21 = vunpack.c.l.b16 %v205_v17 }
  0xe3   :  { %514 = vmatmul.bf16.gmra.mxu3 %v284_v0 }
  0xe6   :  { %v179_v18 = vpop.f32.mrf.mxu0 }
  0xe7   :  { %v206_v19 = vpack.c.bf16 %v179_v18, %v179_v18  ;;  %v731_v20 = vpack.c.bf16 %v179_v18, %v177_v16 }
  0xe9   :  { %751 = vst [vmem:[%s1066_s4 + $0x20] sm:$0xff] %v731_v20   ;;  %v270_v22 = vunpack.c.l.b16 %v206_v19 }
  0xeb   :  { %v281_v23 = vpack.c.b16 %v270_v22, %v269_v21 }
  0xed   :  { %369 = vmatmul.bf16.gmra.mxu1 %v281_v23  ;;  %499 = vmatmul.bf16.gmra.mxu2 %v281_v23 }
  0xee   :  { %v182_v24 = vpop.f32.mrf.mxu0 }
  0xef   :  { %v207_v25 = vpack.c.bf16 %v182_v24, %v182_v24 }
  0xf1   :  { %v271_v29 = vunpack.c.l.b16 %v207_v25 }
  0xf6   :  { %v184_v26 = vpop.f32.mrf.mxu0 }
  0xf7   :  { %v208_v27 = vpack.c.bf16 %v184_v26, %v184_v26  ;;  %v736_v28 = vpack.c.bf16 %v184_v26, %v182_v24 }
  0xf9   :  { %752 = vst [vmem:[%s1066_s4 + $0x28] sm:$0xff] %v736_v28   ;;  %v272_v30 = vunpack.c.l.b16 %v208_v27 }
  0xfb   :  { %v282_v31 = vpack.c.b16 %v272_v30, %v271_v29 }
  0xfd   :  { %374 = vmatmul.bf16.gmra.mxu1 %v282_v31  ;;  %504 = vmatmul.bf16.gmra.mxu2 %v282_v31 }
 0x12a   :  { %v350_v32 = vpop.f32.mrf.mxu1 }
 0x12b   :  { %391 = vst.msk [vmem:[%s1067_s5] sm:$0xff] %vm390_vm0, %v350_v32 }
 0x130   :  { %v480_v33 = vpop.f32.mrf.mxu2 }
 0x131   :  { %520 = vst.msk [vmem:[%s1068_s6] sm:$0xff] %vm390_vm0, %v480_v33 }
 0x132   :  { %v352_v34 = vpop.f32.mrf.mxu1 }
 0x133   :  { %392 = vst.msk [vmem:[%s1067_s5 + $0x8] sm:$0xff] %vm390_vm0, %v352_v34 }
 0x136   :  { %v380_v35 = vpop.f32.mrf.mxu3 }
 0x137   :  { %403 = vst.msk [vmem:[%s1067_s5 + $0x60] sm:$0xff] %vm390_vm0, %v380_v35 }
 0x138   :  { %v482_v36 = vpop.f32.mrf.mxu2 }
 0x139   :  { %521 = vst.msk [vmem:[%s1068_s6 + $0x8] sm:$0xff] %vm390_vm0, %v482_v36 }
 0x13a   :  { %v355_v37 = vpop.f32.mrf.mxu1 }
 0x13b   :  { %393 = vst.msk [vmem:[%s1067_s5 + $0x10] sm:$0xff] %vm390_vm0, %v355_v37 }
 0x13e   :  { %v382_v38 = vpop.f32.mrf.mxu3 }
 0x13f   :  { %404 = vst.msk [vmem:[%s1067_s5 + $0x68] sm:$0xff] %vm390_vm0, %v382_v38 }
 0x140   :  { %v485_v39 = vpop.f32.mrf.mxu2 }
 0x141   :  { %522 = vst.msk [vmem:[%s1068_s6 + $0x10] sm:$0xff] %vm390_vm0, %v485_v39 }
 0x142   :  { %v357_v40 = vpop.f32.mrf.mxu1 }
 0x143   :  { %394 = vst.msk [vmem:[%s1067_s5 + $0x18] sm:$0xff] %vm390_vm0, %v357_v40 }
 0x146   :  { %v385_v41 = vpop.f32.mrf.mxu3 }
 0x147   :  { %405 = vst.msk [vmem:[%s1067_s5 + $0x70] sm:$0xff] %vm390_vm0, %v385_v41 }
 0x148   :  { %v487_v42 = vpop.f32.mrf.mxu2 }
 0x149   :  { %523 = vst.msk [vmem:[%s1068_s6 + $0x18] sm:$0xff] %vm390_vm0, %v487_v42 }
 0x14a   :  { %v360_v43 = vpop.f32.mrf.mxu1 }
 0x14b   :  { %395 = vst.msk [vmem:[%s1067_s5 + $0x20] sm:$0xff] %vm390_vm0, %v360_v43 }
 0x14e   :  { %v387_v44 = vpop.f32.mrf.mxu3 }
 0x14f   :  { %406 = vst.msk [vmem:[%s1067_s5 + $0x78] sm:$0xff] %vm390_vm0, %v387_v44 }
 0x150   :  { %v490_v45 = vpop.f32.mrf.mxu2 }
 0x151   :  { %524 = vst.msk [vmem:[%s1068_s6 + $0x20] sm:$0xff] %vm390_vm0, %v490_v45 }
 0x152   :  { %v362_v46 = vpop.f32.mrf.mxu1 }
 0x153   :  { %396 = vst.msk [vmem:[%s1067_s5 + $0x28] sm:$0xff] %vm390_vm0, %v362_v46 }
 0x156   :  { %v510_v47 = vpop.f32.mrf.mxu3 }
 0x157   :  { %532 = vst.msk [vmem:[%s1068_s6 + $0x60] sm:$0xff] %vm390_vm0, %v510_v47 }
 0x158   :  { %v492_v48 = vpop.f32.mrf.mxu2 }
 0x159   :  { %525 = vst.msk [vmem:[%s1068_s6 + $0x28] sm:$0xff] %vm390_vm0, %v492_v48 }
 0x15a   :  { %v365_v49 = vpop.f32.mrf.mxu1 }
 0x15b   :  { %397 = vst.msk [vmem:[%s1067_s5 + $0x30] sm:$0xff] %vm390_vm0, %v365_v49 }
 0x15e   :  { %v512_v50 = vpop.f32.mrf.mxu3 }
 0x15f   :  { %533 = vst.msk [vmem:[%s1068_s6 + $0x68] sm:$0xff] %vm390_vm0, %v512_v50 }
 0x160   :  { %v495_v51 = vpop.f32.mrf.mxu2 }
 0x161   :  { %526 = vst.msk [vmem:[%s1068_s6 + $0x30] sm:$0xff] %vm390_vm0, %v495_v51 }
 0x162   :  { %v367_v52 = vpop.f32.mrf.mxu1 }
 0x163   :  { %398 = vst.msk [vmem:[%s1067_s5 + $0x38] sm:$0xff] %vm390_vm0, %v367_v52 }
 0x166   :  { %v515_v53 = vpop.f32.mrf.mxu3 }
 0x167   :  { %534 = vst.msk [vmem:[%s1068_s6 + $0x70] sm:$0xff] %vm390_vm0, %v515_v53 }
 0x168   :  { %v497_v54 = vpop.f32.mrf.mxu2 }
 0x169   :  { %527 = vst.msk [vmem:[%s1068_s6 + $0x38] sm:$0xff] %vm390_vm0, %v497_v54 }
 0x16a   :  { %v370_v55 = vpop.f32.mrf.mxu1 }
 0x16b   :  { %399 = vst.msk [vmem:[%s1067_s5 + $0x40] sm:$0xff] %vm390_vm0, %v370_v55 }
 0x16e   :  { %v517_v56 = vpop.f32.mrf.mxu3 }
 0x16f   :  { %535 = vst.msk [vmem:[%s1068_s6 + $0x78] sm:$0xff] %vm390_vm0, %v517_v56 }
 0x170   :  { %v500_v57 = vpop.f32.mrf.mxu2 }
 0x171   :  { %528 = vst.msk [vmem:[%s1068_s6 + $0x40] sm:$0xff] %vm390_vm0, %v500_v57 }
 0x172   :  { %v372_v58 = vpop.f32.mrf.mxu1 }
 0x173   :  { %400 = vst.msk [vmem:[%s1067_s5 + $0x48] sm:$0xff] %vm390_vm0, %v372_v58 }
 0x178   :  { %v502_v59 = vpop.f32.mrf.mxu2 }
 0x179   :  { %529 = vst.msk [vmem:[%s1068_s6 + $0x48] sm:$0xff] %vm390_vm0, %v502_v59 }
 0x17a   :  { %v375_v60 = vpop.f32.mrf.mxu1 }
 0x17b   :  { %401 = vst.msk [vmem:[%s1067_s5 + $0x50] sm:$0xff] %vm390_vm0, %v375_v60 }
 0x180   :  { %v505_v61 = vpop.f32.mrf.mxu2 }
 0x181   :  { %530 = vst.msk [vmem:[%s1068_s6 + $0x50] sm:$0xff] %vm390_vm0, %v505_v61 }
 0x182   :  { %v377_v62 = vpop.f32.mrf.mxu1 }
 0x183   :  { %402 = vst.msk [vmem:[%s1067_s5 + $0x58] sm:$0xff] %vm390_vm0, %v377_v62 }
 0x188   :  { %v507_v63 = vpop.f32.mrf.mxu2 }
 0x189   :  { %531 = vst.msk [vmem:[%s1068_s6 + $0x58] sm:$0xff] %vm390_vm0, %v507_v63 }

// kernel: caugramer_forward.6
= control target key start
LH: loop header
LB: loop body
LE: loop exit
PB: predicated region body
PF: predicated region fallthrough
CT: control target
= control target key end

     0   :  { %v1903_v0 = vmov 0   ;;  %vm36_vm0 = vcmask 7168   ;;  %s2692_s1 = inlined_call_operand.vmem [shape: f32[128,1], index: 1, kind: input, shape index: {}]   ;;  %s2693_s2 = inlined_call_operand.vmem [shape: f32[1,128], index: 2, kind: input, shape index: {}]   ;;  %s2694_s0 = inlined_call_operand.vmem [shape: bf16[128,128], index: 0, kind: input, shape index: {}]   ;;  %s2695_s3 = inlined_call_operand.vmem [shape: bf16[128,128], index: 3, kind: input, shape index: {}]   ;;  %s2696_s4 = inlined_call_operand.vmem [shape: f32[1,128], index: 4, kind: input, shape index: {}]   ;;  %s2697_s5 = inlined_call_operand.vmem [shape: bf16[128,128], index: 5, kind: input, shape index: {}]   ;;  %s2698_s6 = inlined_call_operand.vmem [shape: bf16[128,1], index: 6, kind: input, shape index: {}]   ;;  %s2699_s7 = inlined_call_operand.vmem [shape: bf16[128,1], index: 7, kind: input, shape index: {}]   ;;  %s2700_s8 = inlined_call_operand.vmem [shape: bf16[128,128], index: 8, kind: output, shape index: {0}]   ;;  %s2701_s9 = inlined_call_operand.vmem [shape: f32[128,1], index: 9, kind: output, shape index: {1}]   ;;  %s2702_s10 = inlined_call_operand.vmem [shape: f32[128,1], index: 10, kind: output, shape index: {2}]  }
   0x1   :  { %1803 = vset.pattern.permute.xlu1 %v1903_v0  ;;  %1802 = vset.pattern.permute.xlu0 %v1903_v0  ;;  %v87_v1 = vld [vmem:[%s2692_s1 + $0x10] sm:$0xff]  ;;  %v85_v2 = vld [vmem:[%s2692_s1] sm:$0xff]  ;;  %v88_v4 = vld [vmem:[%s2692_s1 + $0x18] sm:$0xff] }
   0x2   :  { %v89_v3 = vld [vmem:[%s2692_s1 + $0x20] sm:$0xff]  ;;  %114 = vperm.xlu1 %1803, %v87_v1   ;;  %104 = vperm.xlu0 %1802, %v85_v2   ;;  %v86_v5 = vld [vmem:[%s2692_s1 + $0x8] sm:$0xff]  ;;  %v91_v9 = vld [vmem:[%s2692_s1 + $0x30] sm:$0xff] }
   0x3   :  { %1804 = vset.pattern.permute.xlu2 %v1903_v0  ;;  %v90_v6 = vld [vmem:[%s2692_s1 + $0x28] sm:$0xff]  ;;  %v93_v7 = vld [vmem:[%s2692_s1 + $0x40] sm:$0xff]  ;;  %v95_v10 = vld [vmem:[%s2692_s1 + $0x50] sm:$0xff] }
   0x4   :  { %124 = vperm.xlu2 %1804, %v89_v3   ;;  %v94_v8 = vld [vmem:[%s2692_s1 + $0x48] sm:$0xff]  ;;  %v96_v11 = vld [vmem:[%s2692_s1 + $0x58] sm:$0xff]  ;;  %v1714_v16 = vld [vmem:[%s2694_s0] sm:$0xff]  }
   0x5   :  { %v92_v12 = vld [vmem:[%s2692_s1 + $0x38] sm:$0xff]  ;;  %v1785_v15 = vld [vmem:[%s2694_s0 + $0x8] sm:$0xff]   ;;  %v2006_v17 = vld [vmem:[%s2693_s2] ss:$0 sm:$0xff]  ;;  %v1715_v21 = vunpack.c.l.bf16 %v1714_v16  ;;  %v1716_v36 = vunpack.c.h.bf16 %v1714_v16 }
   0x6   :  { %v1786_v19 = vld [vmem:[%s2694_s0 + $0x10] sm:$0xff]   ;;  %v1719_v20 = vunpack.c.l.bf16 %v1785_v15  ;;  %v1787_v33 = vld [vmem:[%s2694_s0 + $0x18] sm:$0xff]   ;;  %v1720_v35 = vunpack.c.h.bf16 %v1785_v15  ;;  %v1788_v50 = vld [vmem:[%s2694_s0 + $0x20] sm:$0xff]  }
   0x7   :  { %v1723_v27 = vunpack.c.l.bf16 %v1786_v19  ;;  %v1724_v43 = vunpack.c.h.bf16 %v1786_v19  ;;  %v1728_v44 = vunpack.c.h.bf16 %v1787_v33  ;;  %v1727_v52 = vunpack.c.l.bf16 %v1787_v33 }
   0x8   :  { %v1731_v55 = vunpack.c.l.bf16 %v1788_v50  ;;  %v1732_v2 = vunpack.c.h.bf16 %v1788_v50 }
   0xa   :  { %119 = vperm.xlu1 %1803, %v88_v4   ;;  %109 = vperm.xlu0 %1802, %v86_v5  }
   0xc   :  { %129 = vperm.xlu2 %1804, %v90_v6  }
  0x12   :  { %144 = vperm.xlu1 %1803, %v93_v7   ;;  %149 = vperm.xlu0 %1802, %v94_v8  }
  0x14   :  { %134 = vperm.xlu2 %1804, %v91_v9  }
  0x1a   :  { %154 = vperm.xlu1 %1803, %v95_v10   ;;  %159 = vperm.xlu0 %1802, %v96_v11   ;;  %v1789_v11 = vld [vmem:[%s2694_s0 + $0x28] sm:$0xff]  }
  0x1b   :  { %v1735_v15 = vunpack.c.l.bf16 %v1789_v11 }
  0x1c   :  { %139 = vperm.xlu2 %1804, %v92_v12  }
  0x5e   :  { %v125_v13 = vpop.permute.xlu2 %124 }
  0x5f   :  { %v189_v26 = vadd.f32 %v2006_v17, %v125_v13 }
  0x61   :  { %v237_v32 = vadd.f32 %v1723_v27, %v189_v26  ;;  %v1736_v27 = vunpack.c.h.bf16 %v1789_v11 }
  0x63   :  { %v253_v45 = vmul.f32 0.2, %v237_v32 }
  0x65   :  { %v2031_v56 = vmax.f32 %v237_v32, %v253_v45  ;;  %v1905_v32 = vmov 0.0  }
  0x66   :  { %v130_v14 = vpop.permute.xlu2 %129  ;;  %53 = vst.msk [vmem:[#allocation4] sm:$0xff] %vm36_vm0, %v1905_v32 }
  0x67   :  { %v190_v46 = vadd.f32 %v2006_v17, %v130_v14  ;;  %54 = vst.msk [vmem:[#allocation4 + $0x8] sm:$0xff] %vm36_vm0, %v1905_v32 }
  0x68   :  { %55 = vst.msk [vmem:[#allocation4 + $0x10] sm:$0xff] %vm36_vm0, %v1905_v32 }
  0x69   :  { %v238_v57 = vadd.f32 %v1724_v43, %v190_v46  ;;  %56 = vst.msk [vmem:[#allocation4 + $0x18] sm:$0xff] %vm36_vm0, %v1905_v32 }
  0x6a   :  { %57 = vst.msk [vmem:[#allocation4 + $0x20] sm:$0xff] %vm36_vm0, %v1905_v32 }
  0x6b   :  { %v254_v4 = vmul.f32 0.2, %v238_v57  ;;  %58 = vst.msk [vmem:[#allocation4 + $0x28] sm:$0xff] %vm36_vm0, %v1905_v32 }
  0x6c   :  { %59 = vst.msk [vmem:[#allocation4 + $0x30] sm:$0xff] %vm36_vm0, %v1905_v32 }
  0x6d   :  { %v2042_v8 = vmax.f32 %v238_v57, %v254_v4  ;;  %60 = vst.msk [vmem:[#allocation4 + $0x38] sm:$0xff] %vm36_vm0, %v1905_v32 }
  0x6e   :  { %v135_v18 = vpop.permute.xlu2 %134  ;;  %61 = vst.msk [vmem:[#allocation4 + $0x40] sm:$0xff] %vm36_vm0, %v1905_v32 }
  0x6f   :  { %v191_v51 = vadd.f32 %v2006_v17, %v135_v18  ;;  %62 = vst.msk [vmem:[#allocation4 + $0x48] sm:$0xff] %vm36_vm0, %v1905_v32 }
  0x70   :  { %63 = vst.msk [vmem:[#allocation4 + $0x50] sm:$0xff] %vm36_vm0, %v1905_v32 }
  0x71   :  { %v239_v61 = vadd.f32 %v1727_v52, %v191_v51  ;;  %64 = vst.msk [vmem:[#allocation4 + $0x58] sm:$0xff] %vm36_vm0, %v1905_v32 }
  0x72   :  { %65 = vst.msk [vmem:[#allocation4 + $0x60] sm:$0xff] %vm36_vm0, %v1905_v32 }
  0x73   :  { %v255_v6 = vmul.f32 0.2, %v239_v61  ;;  %66 = vst.msk [vmem:[#allocation4 + $0x68] sm:$0xff] %vm36_vm0, %v1905_v32 }
  0x74   :  { %v115_v22 = vpop.permute.xlu1 %114  ;;  %v105_v23 = vpop.permute.xlu0 %104  ;;  %67 = vst.msk [vmem:[#allocation4 + $0x70] sm:$0xff] %vm36_vm0, %v1905_v32 }
  0x75   :  { %v187_v24 = vadd.f32 %v2006_v17, %v115_v22  ;;  %v185_v25 = vadd.f32 %v2006_v17, %v105_v23  ;;  %v2049_v12 = vmax.f32 %v239_v61, %v255_v6  ;;  %v98_v22 = vld [vmem:[%s2692_s1 + $0x68] sm:$0xff]  ;;  %v99_v23 = vld [vmem:[%s2692_s1 + $0x70] sm:$0xff]  ;;  %68 = vst.msk [vmem:[#allocation4 + $0x78] sm:$0xff] %vm36_vm0, %v1905_v32  ;;  %v100_v32 = vld [vmem:[%s2692_s1 + $0x78] sm:$0xff] }
  0x76   :  { %v140_v34 = vpop.permute.xlu2 %139 }
  0x77   :  { %v235_v28 = vadd.f32 %v1719_v20, %v187_v24  ;;  %v233_v29 = vadd.f32 %v1715_v21, %v185_v25  ;;  %v192_v47 = vadd.f32 %v2006_v17, %v140_v34  ;;  %v97_v21 = vld [vmem:[%s2692_s1 + $0x60] sm:$0xff]  ;;  %v1904_v24 = vmov -1e+30  }
  0x78   :  { %39 = vst.msk [vmem:[#allocation3 + $0x10] sm:$0xff] %vm36_vm0, %v1904_v24 }
  0x79   :  { %v251_v30 = vmul.f32 0.2, %v235_v28  ;;  %v249_v31 = vmul.f32 0.2, %v233_v29  ;;  %v240_v58 = vadd.f32 %v1728_v44, %v192_v47  ;;  %37 = vst.msk [vmem:[#allocation3] sm:$0xff] %vm36_vm0, %v1904_v24 }
  0x7a   :  { %38 = vst.msk [vmem:[#allocation3 + $0x8] sm:$0xff] %vm36_vm0, %v1904_v24 }
  0x7b   :  { %v2017_v37 = vmax.f32 %v235_v28, %v251_v30  ;;  %v2019_v38 = vmax.f32 %v233_v29, %v249_v31  ;;  %v256_v5 = vmul.f32 0.2, %v240_v58  ;;  %40 = vst.msk [vmem:[#allocation3 + $0x18] sm:$0xff] %vm36_vm0, %v1904_v24 }
  0x7c   :  { %v120_v39 = vpop.permute.xlu1 %119  ;;  %v110_v40 = vpop.permute.xlu0 %109  ;;  %41 = vst.msk [vmem:[#allocation3 + $0x20] sm:$0xff] %vm36_vm0, %v1904_v24 }
  0x7d   :  { %v188_v41 = vadd.f32 %v2006_v17, %v120_v39  ;;  %v186_v42 = vadd.f32 %v2006_v17, %v110_v40  ;;  %301 = vmax.xlane.f32.xlu2 %v2017_v37  ;;  %297 = vmax.xlane.f32.xlu0 %v2019_v38  ;;  %v2044_v9 = vmax.f32 %v240_v58, %v256_v5  ;;  %v1790_v5 = vld [vmem:[%s2694_s0 + $0x30] sm:$0xff]  }
  0x7e   :  { %42 = vst.msk [vmem:[#allocation3 + $0x28] sm:$0xff] %vm36_vm0, %v1904_v24 }
  0x7f   :  { %v236_v48 = vadd.f32 %v1720_v35, %v188_v41  ;;  %v234_v49 = vadd.f32 %v1716_v36, %v186_v42  ;;  %43 = vst.msk [vmem:[#allocation3 + $0x30] sm:$0xff] %vm36_vm0, %v1904_v24  ;;  %v2109_v34 = vld [vmem:[#allocation3 + $0x10] sm:$0xff] }
  0x80   :  { %44 = vst.msk [vmem:[#allocation3 + $0x38] sm:$0xff] %vm36_vm0, %v1904_v24  ;;  %v2111_v35 = vld [vmem:[#allocation3] sm:$0xff] }
  0x81   :  { %v250_v53 = vmul.f32 0.2, %v234_v49  ;;  %v252_v54 = vmul.f32 0.2, %v236_v48  ;;  %45 = vst.msk [vmem:[#allocation3 + $0x40] sm:$0xff] %vm36_vm0, %v1904_v24  ;;  %v2127_v44 = vld [vmem:[#allocation3 + $0x8] sm:$0xff] }
  0x82   :  { %46 = vst.msk [vmem:[#allocation3 + $0x48] sm:$0xff] %vm36_vm0, %v1904_v24  ;;  %v2129_v45 = vld [vmem:[#allocation3 + $0x18] sm:$0xff] }
  0x83   :  { %v2033_v59 = vmax.f32 %v234_v49, %v250_v53  ;;  %v2035_v60 = vmax.f32 %v236_v48, %v252_v54  ;;  %47 = vst.msk [vmem:[#allocation3 + $0x50] sm:$0xff] %vm36_vm0, %v1904_v24  ;;  %v2125_v43 = vld [vmem:[#allocation3 + $0x20] sm:$0xff] }
  0x84   :  { %v145_v62 = vpop.permute.xlu1 %144  ;;  %v150_v63 = vpop.permute.xlu0 %149  ;;  %48 = vst.msk [vmem:[#allocation3 + $0x58] sm:$0xff] %vm36_vm0, %v1904_v24 }
  0x85   :  { %v193_v0 = vadd.f32 %v2006_v17, %v145_v62  ;;  %305 = vmax.xlane.f32.xlu2 %v2031_v56  ;;  %299 = vmax.xlane.f32.xlu1 %v2033_v59  ;;  %v194_v1 = vadd.f32 %v2006_v17, %v150_v63  ;;  %49 = vst.msk [vmem:[#allocation3 + $0x60] sm:$0xff] %vm36_vm0, %v1904_v24 }
  0x86   :  { %303 = vmax.xlane.f32.xlu0 %v2035_v60  ;;  %50 = vst.msk [vmem:[#allocation3 + $0x68] sm:$0xff] %vm36_vm0, %v1904_v24  ;;  %v2157_v58 = vld [vmem:[#allocation3 + $0x30] sm:$0xff] }
  0x87   :  { %v241_v3 = vadd.f32 %v1731_v55, %v193_v0  ;;  %v242_v7 = vadd.f32 %v1732_v2, %v194_v1  ;;  %51 = vst.msk [vmem:[#allocation3 + $0x70] sm:$0xff] %vm36_vm0, %v1904_v24  ;;  %v2153_v55 = vld [vmem:[#allocation3 + $0x28] sm:$0xff]  ;;  %v2155_v57 = vld [vmem:[#allocation3 + $0x38] sm:$0xff] }
  0x88   :  { %52 = vst.msk [vmem:[#allocation3 + $0x78] sm:$0xff] %vm36_vm0, %v1904_v24 }
  0x89   :  { %v258_v13 = vmul.f32 0.2, %v242_v7  ;;  %v257_v28 = vmul.f32 0.2, %v241_v3  ;;  %v2181_v6 = vld [vmem:[#allocation3 + $0x48] sm:$0xff] }
  0x8b   :  { %v2055_v16 = vmax.f32 %v242_v7, %v258_v13  ;;  %v2087_v30 = vmax.f32 %v241_v3, %v257_v28  ;;  %v1739_v7 = vunpack.c.l.bf16 %v1790_v5 }
  0x8c   :  { %v155_v10 = vpop.permute.xlu1 %154  ;;  %v160_v25 = vpop.permute.xlu0 %159 }
  0x8d   :  { %307 = vmax.xlane.f32.xlu2 %v2042_v8  ;;  %311 = vmax.xlane.f32.xlu1 %v2044_v9  ;;  %v195_v14 = vadd.f32 %v2006_v17, %v155_v10  ;;  %v196_v26 = vadd.f32 %v2006_v17, %v160_v25 }
  0x8e   :  { %309 = vmax.xlane.f32.xlu0 %v2049_v12 }
  0x8f   :  { %v243_v18 = vadd.f32 %v1735_v15, %v195_v14  ;;  %v244_v29 = vadd.f32 %v1736_v27, %v196_v26 }
  0x91   :  { %v259_v19 = vmul.f32 0.2, %v243_v18  ;;  %v260_v31 = vmul.f32 0.2, %v244_v29 }
  0x93   :  { %v2058_v20 = vmax.f32 %v243_v18, %v259_v19  ;;  %v2094_v33 = vmax.f32 %v244_v29, %v260_v31  ;;  %v2189_v19 = vld [vmem:[#allocation3 + $0x50] sm:$0xff] }
  0x95   :  { %315 = vmax.xlane.f32.xlu1 %v2055_v16 }
  0x9d   :  { %317 = vmax.xlane.f32.xlu1 %v2058_v20 }
  0xa5   :  { %164 = vperm.xlu2 %1804, %v97_v21   ;;  %v1740_v21 = vunpack.c.h.bf16 %v1790_v5  ;;  %v1688_v5 = vld [vmem:[%s2695_s3 + $0x38] sm:$0xff] }
  0xa6   :  { %802 = vmatpush.bf16.msra.mxu0 %v1688_v5 }
  0xad   :  { %169 = vperm.xlu2 %1804, %v98_v22  }
  0xb6   :  { %174 = vperm.xlu1 %1803, %v99_v23  }
  0xd6   :  { %313 = vmax.xlane.f32.xlu2 %v2087_v30 }
  0xde   :  { %319 = vmax.xlane.f32.xlu2 %v2094_v33 }
  0xf0   :  { %v302_v36 = vpop.xlane.xlu2 %301  ;;  %v298_v39 = vpop.xlane.xlu0 %297 }
  0xf1   :  { %v2114_v40 = vmax.f32 %v2109_v34, %v302_v36  ;;  %v2117_v41 = vmax.f32 %v2111_v35, %v298_v39  ;;  %v2215_v36 = vld [vmem:[#allocation3 + $0x40] sm:$0xff] }
  0xf3   :  { %885 = vst.msk [vmem:[#allocation3 + $0x10] sm:$0xff] %vm36_vm0, %v2114_v40  ;;  %v345_v42 = vsub.f32 %v2111_v35, %v2117_v41 }
  0xf4   :  { %883 = vst.msk [vmem:[#allocation3] sm:$0xff] %vm36_vm0, %v2117_v41 }
  0xf8   :  { %v306_v46 = vpop.xlane.xlu2 %305  ;;  %v300_v47 = vpop.xlane.xlu1 %299 }
  0xf9   :  { %v2132_v48 = vmax.f32 %v2125_v43, %v306_v46  ;;  %v2135_v49 = vmax.f32 %v2127_v44, %v300_v47  ;;  %v304_v50 = vpop.xlane.xlu0 %303 }
  0xfa   :  { %v2138_v51 = vmax.f32 %v2129_v45, %v304_v50  ;;  %v2227_v50 = vld [vmem:[#allocation3 + $0x58] sm:$0xff] }
  0xfb   :  { %v349_v52 = vsub.f32 %v2125_v43, %v2132_v48  ;;  %887 = vst.msk [vmem:[#allocation3 + $0x20] sm:$0xff] %vm36_vm0, %v2132_v48  ;;  %v346_v53 = vsub.f32 %v2127_v44, %v2135_v49  ;;  %400 = vperm.xlu1 %1803, %v2135_v49   ;;  %v347_v44 = vsub.f32 %v2109_v34, %v2114_v40 }
  0xfc   :  { %884 = vst.msk [vmem:[#allocation3 + $0x8] sm:$0xff] %vm36_vm0, %v2135_v49  ;;  %v348_v54 = vsub.f32 %v2129_v45, %v2138_v51  ;;  %v523_v45 = vld [vmem:[#allocation4 + $0x10] sm:$0xff] }
  0xfd   :  { %886 = vst.msk [vmem:[#allocation3 + $0x18] sm:$0xff] %vm36_vm0, %v2138_v51 }
 0x100   :  { %v308_v61 = vpop.xlane.xlu2 %307  ;;  %v312_v62 = vpop.xlane.xlu1 %311 }
 0x101   :  { %v2160_v63 = vmax.f32 %v2153_v55, %v308_v61  ;;  %v2163_v0 = vmax.f32 %v2155_v57, %v312_v62  ;;  %v310_v1 = vpop.xlane.xlu0 %309 }
 0x102   :  { %v2166_v2 = vmax.f32 %v2157_v58, %v310_v1 }
 0x103   :  { %888 = vst.msk [vmem:[#allocation3 + $0x28] sm:$0xff] %vm36_vm0, %v2160_v63 }
 0x104   :  { %890 = vst.msk [vmem:[#allocation3 + $0x38] sm:$0xff] %vm36_vm0, %v2163_v0 }
 0x105   :  { %889 = vst.msk [vmem:[#allocation3 + $0x30] sm:$0xff] %vm36_vm0, %v2166_v2 }
 0x108   :  { %v165_v10 = vpop.permute.xlu2 %164  ;;  %v316_v11 = vpop.xlane.xlu1 %315 }
 0x109   :  { %v197_v13 = vadd.f32 %v2006_v17, %v165_v10  ;;  %v2185_v14 = vmax.f32 %v2181_v6, %v316_v11  ;;  %v1687_v11 = vld [vmem:[%s2695_s3 + $0x30] sm:$0xff] }
 0x10a   :  { %803 = vmatpush.bf16.msra.mxu0 %v1687_v11  ;;  %v2275_v11 = vld [vmem:[#allocation3 + $0x68] sm:$0xff] }
 0x10b   :  { %v245_v15 = vadd.f32 %v1739_v7, %v197_v13  ;;  %892 = vst.msk [vmem:[#allocation3 + $0x48] sm:$0xff] %vm36_vm0, %v2185_v14  ;;  %v1791_v7 = vld [vmem:[%s2694_s0 + $0x38] sm:$0xff]  }
 0x10c   :  { %v1743_v13 = vunpack.c.l.bf16 %v1791_v7 }
 0x10d   :  { %v261_v18 = vmul.f32 0.2, %v245_v15 }
 0x10f   :  { %v2191_v22 = vmax.f32 %v245_v15, %v261_v18  ;;  %v1686_v18 = vld [vmem:[%s2695_s3 + $0x28] sm:$0xff] }
 0x110   :  { %v170_v23 = vpop.permute.xlu2 %169  ;;  %v318_v24 = vpop.xlane.xlu1 %317  ;;  %804 = vmatpush.bf16.msra.mxu0 %v1686_v18 }
 0x111   :  { %v198_v25 = vadd.f32 %v2006_v17, %v170_v23  ;;  %v2195_v26 = vmax.f32 %v2189_v19, %v318_v24  ;;  %321 = vmax.xlane.f32.xlu0 %v2191_v22  ;;  %v1685_v23 = vld [vmem:[%s2695_s3 + $0x20] sm:$0xff] }
 0x113   :  { %v246_v27 = vadd.f32 %v1740_v21, %v198_v25  ;;  %893 = vst.msk [vmem:[#allocation3 + $0x50] sm:$0xff] %vm36_vm0, %v2195_v26  ;;  %v1684_v25 = vld [vmem:[%s2695_s3 + $0x18] sm:$0xff] }
 0x114   :  { %805 = vmatpush.bf16.msra.mxu0 %v1685_v23 }
 0x115   :  { %v262_v29 = vmul.f32 0.2, %v246_v27 }
 0x117   :  { %v2202_v31 = vmax.f32 %v246_v27, %v262_v29  ;;  %v1683_v29 = vld [vmem:[%s2695_s3 + $0x10] sm:$0xff] }
 0x118   :  { %806 = vmatpush.bf16.msra.mxu0 %v1684_v25 }
 0x119   :  { %323 = vmax.xlane.f32.xlu2 %v2202_v31 }
 0x11c   :  { %807 = vmatpush.bf16.msra.mxu0 %v1683_v29  ;;  %v1744_v29 = vunpack.c.h.bf16 %v1791_v7 }
 0x125   :  { %179 = vperm.xlu0 %1802, %v100_v32   ;;  %v1682_v32 = vld [vmem:[%s2695_s3 + $0x8] sm:$0xff] }
 0x126   :  { %808 = vmatpush.bf16.msra.mxu0 %v1682_v32 }
 0x128   :  { %v175_v10 = vpop.permute.xlu1 %174 }
 0x129   :  { %v199_v15 = vadd.f32 %v2006_v17, %v175_v10 }
 0x12b   :  { %v247_v21 = vadd.f32 %v1743_v13, %v199_v15 }
 0x12d   :  { %410 = vperm.xlu0 %1802, %v2138_v51   ;;  %v263_v24 = vmul.f32 0.2, %v247_v21  ;;  %v369_v51 = vmul.f32 1.442695, %v349_v52  ;;  %v525_v52 = vld [vmem:[#allocation4 + $0x20] sm:$0xff] }
 0x12f   :  { %v2256_v27 = vmax.f32 %v247_v21, %v263_v24 }
 0x131   :  { %395 = vperm.xlu2 %1804, %v2117_v41  }
 0x135   :  { %415 = vperm.xlu0 %1802, %v2132_v48  }
 0x139   :  { %405 = vperm.xlu2 %1804, %v2114_v40  }
 0x13d   :  { %420 = vperm.xlu0 %1802, %v2160_v63  }
 0x141   :  { %430 = vperm.xlu2 %1804, %v2163_v0  }
 0x145   :  { %425 = vperm.xlu0 %1802, %v2166_v2  }
 0x149   :  { %v314_v39 = vpop.xlane.xlu2 %313  ;;  %445 = vperm.xlu2 %1804, %v2195_v26  }
 0x14a   :  { %v2219_v46 = vmax.f32 %v2215_v36, %v314_v39  ;;  %v1681_v39 = vld [vmem:[%s2695_s3] sm:$0xff] }
 0x14b   :  { %809 = vmatpush.bf16.msra.mxu0 %v1681_v39 }
 0x14c   :  { %891 = vst.msk [vmem:[#allocation3 + $0x40] sm:$0xff] %vm36_vm0, %v2219_v46  ;;  %435 = vperm.xlu1 %1803, %v2219_v46  }
 0x14d   :  { %440 = vperm.xlu0 %1802, %v2185_v14  }
 0x151   :  { %v320_v61 = vpop.xlane.xlu2 %319 }
 0x152   :  { %v2230_v62 = vmax.f32 %v2227_v50, %v320_v61  ;;  %v2268_v61 = vld [vmem:[#allocation3 + $0x60] sm:$0xff] }
 0x154   :  { %894 = vst.msk [vmem:[#allocation3 + $0x58] sm:$0xff] %vm36_vm0, %v2230_v62  ;;  %450 = vperm.xlu2 %1804, %v2230_v62  }
 0x16d   :  { %v401_v15 = vpop.permute.xlu1 %400 }
 0x16e   :  { %v474_v21 = vsub.f32 %v2033_v59, %v401_v15 }
 0x170   :  { %v491_v23 = vmul.f32 1.442695, %v474_v21 }
 0x172   :  { %1807 = vpow2.f32 %v491_v23 }
 0x176   :  { %325 = vmax.xlane.f32.xlu1 %v2256_v27 }
 0x178   :  { %v2286_v28 = vpop.eup %1807 }
 0x184   :  { %v322_v5 = vpop.xlane.xlu0 %321 }
 0x185   :  { %v2271_v10 = vmax.f32 %v2268_v61, %v322_v5 }
 0x187   :  { %895 = vst.msk [vmem:[#allocation3 + $0x60] sm:$0xff] %vm36_vm0, %v2271_v10 }
 0x18c   :  { %v324_v13 = vpop.xlane.xlu2 %323 }
 0x18d   :  { %v2278_v18 = vmax.f32 %v2275_v11, %v324_v13 }
 0x18f   :  { %896 = vst.msk [vmem:[#allocation3 + $0x68] sm:$0xff] %vm36_vm0, %v2278_v18 }
 0x194   :  { %v396_v24 = vpop.permute.xlu2 %395 }
 0x195   :  { %v473_v25 = vsub.f32 %v2019_v38, %v396_v24 }
 0x197   :  { %v489_v32 = vmul.f32 1.442695, %v473_v25  ;;  %v180_v39 = vpop.permute.xlu0 %179 }
 0x198   :  { %v200_v5 = vadd.f32 %v2006_v17, %v180_v39 }
 0x199   :  { %1809 = vpow2.f32 %v489_v32 }
 0x19a   :  { %v248_v1 = vadd.f32 %v1744_v29, %v200_v5 }
 0x19c   :  { %v406_v47 = vpop.permute.xlu2 %405  ;;  %v264_v13 = vmul.f32 0.2, %v248_v1 }
 0x19d   :  { %v475_v3 = vsub.f32 %v2017_v37, %v406_v47 }
 0x19e   :  { %v2288_v4 = vmax.f32 %v248_v1, %v264_v13 }
 0x19f   :  { %v1810_v59 = vpop.eup %1809  ;;  %v493_v15 = vmul.f32 1.442695, %v475_v3  ;;  %v411_v21 = vpop.permute.xlu0 %410 }
 0x1a0   :  { %v476_v38 = vsub.f32 %v2035_v60, %v411_v21  ;;  %553 = vadd.xlane.f32.xlu1 %v1810_v59  ;;  %327 = vmax.xlane.f32.xlu0 %v2288_v4  ;;  %v730_v17 = vpack.c.bf16 %v2286_v28, %v1810_v59 }
 0x1a1   :  { %1811 = vpow2.f32 %v493_v15 }
 0x1a2   :  { %v495_v7 = vmul.f32 1.442695, %v476_v38  ;;  %810 = vmatmul.bf16.vlgmr.msra.gmra.mxu0 %v730_v17 }
 0x1a4   :  { %1813 = vpow2.f32 %v495_v7  ;;  %v431_v1 = vpop.permute.xlu2 %430 }
 0x1a5   :  { %v480_v60 = vsub.f32 %v2044_v9, %v431_v1 }
 0x1a7   :  { %v1812_v23 = vpop.eup %1811  ;;  %v416_v37 = vpop.permute.xlu0 %415  ;;  %v503_v29 = vmul.f32 1.442695, %v480_v60 }
 0x1a8   :  { %v477_v47 = vsub.f32 %v2031_v56, %v416_v37  ;;  %557 = vadd.xlane.f32.xlu0 %v1812_v23 }
 0x1aa   :  { %v1814_v24 = vpop.eup %1813  ;;  %v497_v3 = vmul.f32 1.442695, %v477_v47 }
 0x1ab   :  { %559 = vadd.xlane.f32.xlu1 %v1814_v24  ;;  %v731_v39 = vpack.c.bf16 %v1814_v24, %v1812_v23 }
 0x1ac   :  { %1815 = vpow2.f32 %v497_v3  ;;  %v446_v59 = vpop.permute.xlu2 %445 }
 0x1ad   :  { %1817 = vpow2.f32 %v503_v29  ;;  %v483_v9 = vsub.f32 %v2058_v20, %v446_v59 }
 0x1af   :  { %v421_v25 = vpop.permute.xlu0 %420 }
 0x1b0   :  { %v478_v32 = vsub.f32 %v2042_v8, %v421_v25  ;;  %v509_v8 = vmul.f32 1.442695, %v483_v9 }
 0x1b2   :  { %v1816_v5 = vpop.eup %1815  ;;  %815 = vmatmul.bf16.gmra.mxu0 %v731_v39  ;;  %v499_v13 = vmul.f32 1.442695, %v478_v32 }
 0x1b3   :  { %561 = vadd.xlane.f32.xlu0 %v1816_v5  ;;  %v1818_v21 = vpop.eup %1817 }
 0x1b4   :  { %1819 = vpow2.f32 %v499_v13  ;;  %v451_v29 = vpop.permute.xlu2 %450 }
 0x1b5   :  { %v484_v39 = vsub.f32 %v2094_v33, %v451_v29  ;;  %v2320_v33 = vld [vmem:[#allocation3 + $0x70] sm:$0xff]  ;;  %v2703_v29 = vsub.f32 %v2155_v57, %v2163_v0  ;;  %v528_v0 = vld [vmem:[#allocation4 + $0x38] sm:$0xff] }
 0x1b7   :  { %v426_v56 = vpop.permute.xlu0 %425  ;;  %v511_v13 = vmul.f32 1.442695, %v484_v39  ;;  %v375_v43 = vmul.f32 1.442695, %v2703_v29 }
 0x1b8   :  { %v479_v15 = vsub.f32 %v2049_v12, %v426_v56 }
 0x1ba   :  { %v501_v38 = vmul.f32 1.442695, %v479_v15  ;;  %v2298_v17 = vpop.eup %1819  ;;  %v521_v15 = vld [vmem:[#allocation4] sm:$0xff] }
 0x1bb   :  { %567 = vadd.xlane.f32.xlu0 %v1818_v21  ;;  %v732_v37 = vpack.c.bf16 %v2298_v17, %v1816_v5 }
 0x1bc   :  { %1821 = vpow2.f32 %v501_v38  ;;  %v2336_v38 = vld [vmem:[#allocation3 + $0x78] sm:$0xff] }
 0x1bd   :  { %1823 = vpow2.f32 %v509_v8 }
 0x1be   :  { %v436_v20 = vpop.permute.xlu1 %435 }
 0x1bf   :  { %v441_v7 = vpop.permute.xlu0 %440  ;;  %v481_v3 = vsub.f32 %v2087_v30, %v436_v20  ;;  %v361_v30 = vmul.f32 1.442695, %v345_v42 }
 0x1c0   :  { %v482_v23 = vsub.f32 %v2055_v16, %v441_v7  ;;  %v363_v16 = vmul.f32 1.442695, %v346_v53  ;;  %v365_v53 = vmul.f32 1.442695, %v347_v44 }
 0x1c1   :  { %v505_v25 = vmul.f32 1.442695, %v481_v3 }
 0x1c2   :  { %v1822_v47 = vpop.eup %1821  ;;  %v507_v1 = vmul.f32 1.442695, %v482_v23  ;;  %820 = vmatmul.bf16.gmra.mxu0 %v732_v37 }
 0x1c3   :  { %565 = vadd.xlane.f32.xlu1 %v1822_v47  ;;  %v1824_v12 = vpop.eup %1823  ;;  %v733_v60 = vpack.c.bf16 %v1818_v21, %v1822_v47  ;;  %v367_v21 = vmul.f32 1.442695, %v348_v54 }
 0x1c4   :  { %1825 = vpow2.f32 %v507_v1 }
 0x1c5   :  { %1827 = vpow2.f32 %v505_v25 }
 0x1c6   :  { %1829 = vpow2.f32 %v363_v16 }
 0x1c7   :  { %1831 = vpow2.f32 %v361_v30 }
 0x1c8   :  { %1833 = vpow2.f32 %v511_v13 }
 0x1c9   :  { %1835 = vpow2.f32 %v365_v53 }
 0x1ca   :  { %v1826_v24 = vpop.eup %1825  ;;  %1837 = vpow2.f32 %v367_v21 }
 0x1cb   :  { %573 = vadd.xlane.f32.xlu1 %v1824_v12  ;;  %571 = vadd.xlane.f32.xlu0 %v1826_v24  ;;  %v2306_v32 = vpop.eup %1827  ;;  %1839 = vpow2.f32 %v369_v51  ;;  %v530_v51 = vld [vmem:[#allocation4 + $0x48] sm:$0xff] }
 0x1cc   :  { %v734_v5 = vpack.c.bf16 %v1826_v24, %v2306_v32  ;;  %v2317_v49 = vpop.eup %1829 }
 0x1cd   :  { %v1832_v41 = vpop.eup %1831 }
 0x1ce   :  { %v2330_v34 = vpop.eup %1833  ;;  %v537_v9 = vmul.f32 %v1832_v41, %v521_v15 }
 0x1cf   :  { %v735_v40 = vpack.c.bf16 %v2330_v34, %v1824_v12  ;;  %v1836_v59 = vpop.eup %1835  ;;  %v524_v12 = vld [vmem:[#allocation4 + $0x18] sm:$0xff] }
 0x1d0   :  { %v2350_v54 = vpop.eup %1837  ;;  %v539_v1 = vmul.f32 %v1836_v59, %v523_v45  ;;  %v531_v45 = vld [vmem:[#allocation4 + $0x50] sm:$0xff] }
 0x1d1   :  { %v540_v3 = vmul.f32 %v2350_v54, %v524_v12  ;;  %v2358_v48 = vpop.eup %1839 }
 0x1d2   :  { %825 = vmatmul.bf16.gmra.mxu0 %v733_v60  ;;  %v541_v30 = vmul.f32 %v2358_v48, %v525_v52 }
 0x1df   :  { %460 = vperm.xlu0 %1802, %v2278_v18  }
 0x1e2   :  { %830 = vmatmul.bf16.gmra.mxu0 %v734_v5  ;;  %v351_v5 = vsub.f32 %v2157_v58, %v2166_v2  ;;  %v2704_v2 = vsub.f32 %v2189_v19, %v2195_v26 }
 0x1e4   :  { %455 = vperm.xlu1 %1803, %v2271_v10   ;;  %v373_v53 = vmul.f32 1.442695, %v351_v5  ;;  %v381_v15 = vmul.f32 1.442695, %v2704_v2 }
 0x1e7   :  { %641 = vperm.xlu0 %1802, %v2317_v49  }
 0x1e9   :  { %v326_v56 = vpop.xlane.xlu1 %325 }
 0x1ea   :  { %v2323_v35 = vmax.f32 %v2320_v33, %v326_v56  ;;  %v354_v56 = vsub.f32 %v2181_v6, %v2185_v14 }
 0x1ec   :  { %v359_v42 = vsub.f32 %v2320_v33, %v2323_v35  ;;  %897 = vst.msk [vmem:[#allocation3 + $0x70] sm:$0xff] %vm36_vm0, %v2323_v35  ;;  %465 = vperm.xlu2 %1804, %v2323_v35   ;;  %636 = vperm.xlu1 %1803, %v1832_v41  }
 0x1f2   :  { %835 = vmatmul.bf16.gmra.mxu0 %v735_v40 }
 0x1f4   :  { %646 = vperm.xlu1 %1803, %v1836_v59   ;;  %v379_v59 = vmul.f32 1.442695, %v354_v56 }
 0x213   :  { %v554_v8 = vpop.xlane.xlu1 %553  ;;  %v328_v7 = vpop.xlane.xlu0 %327 }
 0x214   :  { %v585_v23 = vadd.f32 %v554_v8, %v537_v9  ;;  %v2339_v37 = vmax.f32 %v2336_v38, %v328_v7  ;;  %v527_v9 = vld [vmem:[#allocation4 + $0x30] sm:$0xff] }
 0x216   :  { %602 = vst.msk [vmem:[#allocation4] sm:$0xff] %vm36_vm0, %v585_v23  ;;  %v360_v47 = vsub.f32 %v2336_v38, %v2339_v37  ;;  %470 = vperm.xlu2 %1804, %v2339_v37   ;;  %v1692_v38 = vld [vmem:[%s2697_s5 + $0x18] sm:$0xff] }
 0x217   :  { %898 = vst.msk [vmem:[#allocation3 + $0x78] sm:$0xff] %vm36_vm0, %v2339_v37 }
 0x21b   :  { %v558_v24 = vpop.xlane.xlu0 %557 }
 0x21c   :  { %v587_v20 = vadd.f32 %v558_v24, %v539_v1 }
 0x21d   :  { %v918_v60 = vld [vmem:[#allocation4] sm:$0xff] }
 0x21e   :  { %604 = vst.msk [vmem:[#allocation4 + $0x10] sm:$0xff] %vm36_vm0, %v587_v20  ;;  %v560_v25 = vpop.xlane.xlu1 %559  ;;  %1841 = vrcp.f32 %v918_v60 }
 0x21f   :  { %v588_v16 = vadd.f32 %v560_v25, %v540_v3  ;;  %1843 = vpow2.f32 %v375_v43  ;;  %v811_v37 = vpop.f32.mrf.mxu0 }
 0x220   :  { %1845 = vpow2.f32 %v373_v53 }
 0x221   :  { %605 = vst.msk [vmem:[#allocation4 + $0x18] sm:$0xff] %vm36_vm0, %v588_v16  ;;  %1847 = vpow2.f32 %v379_v59 }
 0x222   :  { %1849 = vpow2.f32 %v381_v15 }
 0x224   :  { %v1842_v39 = vpop.eup %1841 }
 0x225   :  { %952 = vperm.xlu0 %1802, %v1842_v39   ;;  %v2364_v57 = vpop.eup %1843 }
 0x226   :  { %v562_v13 = vpop.xlane.xlu0 %561  ;;  %v544_v41 = vmul.f32 %v2364_v57, %v528_v0  ;;  %v1846_v21 = vpop.eup %1845 }
 0x227   :  { %v589_v44 = vadd.f32 %v562_v13, %v541_v30  ;;  %v543_v8 = vmul.f32 %v1846_v21, %v527_v9  ;;  %v2373_v6 = vpop.eup %1847 }
 0x228   :  { %v2376_v14 = vpop.eup %1849  ;;  %v546_v26 = vmul.f32 %v2373_v6, %v530_v51 }
 0x229   :  { %606 = vst.msk [vmem:[#allocation4 + $0x20] sm:$0xff] %vm36_vm0, %v589_v44  ;;  %v547_v19 = vmul.f32 %v2376_v14, %v531_v45  ;;  %v920_v45 = vld [vmem:[#allocation4 + $0x10] sm:$0xff] }
 0x22e   :  { %v568_v40 = vpop.xlane.xlu0 %567 }
 0x22f   :  { %v592_v58 = vadd.f32 %v568_v40, %v544_v41  ;;  %v2706_v40 = vsub.f32 %v2215_v36, %v2219_v46  ;;  %v358_v36 = vsub.f32 %v2275_v11, %v2278_v18  ;;  %v529_v46 = vld [vmem:[#allocation4 + $0x40] sm:$0xff]  ;;  %v532_v18 = vld [vmem:[#allocation4 + $0x58] sm:$0xff] }
 0x231   :  { %609 = vst.msk [vmem:[#allocation4 + $0x38] sm:$0xff] %vm36_vm0, %v592_v58  ;;  %v377_v59 = vmul.f32 1.442695, %v2706_v40  ;;  %v387_v51 = vmul.f32 1.442695, %v358_v36 }
 0x236   :  { %v566_v7 = vpop.xlane.xlu1 %565 }
 0x237   :  { %v591_v23 = vadd.f32 %v566_v7, %v543_v8 }
 0x239   :  { %608 = vst.msk [vmem:[#allocation4 + $0x30] sm:$0xff] %vm36_vm0, %v591_v23 }
 0x23e   :  { %v574_v1 = vpop.xlane.xlu1 %573  ;;  %v572_v12 = vpop.xlane.xlu0 %571 }
 0x23f   :  { %v595_v24 = vadd.f32 %v574_v1, %v547_v19  ;;  %v594_v20 = vadd.f32 %v572_v12, %v546_v26  ;;  %555 = vadd.xlane.f32.xlu2 %v2286_v28 }
 0x241   :  { %612 = vst.msk [vmem:[#allocation4 + $0x50] sm:$0xff] %vm36_vm0, %v595_v24 }
 0x242   :  { %611 = vst.msk [vmem:[#allocation4 + $0x48] sm:$0xff] %vm36_vm0, %v594_v20 }
 0x247   :  { %563 = vadd.xlane.f32.xlu2 %v2298_v17  ;;  %v466_v17 = vpop.permute.xlu2 %465 }
 0x24f   :  { %569 = vadd.xlane.f32.xlu2 %v2306_v32  ;;  %v487_v32 = vsub.f32 %v2256_v27, %v466_v17 }
 0x251   :  { %v461_v3 = vpop.permute.xlu0 %460  ;;  %v517_v30 = vmul.f32 1.442695, %v487_v32  ;;  %v533_v32 = vld [vmem:[#allocation4 + $0x60] sm:$0xff] }
 0x252   :  { %v486_v60 = vsub.f32 %v2202_v31, %v461_v3  ;;  %v2705_v31 = vsub.f32 %v2153_v55, %v2160_v63  ;;  %v925_v63 = vld [vmem:[#allocation4 + $0x38] sm:$0xff] }
 0x254   :  { %v515_v25 = vmul.f32 1.442695, %v486_v60  ;;  %v371_v5 = vmul.f32 1.442695, %v2705_v31  ;;  %v922_v31 = vld [vmem:[#allocation4 + $0x20] sm:$0xff] }
 0x256   :  { %1851 = vpow2.f32 %v515_v25  ;;  %v456_v16 = vpop.permute.xlu1 %455  ;;  %v921_v25 = vld [vmem:[#allocation4 + $0x18] sm:$0xff] }
 0x257   :  { %v485_v29 = vsub.f32 %v2191_v22, %v456_v16  ;;  %575 = vadd.xlane.f32.xlu2 %v2330_v34 }
 0x259   :  { %v513_v43 = vmul.f32 1.442695, %v485_v29  ;;  %v2409_v7 = vpop.permute.xlu0 %641  ;;  %v534_v29 = vld [vmem:[#allocation4 + $0x68] sm:$0xff] }
 0x25b   :  { %1853 = vpow2.f32 %v513_v43 }
 0x25c   :  { %v1852_v28 = vpop.eup %1851  ;;  %1855 = vpow2.f32 %v371_v5 }
 0x25d   :  { %579 = vadd.xlane.f32.xlu0 %v1852_v28  ;;  %1857 = vpow2.f32 %v517_v30 }
 0x261   :  { %v1854_v52 = vpop.eup %1853 }
 0x262   :  { %577 = vadd.xlane.f32.xlu2 %v1854_v52  ;;  %v736_v39 = vpack.c.bf16 %v1852_v28, %v1854_v52  ;;  %v1856_v44 = vpop.eup %1855  ;;  %v389_v28 = vmul.f32 1.442695, %v359_v42 }
 0x263   :  { %v2394_v53 = vpop.eup %1857 }
 0x264   :  { %840 = vmatmul.bf16.gmra.mxu0 %v736_v39 }
 0x270   :  { %v471_v13 = vpop.permute.xlu2 %470 }
 0x271   :  { %v488_v22 = vsub.f32 %v2288_v4, %v471_v13  ;;  %656 = vperm.xlu0 %1802, %v2358_v48   ;;  %v522_v48 = vld [vmem:[#allocation4 + $0x8] sm:$0xff] }
 0x272   :  { %v538_v0 = vmul.f32 %v2317_v49, %v522_v48 }
 0x273   :  { %v519_v34 = vmul.f32 1.442695, %v488_v22  ;;  %v924_v22 = vld [vmem:[#allocation4 + $0x30] sm:$0xff] }
 0x275   :  { %1859 = vpow2.f32 %v519_v34 }
 0x276   :  { %1861 = vrcp.f32 %v925_v63 }
 0x277   :  { %1863 = vpow2.f32 %v377_v59  ;;  %v1693_v59 = vld [vmem:[%s2697_s5 + $0x20] sm:$0xff] }
 0x279   :  { %661 = vperm.xlu0 %1802, %v1856_v44  }
 0x27a   :  { %651 = vperm.xlu2 %1804, %v2350_v54   ;;  %v526_v54 = vld [vmem:[#allocation4 + $0x28] sm:$0xff] }
 0x27b   :  { %v1860_v27 = vpop.eup %1859  ;;  %v542_v58 = vmul.f32 %v1856_v44, %v526_v54  ;;  %v928_v44 = vld [vmem:[#allocation4 + $0x50] sm:$0xff] }
 0x27c   :  { %v737_v55 = vpack.c.bf16 %v1860_v27, %v2394_v53  ;;  %v1862_v4 = vpop.eup %1861 }
 0x27d   :  { %v1864_v49 = vpop.eup %1863 }
 0x27e   :  { %845 = vmatmul.bf16.gmra.mxu0 %v737_v55  ;;  %v545_v23 = vmul.f32 %v1864_v49, %v529_v46  ;;  %v927_v46 = vld [vmem:[#allocation4 + $0x48] sm:$0xff] }
 0x282   :  { %666 = vperm.xlu2 %1804, %v1846_v21   ;;  %v2707_v21 = vsub.f32 %v2227_v50, %v2230_v62  ;;  %v357_v50 = vsub.f32 %v2268_v61, %v2271_v10 }
 0x284   :  { %v383_v9 = vmul.f32 1.442695, %v2707_v21  ;;  %v385_v12 = vmul.f32 1.442695, %v357_v50  ;;  %v813_v21 = vpop.f32.mrf.mxu0 }
 0x28a   :  { %987 = vperm.xlu2 %1804, %v1862_v4  }
 0x297   :  { %v2414_v24 = vpop.permute.xlu0 %952 }
 0x2b2   :  { %v556_v56 = vpop.xlane.xlu2 %555 }
 0x2b3   :  { %v586_v41 = vadd.f32 %v556_v56, %v538_v0  ;;  %583 = vadd.xlane.f32.xlu2 %v1860_v27  ;;  %v391_v0 = vmul.f32 1.442695, %v360_v47  ;;  %v1691_v47 = vld [vmem:[%s2697_s5 + $0x10] sm:$0xff] }
 0x2b5   :  { %603 = vst.msk [vmem:[#allocation4 + $0x8] sm:$0xff] %vm36_vm0, %v586_v41  ;;  %v1694_v41 = vld [vmem:[%s2697_s5 + $0x28] sm:$0xff] }
 0x2ba   :  { %v564_v2 = vpop.xlane.xlu2 %563 }
 0x2bb   :  { %v590_v15 = vadd.f32 %v564_v2, %v542_v58  ;;  %v1690_v2 = vld [vmem:[%s2697_s5 + $0x8] sm:$0xff] }
 0x2bc   :  { %v919_v8 = vld [vmem:[#allocation4 + $0x8] sm:$0xff] }
 0x2bd   :  { %607 = vst.msk [vmem:[#allocation4 + $0x28] sm:$0xff] %vm36_vm0, %v590_v15  ;;  %1865 = vrcp.f32 %v919_v8  ;;  %v1689_v15 = vld [vmem:[%s2697_s5] sm:$0xff]  ;;  %v536_v8 = vld [vmem:[#allocation4 + $0x78] sm:$0xff] }
 0x2be   :  { %1867 = vpow2.f32 %v383_v9 }
 0x2bf   :  { %1869 = vrcp.f32 %v920_v45 }
 0x2c2   :  { %v570_v19 = vpop.xlane.xlu2 %569 }
 0x2c3   :  { %v1866_v26 = vpop.eup %1865  ;;  %v593_v62 = vadd.f32 %v570_v19, %v545_v23  ;;  %v816_v23 = vpop.f32.mrf.mxu0 }
 0x2c4   :  { %957 = vperm.xlu1 %1803, %v1866_v26   ;;  %v923_v1 = vld [vmem:[#allocation4 + $0x28] sm:$0xff]  ;;  %v1868_v11 = vpop.eup %1867 }
 0x2c5   :  { %610 = vst.msk [vmem:[#allocation4 + $0x40] sm:$0xff] %vm36_vm0, %v593_v62  ;;  %1871 = vrcp.f32 %v923_v1  ;;  %v548_v20 = vmul.f32 %v1868_v11, %v532_v18  ;;  %v1870_v3 = vpop.eup %1869  ;;  %v715_v1 = vmul.f32 0.0, %v2409_v7  ;;  %v2468_v18 = vld [vmem:[%s2696_s4] ss:$0 sm:$0xff] }
 0x2c6   :  { %1873 = vpow2.f32 %v387_v51 }
 0x2c7   :  { %1875 = vpow2.f32 %v385_v12 }
 0x2c8   :  { %1877 = vrcp.f32 %v921_v25 }
 0x2c9   :  { %1879 = vpow2.f32 %v389_v28 }
 0x2ca   :  { %v576_v60 = vpop.xlane.xlu2 %575  ;;  %1881 = vrcp.f32 %v922_v31 }
 0x2cb   :  { %v1872_v16 = vpop.eup %1871  ;;  %v596_v61 = vadd.f32 %v576_v60, %v548_v20  ;;  %686 = vperm.xlu2 %1804, %v2376_v14   ;;  %v818_v50 = vpop.f32.mrf.mxu0  ;;  %v852_v20 = vadd.f32 %v813_v21, %v715_v1  ;;  %v535_v1 = vld [vmem:[#allocation4 + $0x70] sm:$0xff] }
 0x2cc   :  { %v1874_v10 = vpop.eup %1873  ;;  %962 = vperm.xlu1 %1803, %v1870_v3   ;;  %977 = vperm.xlu0 %1802, %v1872_v16   ;;  %v926_v35 = vld [vmem:[#allocation4 + $0x40] sm:$0xff] }
 0x2cd   :  { %613 = vst.msk [vmem:[#allocation4 + $0x58] sm:$0xff] %vm36_vm0, %v596_v61  ;;  %v550_v43 = vmul.f32 %v1874_v10, %v534_v29  ;;  %v2421_v39 = vpop.eup %1875  ;;  %1883 = vrcp.f32 %v926_v35 }
 0x2ce   :  { %v1878_v5 = vpop.eup %1877  ;;  %v549_v14 = vmul.f32 %v2421_v39, %v533_v32  ;;  %1885 = vrcp.f32 %v924_v22 }
 0x2cf   :  { %v2426_v33 = vpop.eup %1879  ;;  %1887 = vrcp.f32 %v928_v44 }
 0x2d0   :  { %v580_v52 = vpop.xlane.xlu0 %579  ;;  %v1882_v42 = vpop.eup %1881 }
 0x2d1   :  { %v598_v17 = vadd.f32 %v580_v52, %v550_v43 }
 0x2d3   :  { %615 = vst.msk [vmem:[#allocation4 + $0x68] sm:$0xff] %vm36_vm0, %v598_v17  ;;  %701 = vperm.xlu2 %1804, %v1874_v10   ;;  %v1884_v34 = vpop.eup %1883  ;;  %v821_v10 = vpop.f32.mrf.mxu0 }
 0x2d4   :  { %967 = vperm.xlu1 %1803, %v1878_v5   ;;  %676 = vperm.xlu0 %1802, %v1864_v49   ;;  %v1886_v27 = vpop.eup %1885  ;;  %v929_v55 = vld [vmem:[#allocation4 + $0x58] sm:$0xff]  ;;  %v637_v49 = vpop.permute.xlu1 %636 }
 0x2d5   :  { %v578_v30 = vpop.xlane.xlu2 %577  ;;  %v1888_v63 = vpop.eup %1887  ;;  %1889 = vrcp.f32 %v929_v55  ;;  %v714_v51 = vmul.f32 0.0, %v637_v49 }
 0x2d6   :  { %v597_v13 = vadd.f32 %v578_v30, %v549_v14 }
 0x2d8   :  { %614 = vst.msk [vmem:[#allocation4 + $0x60] sm:$0xff] %vm36_vm0, %v597_v13 }
 0x2da   :  { %v931_v3 = vld [vmem:[#allocation4 + $0x68] sm:$0xff] }
 0x2db   :  { %706 = vperm.xlu2 %1804, %v2426_v33   ;;  %v1890_v48 = vpop.eup %1889  ;;  %v823_v30 = vpop.f32.mrf.mxu0 }
 0x2dc   :  { %972 = vperm.xlu1 %1803, %v1882_v42   ;;  %681 = vperm.xlu0 %1802, %v2373_v6   ;;  %v1696_v6 = vld [vmem:[%s2697_s5 + $0x38] sm:$0xff]  ;;  %v647_v26 = vpop.permute.xlu1 %646 }
 0x2dd   :  { %1154 = vmatpush.bf16.msra.mxu1 %v1696_v6  ;;  %v652_v40 = vpop.permute.xlu2 %651  ;;  %v716_v28 = vmul.f32 0.0, %v647_v26 }
 0x2de   :  { %v717_v31 = vmul.f32 0.0, %v652_v40 }
 0x2df   :  { %v930_v4 = vld [vmem:[#allocation4 + $0x60] sm:$0xff]  ;;  %v853_v5 = vadd.f32 %v816_v23, %v716_v28 }
 0x2e0   :  { %1891 = vrcp.f32 %v930_v4  ;;  %v854_v13 = vadd.f32 %v818_v50, %v717_v31  ;;  %v1701_v28 = vld [vmem:[%s2698_s6 + $0x20] sm:$0xff] }
 0x2e1   :  { %1893 = vpow2.f32 %v391_v0 }
 0x2e2   :  { %1895 = vrcp.f32 %v927_v46 }
 0x2e4   :  { %671 = vperm.xlu1 %1803, %v2364_v57   ;;  %992 = vperm.xlu0 %1802, %v1884_v34   ;;  %v1695_v57 = vld [vmem:[%s2697_s5 + $0x30] sm:$0xff] }
 0x2e5   :  { %1155 = vmatpush.bf16.msra.mxu1 %v1695_v57  ;;  %v2452_v58 = vpop.permute.xlu2 %666  ;;  %v826_v57 = vpop.f32.mrf.mxu0 }
 0x2e6   :  { %v1892_v56 = vpop.eup %1891 }
 0x2e7   :  { %v1894_v54 = vpop.eup %1893 }
 0x2e8   :  { %v552_v36 = vmul.f32 %v1894_v54, %v536_v8  ;;  %v1896_v19 = vpop.eup %1895 }
 0x2e9   :  { %1156 = vmatpush.bf16.msra.mxu1 %v1694_v41 }
 0x2ec   :  { %982 = vperm.xlu1 %1803, %v1886_v27   ;;  %691 = vperm.xlu0 %1802, %v1868_v11   ;;  %v851_v11 = vadd.f32 %v811_v37, %v714_v51 }
 0x2ed   :  { %1157 = vmatpush.bf16.msra.mxu1 %v1693_v59  ;;  %v2461_v9 = vpop.permute.xlu2 %987 }
 0x2ee   :  { %v1030_v12 = vmul.f32 %v2414_v24, %v851_v11  ;;  %v657_v24 = vpop.permute.xlu0 %656  ;;  %v551_v11 = vmul.f32 %v2426_v33, %v535_v1  ;;  %v1703_v33 = vld [vmem:[%s2698_s6 + $0x30] sm:$0xff] }
 0x2ef   :  { %v718_v44 = vmul.f32 0.0, %v657_v24 }
 0x2f0   :  { %v1050_v16 = vadd.f32 %v2468_v18, %v1030_v12 }
 0x2f1   :  { %1158 = vmatpush.bf16.msra.mxu1 %v1692_v38 }
 0x2f2   :  { %v1066_v29 = vmax.f32 %v1050_v16, 0.0  ;;  %v1711_v16 = vld [vmem:[%s2699_s7 + $0x30] sm:$0xff] }
 0x2f4   :  { %1002 = vperm.xlu0 %1802, %v1888_v63  }
 0x2f5   :  { %1159 = vmatpush.bf16.msra.mxu1 %v1691_v47  ;;  %v828_v47 = vpop.f32.mrf.mxu0 }
 0x2f6   :  { %v662_v22 = vpop.permute.xlu0 %661 }
 0x2f7   :  { %v719_v63 = vmul.f32 0.0, %v662_v22 }
 0x2f9   :  { %1160 = vmatpush.bf16.msra.mxu1 %v1690_v2  ;;  %v720_v2 = vmul.f32 0.0, %v2452_v58 }
 0x2fc   :  { %1007 = vperm.xlu0 %1802, %v1890_v48   ;;  %v855_v48 = vadd.f32 %v821_v10, %v718_v44  ;;  %v1702_v10 = vld [vmem:[%s2698_s6 + $0x28] sm:$0xff] }
 0x2fd   :  { %1161 = vmatpush.bf16.msra.mxu1 %v1689_v15  ;;  %v831_v12 = vpop.f32.mrf.mxu0 }
 0x304   :  { %1012 = vperm.xlu0 %1802, %v1892_v56   ;;  %v856_v56 = vadd.f32 %v823_v30, %v719_v63  ;;  %v1698_v63 = vld [vmem:[%s2698_s6 + $0x8] sm:$0xff] }
 0x30c   :  { %711 = vperm.xlu0 %1802, %v1894_v54  }
 0x316   :  { %581 = vadd.xlane.f32.xlu1 %v2394_v53 }
 0x326   :  { %v584_v53 = vpop.xlane.xlu2 %583 }
 0x327   :  { %v600_v45 = vadd.f32 %v584_v53, %v552_v36  ;;  %v857_v36 = vadd.f32 %v826_v57, %v720_v2 }
 0x329   :  { %617 = vst.msk [vmem:[#allocation4 + $0x78] sm:$0xff] %vm36_vm0, %v600_v45 }
 0x32e   :  { %v687_v57 = vpop.permute.xlu2 %686 }
 0x32f   :  { %997 = vperm.xlu1 %1803, %v1896_v19  }
 0x330   :  { %v933_v62 = vld [vmem:[#allocation4 + $0x78] sm:$0xff] }
 0x331   :  { %1897 = vrcp.f32 %v933_v62 }
 0x332   :  { %1899 = vrcp.f32 %v931_v3 }
 0x336   :  { %v958_v60 = vpop.permute.xlu1 %957 }
 0x337   :  { %v1898_v25 = vpop.eup %1897  ;;  %v1031_v61 = vmul.f32 %v958_v60, %v852_v20  ;;  %696 = vperm.xlu1 %1803, %v2421_v39   ;;  %v1704_v60 = vld [vmem:[%s2698_s6 + $0x38] sm:$0xff] }
 0x338   :  { %1027 = vperm.xlu2 %1804, %v1898_v25   ;;  %v1900_v17 = vpop.eup %1899  ;;  %v1712_v25 = vld [vmem:[%s2699_s7 + $0x38] sm:$0xff]  ;;  %1347 = vmatpush.bf16.msra.mxu2 %v1704_v60 }
 0x339   :  { %v1051_v7 = vadd.f32 %v2468_v18, %v1031_v61  ;;  %1476 = vmatpush.bf16.msra.mxu3 %v1712_v25  ;;  %v833_v61 = vpop.f32.mrf.mxu0 }
 0x33b   :  { %v1067_v43 = vmax.f32 %v1051_v7, 0.0 }
 0x33c   :  { %1348 = vmatpush.bf16.msra.mxu2 %v1703_v33 }
 0x33d   :  { %v1082_v52 = vpack.c.bf16 %v1067_v43, %v1066_v29  ;;  %1477 = vmatpush.bf16.msra.mxu3 %v1711_v16  ;;  %v1710_v29 = vld [vmem:[%s2699_s7 + $0x28] sm:$0xff] }
 0x33e   :  { %v963_v32 = vpop.permute.xlu1 %962  ;;  %v978_v0 = vpop.permute.xlu0 %977 }
 0x33f   :  { %1162 = vmatmul.bf16.vlgmr.msra.gmra.mxu1 %v1082_v52  ;;  %1017 = vperm.xlu1 %1803, %v1900_v17   ;;  %v1032_v14 = vmul.f32 %v963_v32, %v853_v5  ;;  %v1035_v40 = vmul.f32 %v978_v0, %v856_v56  ;;  %v1709_v52 = vld [vmem:[%s2699_s7 + $0x20] sm:$0xff]  ;;  %v1700_v5 = vld [vmem:[%s2698_s6 + $0x18] sm:$0xff] }
 0x340   :  { %1349 = vmatpush.bf16.msra.mxu2 %v1702_v10 }
 0x341   :  { %v1052_v35 = vadd.f32 %v2468_v18, %v1032_v14  ;;  %v1055_v38 = vadd.f32 %v2468_v18, %v1035_v40  ;;  %1478 = vmatpush.bf16.msra.mxu3 %v1710_v29  ;;  %v1708_v14 = vld [vmem:[%s2699_s7 + $0x18] sm:$0xff]  ;;  %v836_v30 = vpop.f32.mrf.mxu0  ;;  %v1705_v40 = vld [vmem:[%s2699_s7] sm:$0xff] }
 0x343   :  { %v1068_v27 = vmax.f32 %v1052_v35, 0.0  ;;  %v1071_v8 = vmax.f32 %v1055_v38, 0.0  ;;  %v1699_v35 = vld [vmem:[%s2698_s6 + $0x10] sm:$0xff] }
 0x344   :  { %1350 = vmatpush.bf16.msra.mxu2 %v1701_v28 }
 0x345   :  { %1479 = vmatpush.bf16.msra.mxu3 %v1709_v52 }
 0x346   :  { %v968_v39 = vpop.permute.xlu1 %967  ;;  %v677_v62 = vpop.permute.xlu0 %676 }
 0x347   :  { %v1033_v42 = vmul.f32 %v968_v39, %v854_v13  ;;  %v722_v17 = vmul.f32 0.0, %v677_v62 }
 0x348   :  { %1351 = vmatpush.bf16.msra.mxu2 %v1700_v5 }
 0x349   :  { %v1053_v34 = vadd.f32 %v2468_v18, %v1033_v42  ;;  %v859_v31 = vadd.f32 %v831_v12, %v722_v17  ;;  %1480 = vmatpush.bf16.msra.mxu3 %v1708_v14  ;;  %v1707_v42 = vld [vmem:[%s2699_s7 + $0x10] sm:$0xff]  ;;  %v838_v56 = vpop.f32.mrf.mxu0 }
 0x34b   :  { %v1069_v55 = vmax.f32 %v1053_v34, 0.0 }
 0x34c   :  { %1352 = vmatpush.bf16.msra.mxu2 %v1699_v35 }
 0x34d   :  { %v1083_v6 = vpack.c.bf16 %v1069_v55, %v1068_v27  ;;  %1481 = vmatpush.bf16.msra.mxu3 %v1707_v42 }
 0x34e   :  { %v973_v4 = vpop.permute.xlu1 %972  ;;  %v682_v58 = vpop.permute.xlu0 %681 }
 0x34f   :  { %1167 = vmatmul.bf16.gmra.mxu1 %v1083_v6  ;;  %v1034_v41 = vmul.f32 %v973_v4, %v855_v48  ;;  %v723_v32 = vmul.f32 0.0, %v682_v58  ;;  %v1706_v6 = vld [vmem:[%s2699_s7 + $0x8] sm:$0xff] }
 0x350   :  { %1353 = vmatpush.bf16.msra.mxu2 %v1698_v63 }
 0x351   :  { %v1054_v59 = vadd.f32 %v2468_v18, %v1034_v41  ;;  %v860_v22 = vadd.f32 %v833_v61, %v723_v32  ;;  %1482 = vmatpush.bf16.msra.mxu3 %v1706_v6  ;;  %v1697_v41 = vld [vmem:[%s2698_s6] sm:$0xff] }
 0x353   :  { %v1070_v15 = vmax.f32 %v1054_v59, 0.0  ;;  %v724_v59 = vmul.f32 0.0, %v687_v57 }
 0x354   :  { %1354 = vmatpush.bf16.msra.mxu2 %v1697_v41 }
 0x355   :  { %v1084_v46 = vpack.c.bf16 %v1071_v8, %v1070_v15  ;;  %1483 = vmatpush.bf16.msra.mxu3 %v1705_v40 }
 0x356   :  { %v672_v54 = vpop.permute.xlu1 %671  ;;  %v993_v3 = vpop.permute.xlu0 %992 }
 0x357   :  { %v721_v37 = vmul.f32 0.0, %v672_v54  ;;  %v1038_v13 = vmul.f32 %v993_v3, %v859_v31 }
 0x359   :  { %v858_v21 = vadd.f32 %v828_v47, %v721_v37  ;;  %v1058_v44 = vadd.f32 %v2468_v18, %v1038_v13  ;;  %v861_v47 = vadd.f32 %v836_v30, %v724_v59 }
 0x35b   :  { %v1037_v49 = vmul.f32 %v2461_v9, %v858_v21  ;;  %v1074_v4 = vmax.f32 %v1058_v44, 0.0  ;;  %v841_v21 = vpop.f32.mrf.mxu0 }
 0x35d   :  { %v1057_v45 = vadd.f32 %v2468_v18, %v1037_v49 }
 0x35e   :  { %v983_v23 = vpop.permute.xlu1 %982  ;;  %v692_v43 = vpop.permute.xlu0 %691 }
 0x35f   :  { %v1036_v53 = vmul.f32 %v983_v23, %v857_v36  ;;  %1172 = vmatmul.bf16.gmra.mxu1 %v1084_v46  ;;  %v1073_v26 = vmax.f32 %v1057_v45, 0.0  ;;  %v725_v48 = vmul.f32 0.0, %v692_v43  ;;  %v702_v46 = vpop.permute.xlu2 %701 }
 0x361   :  { %v1056_v51 = vadd.f32 %v2468_v18, %v1036_v53  ;;  %v862_v37 = vadd.f32 %v838_v56, %v725_v48  ;;  %v727_v53 = vmul.f32 0.0, %v702_v46 }
 0x363   :  { %v1072_v19 = vmax.f32 %v1056_v51, 0.0 }
 0x365   :  { %v1085_v50 = vpack.c.bf16 %v1073_v26, %v1072_v19  ;;  %v843_v26 = vpop.f32.mrf.mxu0 }
 0x366   :  { %v1003_v39 = vpop.permute.xlu0 %1002  ;;  %v864_v58 = vadd.f32 %v843_v26, %v727_v53 }
 0x367   :  { %v1040_v15 = vmul.f32 %v1003_v39, %v861_v47  ;;  %v707_v40 = vpop.permute.xlu2 %706 }
 0x368   :  { %v728_v47 = vmul.f32 0.0, %v707_v40 }
 0x369   :  { %v1060_v36 = vadd.f32 %v2468_v18, %v1040_v15 }
 0x36b   :  { %v1076_v45 = vmax.f32 %v1060_v36, 0.0 }
 0x36d   :  { %v846_v41 = vpop.f32.mrf.mxu0 }
 0x36e   :  { %v1008_v38 = vpop.permute.xlu0 %1007 }
 0x36f   :  { %1177 = vmatmul.bf16.gmra.mxu1 %v1085_v50  ;;  %v1041_v2 = vmul.f32 %v1008_v38, %v862_v37 }
 0x371   :  { %v1061_v49 = vadd.f32 %v2468_v18, %v1041_v2 }
 0x373   :  { %v1077_v23 = vmax.f32 %v1061_v49, 0.0 }
 0x375   :  { %v1087_v19 = vpack.c.bf16 %v1077_v23, %v1076_v45  ;;  %v848_v38 = vpop.f32.mrf.mxu0 }
 0x376   :  { %v1013_v12 = vpop.permute.xlu0 %1012 }
 0x37e   :  { %v712_v59 = vpop.permute.xlu0 %711 }
 0x389   :  { %v582_v9 = vpop.xlane.xlu1 %581 }
 0x38a   :  { %v599_v20 = vadd.f32 %v582_v9, %v551_v11 }
 0x38c   :  { %616 = vst.msk [vmem:[#allocation4 + $0x70] sm:$0xff] %vm36_vm0, %v599_v20 }
 0x392   :  { %v1028_v37 = vpop.permute.xlu2 %1027 }
 0x393   :  { %v932_v7 = vld [vmem:[#allocation4 + $0x70] sm:$0xff] }
 0x394   :  { %1901 = vrcp.f32 %v932_v7 }
 0x39a   :  { %v1902_v24 = vpop.eup %1901 }
 0x39b   :  { %1022 = vperm.xlu1 %1803, %v1902_v24  }
 0x3a1   :  { %v998_v34 = vpop.permute.xlu1 %997 }
 0x3a2   :  { %v1039_v27 = vmul.f32 %v998_v34, %v860_v22 }
 0x3a4   :  { %v1059_v55 = vadd.f32 %v2468_v18, %v1039_v27 }
 0x3a6   :  { %v1075_v0 = vmax.f32 %v1059_v55, 0.0 }
 0x3a8   :  { %v1086_v54 = vpack.c.bf16 %v1075_v0, %v1074_v4 }
 0x3a9   :  { %v697_v8 = vpop.permute.xlu1 %696 }
 0x3aa   :  { %1182 = vmatmul.bf16.gmra.mxu1 %v1086_v54  ;;  %v726_v51 = vmul.f32 0.0, %v697_v8  ;;  %v729_v54 = vmul.f32 0.0, %v712_v59 }
 0x3ac   :  { %v863_v62 = vadd.f32 %v841_v21, %v726_v51  ;;  %v866_v2 = vadd.f32 %v848_v38, %v729_v54  ;;  %v865_v21 = vadd.f32 %v846_v41, %v728_v47 }
 0x3ae   :  { %v1042_v9 = vmul.f32 %v1013_v12, %v863_v62  ;;  %v1045_v15 = vmul.f32 %v1028_v37, %v866_v2 }
 0x3b0   :  { %v1062_v3 = vadd.f32 %v2468_v18, %v1042_v9  ;;  %v1065_v49 = vadd.f32 %v2468_v18, %v1045_v15 }
 0x3b1   :  { %v1018_v50 = vpop.permute.xlu1 %1017 }
 0x3b2   :  { %v1043_v1 = vmul.f32 %v1018_v50, %v864_v58  ;;  %v1078_v7 = vmax.f32 %v1062_v3, 0.0  ;;  %v1081_v23 = vmax.f32 %v1065_v49, 0.0 }
 0x3b4   :  { %v1063_v20 = vadd.f32 %v2468_v18, %v1043_v1 }
 0x3b6   :  { %v1079_v25 = vmax.f32 %v1063_v20, 0.0 }
 0x3b8   :  { %v1088_v43 = vpack.c.bf16 %v1079_v25, %v1078_v7 }
 0x3ba   :  { %1187 = vmatmul.bf16.gmra.mxu1 %v1087_v19 }
 0x3bc   :  { %v1163_v11 = vpop.f32.mrf.mxu1 }
 0x3bd   :  { %v1203_v60 = vpack.c.bf16 %v1163_v11, %v1163_v11 }
 0x3bf   :  { %v1267_v10 = vunpack.c.l.b16 %v1203_v60 }
 0x3c4   :  { %v1165_v33 = vpop.f32.mrf.mxu1 }
 0x3c5   :  { %v1204_v16 = vpack.c.bf16 %v1165_v33, %v1165_v33  ;;  %v1748_v61 = vpack.c.bf16 %v1165_v33, %v1163_v11 }
 0x3c7   :  { %1749 = vst [vmem:[%s2700_s8] sm:$0xff] %v1748_v61   ;;  %v1268_v29 = vunpack.c.l.b16 %v1204_v16 }
 0x3c9   :  { %v1283_v28 = vpack.c.b16 %v1268_v29, %v1267_v10 }
 0x3ca   :  { %1192 = vmatmul.bf16.gmra.mxu1 %v1088_v43 }
 0x3cb   :  { %1355 = vmatmul.bf16.vlgmr.msra.gmra.mxu2 %v1283_v28  ;;  %1484 = vmatmul.bf16.vlgmr.msra.gmra.mxu3 %v1283_v28 }
 0x3cc   :  { %v1168_v52 = vpop.f32.mrf.mxu1 }
 0x3cd   :  { %v1205_v17 = vpack.c.bf16 %v1168_v52, %v1168_v52 }
 0x3cf   :  { %v1269_v5 = vunpack.c.l.b16 %v1205_v17 }
 0x3d4   :  { %v1170_v24 = vpop.f32.mrf.mxu1 }
 0x3d5   :  { %v1206_v32 = vpack.c.bf16 %v1170_v24, %v1170_v24  ;;  %v1753_v31 = vpack.c.bf16 %v1170_v24, %v1168_v52 }
 0x3d7   :  { %1792 = vst [vmem:[%s2700_s8 + $0x8] sm:$0xff] %v1753_v31   ;;  %v1270_v14 = vunpack.c.l.b16 %v1206_v32 }
 0x3d9   :  { %v1284_v30 = vpack.c.b16 %v1270_v14, %v1269_v5 }
 0x3db   :  { %1360 = vmatmul.bf16.gmra.mxu2 %v1284_v30  ;;  %1489 = vmatmul.bf16.gmra.mxu3 %v1284_v30 }
 0x3dc   :  { %v1173_v13 = vpop.f32.mrf.mxu1 }
 0x3dd   :  { %v1207_v39 = vpack.c.bf16 %v1173_v13, %v1173_v13 }
 0x3df   :  { %v1271_v34 = vunpack.c.l.b16 %v1207_v39 }
 0x3e4   :  { %v1175_v35 = vpop.f32.mrf.mxu1 }
 0x3e5   :  { %v1208_v42 = vpack.c.bf16 %v1175_v35, %v1175_v35  ;;  %v1758_v22 = vpack.c.bf16 %v1175_v35, %v1173_v13 }
 0x3e7   :  { %1793 = vst [vmem:[%s2700_s8 + $0x10] sm:$0xff] %v1758_v22   ;;  %v1272_v44 = vunpack.c.l.b16 %v1208_v42 }
 0x3e9   :  { %v1285_v27 = vpack.c.b16 %v1272_v44, %v1271_v34 }
 0x3eb   :  { %1365 = vmatmul.bf16.gmra.mxu2 %v1285_v27  ;;  %1494 = vmatmul.bf16.gmra.mxu3 %v1285_v27 }
 0x3ec   :  { %v1178_v55 = vpop.f32.mrf.mxu1 }
 0x3ed   :  { %v1209_v63 = vpack.c.bf16 %v1178_v55, %v1178_v55 }
 0x3ef   :  { %v1273_v48 = vunpack.c.l.b16 %v1209_v63 }
 0x3f4   :  { %v1180_v6 = vpop.f32.mrf.mxu1 }
 0x3f5   :  { %v1210_v57 = vpack.c.bf16 %v1180_v6, %v1180_v6  ;;  %v1763_v4 = vpack.c.bf16 %v1180_v6, %v1178_v55 }
 0x3f7   :  { %1794 = vst [vmem:[%s2700_s8 + $0x18] sm:$0xff] %v1763_v4   ;;  %v1274_v0 = vunpack.c.l.b16 %v1210_v57 }
 0x3f9   :  { %v1286_v56 = vpack.c.b16 %v1274_v0, %v1273_v48 }
 0x3fb   :  { %1370 = vmatmul.bf16.gmra.mxu2 %v1286_v56  ;;  %1499 = vmatmul.bf16.gmra.mxu3 %v1286_v56 }
 0x40d   :  { %v1023_v8 = vpop.permute.xlu1 %1022 }
 0x40e   :  { %v1044_v36 = vmul.f32 %v1023_v8, %v865_v21 }
 0x410   :  { %v1064_v46 = vadd.f32 %v2468_v18, %v1044_v36 }
 0x412   :  { %v1080_v53 = vmax.f32 %v1064_v46, 0.0 }
 0x414   :  { %v1089_v45 = vpack.c.bf16 %v1081_v23, %v1080_v53 }
 0x416   :  { %1197 = vmatmul.bf16.gmra.mxu1 %v1089_v45 }
 0x427   :  { %v1183_v51 = vpop.f32.mrf.mxu1 }
 0x428   :  { %v1211_v19 = vpack.c.bf16 %v1183_v51, %v1183_v51 }
 0x42a   :  { %v1275_v58 = vunpack.c.l.b16 %v1211_v19 }
 0x42f   :  { %v1185_v26 = vpop.f32.mrf.mxu1 }
 0x430   :  { %v1212_v50 = vpack.c.bf16 %v1185_v26, %v1185_v26  ;;  %v1768_v62 = vpack.c.bf16 %v1185_v26, %v1183_v51 }
 0x432   :  { %1795 = vst [vmem:[%s2700_s8 + $0x20] sm:$0xff] %v1768_v62   ;;  %v1276_v1 = vunpack.c.l.b16 %v1212_v50 }
 0x434   :  { %v1287_v11 = vpack.c.b16 %v1276_v1, %v1275_v58 }
 0x436   :  { %1375 = vmatmul.bf16.gmra.mxu2 %v1287_v11  ;;  %1504 = vmatmul.bf16.gmra.mxu3 %v1287_v11 }
 0x437   :  { %v1188_v12 = vpop.f32.mrf.mxu1 }
 0x438   :  { %v1213_v18 = vpack.c.bf16 %v1188_v12, %v1188_v12 }
 0x43a   :  { %v1277_v60 = vunpack.c.l.b16 %v1213_v18 }
 0x43f   :  { %v1190_v9 = vpop.f32.mrf.mxu1 }
 0x440   :  { %v1214_v20 = vpack.c.bf16 %v1190_v9, %v1190_v9  ;;  %v1773_v3 = vpack.c.bf16 %v1190_v9, %v1188_v12 }
 0x442   :  { %1796 = vst [vmem:[%s2700_s8 + $0x28] sm:$0xff] %v1773_v3   ;;  %v1278_v25 = vunpack.c.l.b16 %v1214_v20 }
 0x444   :  { %v1288_v33 = vpack.c.b16 %v1278_v25, %v1277_v60 }
 0x446   :  { %1380 = vmatmul.bf16.gmra.mxu2 %v1288_v33  ;;  %1509 = vmatmul.bf16.gmra.mxu3 %v1288_v33 }
 0x447   :  { %v1193_v16 = vpop.f32.mrf.mxu1 }
 0x448   :  { %v1215_v61 = vpack.c.bf16 %v1193_v16, %v1193_v16 }
 0x44a   :  { %v1279_v52 = vunpack.c.l.b16 %v1215_v61 }
 0x44e   :  { %v1356_v7 = vpop.f32.mrf.mxu2  ;;  %v1485_v10 = vpop.f32.mrf.mxu3 }
 0x44f   :  { %1396 = vst.msk [vmem:[%s2701_s9] sm:$0xff] %vm36_vm0, %v1356_v7  ;;  %v1195_v29 = vpop.f32.mrf.mxu1 }
 0x450   :  { %1525 = vst.msk [vmem:[%s2702_s10] sm:$0xff] %vm36_vm0, %v1485_v10  ;;  %v1216_v43 = vpack.c.bf16 %v1195_v29, %v1195_v29  ;;  %v1778_v28 = vpack.c.bf16 %v1195_v29, %v1193_v16 }
 0x452   :  { %1797 = vst [vmem:[%s2700_s8 + $0x30] sm:$0xff] %v1778_v28   ;;  %v1280_v17 = vunpack.c.l.b16 %v1216_v43 }
 0x454   :  { %v1289_v24 = vpack.c.b16 %v1280_v17, %v1279_v52 }
 0x456   :  { %v1358_v32 = vpop.f32.mrf.mxu2  ;;  %1385 = vmatmul.bf16.gmra.mxu2 %v1289_v24  ;;  %v1487_v31 = vpop.f32.mrf.mxu3  ;;  %1514 = vmatmul.bf16.gmra.mxu3 %v1289_v24 }
 0x457   :  { %1397 = vst.msk [vmem:[%s2701_s9 + $0x8] sm:$0xff] %vm36_vm0, %v1358_v32 }
 0x458   :  { %1526 = vst.msk [vmem:[%s2702_s10 + $0x8] sm:$0xff] %vm36_vm0, %v1487_v31 }
 0x45e   :  { %v1361_v5 = vpop.f32.mrf.mxu2  ;;  %v1490_v14 = vpop.f32.mrf.mxu3 }
 0x45f   :  { %1398 = vst.msk [vmem:[%s2701_s9 + $0x10] sm:$0xff] %vm36_vm0, %v1361_v5 }
 0x460   :  { %1527 = vst.msk [vmem:[%s2702_s10 + $0x10] sm:$0xff] %vm36_vm0, %v1490_v14 }
 0x466   :  { %v1363_v30 = vpop.f32.mrf.mxu2  ;;  %v1492_v13 = vpop.f32.mrf.mxu3 }
 0x467   :  { %1399 = vst.msk [vmem:[%s2701_s9 + $0x18] sm:$0xff] %vm36_vm0, %v1363_v30 }
 0x468   :  { %1528 = vst.msk [vmem:[%s2702_s10 + $0x18] sm:$0xff] %vm36_vm0, %v1492_v13 }
 0x46e   :  { %v1366_v39 = vpop.f32.mrf.mxu2  ;;  %v1495_v35 = vpop.f32.mrf.mxu3 }
 0x46f   :  { %1400 = vst.msk [vmem:[%s2701_s9 + $0x20] sm:$0xff] %vm36_vm0, %v1366_v39 }
 0x470   :  { %1529 = vst.msk [vmem:[%s2702_s10 + $0x20] sm:$0xff] %vm36_vm0, %v1495_v35 }
 0x476   :  { %v1368_v42 = vpop.f32.mrf.mxu2  ;;  %v1497_v22 = vpop.f32.mrf.mxu3 }
 0x477   :  { %1401 = vst.msk [vmem:[%s2701_s9 + $0x28] sm:$0xff] %vm36_vm0, %v1368_v42 }
 0x478   :  { %1530 = vst.msk [vmem:[%s2702_s10 + $0x28] sm:$0xff] %vm36_vm0, %v1497_v22 }
 0x47e   :  { %v1371_v34 = vpop.f32.mrf.mxu2  ;;  %v1500_v44 = vpop.f32.mrf.mxu3 }
 0x47f   :  { %1402 = vst.msk [vmem:[%s2701_s9 + $0x30] sm:$0xff] %vm36_vm0, %v1371_v34 }
 0x480   :  { %1531 = vst.msk [vmem:[%s2702_s10 + $0x30] sm:$0xff] %vm36_vm0, %v1500_v44 }
 0x486   :  { %v1373_v27 = vpop.f32.mrf.mxu2  ;;  %v1502_v55 = vpop.f32.mrf.mxu3 }
 0x487   :  { %1403 = vst.msk [vmem:[%s2701_s9 + $0x38] sm:$0xff] %vm36_vm0, %v1373_v27 }
 0x488   :  { %1532 = vst.msk [vmem:[%s2702_s10 + $0x38] sm:$0xff] %vm36_vm0, %v1502_v55 }
 0x493   :  { %v1198_v63 = vpop.f32.mrf.mxu1 }
 0x494   :  { %v1217_v6 = vpack.c.bf16 %v1198_v63, %v1198_v63 }
 0x496   :  { %v1281_v0 = vunpack.c.l.b16 %v1217_v6 }
 0x49b   :  { %v1200_v57 = vpop.f32.mrf.mxu1 }
 0x49c   :  { %v1218_v4 = vpack.c.bf16 %v1200_v57, %v1200_v57  ;;  %v1783_v48 = vpack.c.bf16 %v1200_v57, %v1198_v63 }
 0x49e   :  { %1798 = vst [vmem:[%s2700_s8 + $0x38] sm:$0xff] %v1783_v48   ;;  %v1282_v56 = vunpack.c.l.b16 %v1218_v4 }
 0x4a0   :  { %v1290_v41 = vpack.c.b16 %v1282_v56, %v1281_v0 }
 0x4a2   :  { %1390 = vmatmul.bf16.gmra.mxu2 %v1290_v41  ;;  %1519 = vmatmul.bf16.gmra.mxu3 %v1290_v41 }
 0x4b9   :  { %v1376_v40 = vpop.f32.mrf.mxu2  ;;  %v1505_v59 = vpop.f32.mrf.mxu3 }
 0x4ba   :  { %1404 = vst.msk [vmem:[%s2701_s9 + $0x40] sm:$0xff] %vm36_vm0, %v1376_v40 }
 0x4bb   :  { %1533 = vst.msk [vmem:[%s2702_s10 + $0x40] sm:$0xff] %vm36_vm0, %v1505_v59 }
 0x4c1   :  { %v1378_v54 = vpop.f32.mrf.mxu2  ;;  %v1507_v38 = vpop.f32.mrf.mxu3 }
 0x4c2   :  { %1405 = vst.msk [vmem:[%s2701_s9 + $0x48] sm:$0xff] %vm36_vm0, %v1378_v54 }
 0x4c3   :  { %1534 = vst.msk [vmem:[%s2702_s10 + $0x48] sm:$0xff] %vm36_vm0, %v1507_v38 }
 0x4c9   :  { %v1381_v37 = vpop.f32.mrf.mxu2  ;;  %v1510_v47 = vpop.f32.mrf.mxu3 }
 0x4ca   :  { %1406 = vst.msk [vmem:[%s2701_s9 + $0x50] sm:$0xff] %vm36_vm0, %v1381_v37 }
 0x4cb   :  { %1535 = vst.msk [vmem:[%s2702_s10 + $0x50] sm:$0xff] %vm36_vm0, %v1510_v47 }
 0x4d1   :  { %v1383_v2 = vpop.f32.mrf.mxu2  ;;  %v1512_v15 = vpop.f32.mrf.mxu3 }
 0x4d2   :  { %1407 = vst.msk [vmem:[%s2701_s9 + $0x58] sm:$0xff] %vm36_vm0, %v1383_v2 }
 0x4d3   :  { %1536 = vst.msk [vmem:[%s2702_s10 + $0x58] sm:$0xff] %vm36_vm0, %v1512_v15 }
 0x4d9   :  { %v1386_v21 = vpop.f32.mrf.mxu2  ;;  %v1515_v8 = vpop.f32.mrf.mxu3 }
 0x4da   :  { %1408 = vst.msk [vmem:[%s2701_s9 + $0x60] sm:$0xff] %vm36_vm0, %v1386_v21 }
 0x4db   :  { %1537 = vst.msk [vmem:[%s2702_s10 + $0x60] sm:$0xff] %vm36_vm0, %v1515_v8 }
 0x4e1   :  { %v1388_v49 = vpop.f32.mrf.mxu2  ;;  %v1517_v36 = vpop.f32.mrf.mxu3 }
 0x4e2   :  { %1409 = vst.msk [vmem:[%s2701_s9 + $0x68] sm:$0xff] %vm36_vm0, %v1388_v49 }
 0x4e3   :  { %1538 = vst.msk [vmem:[%s2702_s10 + $0x68] sm:$0xff] %vm36_vm0, %v1517_v36 }
 0x525   :  { %v1391_v46 = vpop.f32.mrf.mxu2  ;;  %v1520_v23 = vpop.f32.mrf.mxu3 }
 0x526   :  { %1410 = vst.msk [vmem:[%s2701_s9 + $0x70] sm:$0xff] %vm36_vm0, %v1391_v46 }
 0x527   :  { %1539 = vst.msk [vmem:[%s2702_s10 + $0x70] sm:$0xff] %vm36_vm0, %v1520_v23 }
 0x52d   :  { %v1393_v53 = vpop.f32.mrf.mxu2  ;;  %v1522_v45 = vpop.f32.mrf.mxu3 }
 0x52e   :  { %1411 = vst.msk [vmem:[%s2701_s9 + $0x78] sm:$0xff] %vm36_vm0, %v1393_v53 }
 0x52f   :  { %1540 = vst.msk [vmem:[%s2702_s10 + $0x78] sm:$0xff] %vm36_vm0, %v1522_v45 }

// kernel: caugramer_forward.9
= control target key start
LH: loop header
LB: loop body
LE: loop exit
PB: predicated region body
PF: predicated region fallthrough
CT: control target
= control target key end

     0   :  { %s439_s1 = inlined_call_operand.vmem [shape: bf16[128,128], index: 1, kind: input, shape index: {}]   ;;  %s440_s2 = inlined_call_operand.vmem [shape: f32[1,128], index: 2, kind: input, shape index: {}]   ;;  %s441_s0 = inlined_call_operand.vmem [shape: bf16[128,128], index: 0, kind: input, shape index: {}]   ;;  %s442_s3 = inlined_call_operand.vmem [shape: f32[128,128], index: 3, kind: output, shape index: {}]  }
   0x1   :  { %v294_v0 = vld [vmem:[%s439_s1 + $0x38] sm:$0xff]  ;;  %v293_v1 = vld [vmem:[%s439_s1 + $0x30] sm:$0xff]  ;;  %v292_v2 = vld [vmem:[%s439_s1 + $0x28] sm:$0xff] }
   0x2   :  { %146 = vmatpush.bf16.msra.mxu0 %v294_v0  ;;  %295 = vmatpush.bf16.msra.mxu1 %v294_v0  ;;  %v291_v3 = vld [vmem:[%s439_s1 + $0x20] sm:$0xff]  ;;  %v290_v4 = vld [vmem:[%s439_s1 + $0x18] sm:$0xff]  ;;  %v289_v5 = vld [vmem:[%s439_s1 + $0x10] sm:$0xff] }
   0x3   :  { %296 = vmatpush.bf16.msra.mxu2 %v294_v0  ;;  %297 = vmatpush.bf16.msra.mxu3 %v294_v0  ;;  %v288_v6 = vld [vmem:[%s439_s1 + $0x8] sm:$0xff]  ;;  %v287_v7 = vld [vmem:[%s439_s1] sm:$0xff]  ;;  %v281_v9 = vld [vmem:[%s441_s0 + $0x10] sm:$0xff] }
   0x4   :  { %v279_v8 = vld [vmem:[%s441_s0] sm:$0xff]  ;;  %v285_v11 = vld [vmem:[%s441_s0 + $0x30] sm:$0xff]  ;;  %v280_v12 = vld [vmem:[%s441_s0 + $0x8] sm:$0xff] }
   0x5   :  { %v283_v10 = vld [vmem:[%s441_s0 + $0x20] sm:$0xff]  ;;  %v282_v13 = vld [vmem:[%s441_s0 + $0x18] sm:$0xff]  ;;  %v284_v14 = vld [vmem:[%s441_s0 + $0x28] sm:$0xff] }
   0x6   :  { %147 = vmatpush.bf16.msra.mxu0 %v293_v1  ;;  %298 = vmatpush.bf16.msra.mxu1 %v293_v1  ;;  %v286_v15 = vld [vmem:[%s441_s0 + $0x38] sm:$0xff]  ;;  %v319_v16 = vld [vmem:[%s440_s2] ss:$0 sm:$0xff] }
   0x7   :  { %299 = vmatpush.bf16.msra.mxu2 %v293_v1  ;;  %300 = vmatpush.bf16.msra.mxu3 %v293_v1 }
   0xa   :  { %148 = vmatpush.bf16.msra.mxu0 %v292_v2  ;;  %301 = vmatpush.bf16.msra.mxu1 %v292_v2 }
   0xb   :  { %302 = vmatpush.bf16.msra.mxu2 %v292_v2  ;;  %303 = vmatpush.bf16.msra.mxu3 %v292_v2 }
   0xe   :  { %149 = vmatpush.bf16.msra.mxu0 %v291_v3  ;;  %304 = vmatpush.bf16.msra.mxu1 %v291_v3 }
   0xf   :  { %305 = vmatpush.bf16.msra.mxu2 %v291_v3  ;;  %306 = vmatpush.bf16.msra.mxu3 %v291_v3 }
  0x12   :  { %150 = vmatpush.bf16.msra.mxu0 %v290_v4  ;;  %307 = vmatpush.bf16.msra.mxu1 %v290_v4 }
  0x13   :  { %308 = vmatpush.bf16.msra.mxu2 %v290_v4  ;;  %309 = vmatpush.bf16.msra.mxu3 %v290_v4 }
  0x16   :  { %151 = vmatpush.bf16.msra.mxu0 %v289_v5  ;;  %310 = vmatpush.bf16.msra.mxu1 %v289_v5 }
  0x17   :  { %311 = vmatpush.bf16.msra.mxu2 %v289_v5  ;;  %312 = vmatpush.bf16.msra.mxu3 %v289_v5 }
  0x1a   :  { %152 = vmatpush.bf16.msra.mxu0 %v288_v6  ;;  %313 = vmatpush.bf16.msra.mxu1 %v288_v6 }
  0x1b   :  { %314 = vmatpush.bf16.msra.mxu2 %v288_v6  ;;  %315 = vmatpush.bf16.msra.mxu3 %v288_v6 }
  0x1e   :  { %153 = vmatpush.bf16.msra.mxu0 %v287_v7  ;;  %316 = vmatpush.bf16.msra.mxu1 %v287_v7 }
  0x1f   :  { %317 = vmatpush.bf16.msra.mxu2 %v287_v7  ;;  %318 = vmatpush.bf16.msra.mxu3 %v287_v7 }
  0x21   :  { %154 = vmatmul.bf16.vlgmr.msra.gmra.mxu0 %v279_v8  ;;  %164 = vmatmul.bf16.vlgmr.msra.gmra.mxu1 %v281_v9 }
  0x22   :  { %174 = vmatmul.bf16.vlgmr.msra.gmra.mxu2 %v283_v10  ;;  %184 = vmatmul.bf16.vlgmr.msra.gmra.mxu3 %v285_v11 }
  0x31   :  { %159 = vmatmul.bf16.gmra.mxu0 %v280_v12  ;;  %169 = vmatmul.bf16.gmra.mxu1 %v282_v13 }
  0x32   :  { %179 = vmatmul.bf16.gmra.mxu2 %v284_v14  ;;  %189 = vmatmul.bf16.gmra.mxu3 %v286_v15 }
  0x9e   :  { %v155_v17 = vpop.f32.mrf.mxu0  ;;  %v165_v18 = vpop.f32.mrf.mxu1 }
  0x9f   :  { %v156_v19 = vadd.f32 %v319_v16, %v155_v17  ;;  %v166_v20 = vadd.f32 %v319_v16, %v165_v18 }
  0xa1   :  { %195 = vst [vmem:[%s442_s3] sm:$0xff] %v156_v19 }
  0xa2   :  { %199 = vst [vmem:[%s442_s3 + $0x20] sm:$0xff] %v166_v20 }
  0xa5   :  { %v175_v21 = vpop.f32.mrf.mxu2  ;;  %v185_v22 = vpop.f32.mrf.mxu3 }
  0xa6   :  { %v176_v23 = vadd.f32 %v319_v16, %v175_v21  ;;  %v186_v24 = vadd.f32 %v319_v16, %v185_v22  ;;  %v157_v25 = vpop.f32.mrf.mxu0  ;;  %v167_v26 = vpop.f32.mrf.mxu1 }
  0xa7   :  { %v158_v27 = vadd.f32 %v319_v16, %v157_v25  ;;  %v168_v28 = vadd.f32 %v319_v16, %v167_v26 }
  0xa8   :  { %203 = vst [vmem:[%s442_s3 + $0x40] sm:$0xff] %v176_v23 }
  0xa9   :  { %207 = vst [vmem:[%s442_s3 + $0x60] sm:$0xff] %v186_v24 }
  0xaa   :  { %196 = vst [vmem:[%s442_s3 + $0x8] sm:$0xff] %v158_v27 }
  0xab   :  { %200 = vst [vmem:[%s442_s3 + $0x28] sm:$0xff] %v168_v28 }
  0xad   :  { %v177_v29 = vpop.f32.mrf.mxu2  ;;  %v187_v30 = vpop.f32.mrf.mxu3 }
  0xae   :  { %v178_v31 = vadd.f32 %v319_v16, %v177_v29  ;;  %v188_v32 = vadd.f32 %v319_v16, %v187_v30  ;;  %v160_v33 = vpop.f32.mrf.mxu0  ;;  %v170_v34 = vpop.f32.mrf.mxu1 }
  0xaf   :  { %v161_v35 = vadd.f32 %v319_v16, %v160_v33  ;;  %v171_v36 = vadd.f32 %v319_v16, %v170_v34 }
  0xb0   :  { %204 = vst [vmem:[%s442_s3 + $0x48] sm:$0xff] %v178_v31 }
  0xb1   :  { %208 = vst [vmem:[%s442_s3 + $0x68] sm:$0xff] %v188_v32 }
  0xb2   :  { %197 = vst [vmem:[%s442_s3 + $0x10] sm:$0xff] %v161_v35 }
  0xb3   :  { %201 = vst [vmem:[%s442_s3 + $0x30] sm:$0xff] %v171_v36 }
  0xb5   :  { %v180_v37 = vpop.f32.mrf.mxu2  ;;  %v190_v38 = vpop.f32.mrf.mxu3 }
  0xb6   :  { %v181_v39 = vadd.f32 %v319_v16, %v180_v37  ;;  %v191_v40 = vadd.f32 %v319_v16, %v190_v38  ;;  %v162_v41 = vpop.f32.mrf.mxu0  ;;  %v172_v42 = vpop.f32.mrf.mxu1 }
  0xb7   :  { %v163_v43 = vadd.f32 %v319_v16, %v162_v41  ;;  %v173_v44 = vadd.f32 %v319_v16, %v172_v42 }
  0xb8   :  { %205 = vst [vmem:[%s442_s3 + $0x50] sm:$0xff] %v181_v39 }
  0xb9   :  { %209 = vst [vmem:[%s442_s3 + $0x70] sm:$0xff] %v191_v40 }
  0xba   :  { %198 = vst [vmem:[%s442_s3 + $0x18] sm:$0xff] %v163_v43 }
  0xbb   :  { %202 = vst [vmem:[%s442_s3 + $0x38] sm:$0xff] %v173_v44 }
  0xbd   :  { %v182_v45 = vpop.f32.mrf.mxu2  ;;  %v192_v46 = vpop.f32.mrf.mxu3 }
  0xbe   :  { %v183_v47 = vadd.f32 %v319_v16, %v182_v45  ;;  %v193_v48 = vadd.f32 %v319_v16, %v192_v46 }
  0xc0   :  { %206 = vst [vmem:[%s442_s3 + $0x58] sm:$0xff] %v183_v47 }
  0xc1   :  { %210 = vst [vmem:[%s442_s3 + $0x78] sm:$0xff] %v193_v48 }

// kernel: caugramer_forward.7
= control target key start
LH: loop header
LB: loop body
LE: loop exit
PB: predicated region body
PF: predicated region fallthrough
CT: control target
= control target key end

     0   :  { %v1344_v0 = vmov 0   ;;  %vm24_vm0 = vcmask 7168   ;;  %s1897_s1 = inlined_call_operand.vmem [shape: f32[128,1], index: 1, kind: input, shape index: {}]   ;;  %s1898_s2 = inlined_call_operand.vmem [shape: f32[1,128], index: 2, kind: input, shape index: {}]   ;;  %s1899_s0 = inlined_call_operand.vmem [shape: bf16[128,128], index: 0, kind: input, shape index: {}]   ;;  %s1900_s3 = inlined_call_operand.vmem [shape: bf16[128,128], index: 3, kind: input, shape index: {}]   ;;  %s1901_s4 = inlined_call_operand.vmem [shape: f32[1,128], index: 4, kind: input, shape index: {}]   ;;  %s1902_s5 = inlined_call_operand.vmem [shape: bf16[128,128], index: 5, kind: output, shape index: {}]  }
   0x1   :  { %1244 = vset.pattern.permute.xlu1 %v1344_v0  ;;  %1243 = vset.pattern.permute.xlu0 %v1344_v0  ;;  %v75_v1 = vld [vmem:[%s1897_s1 + $0x10] sm:$0xff]  ;;  %v73_v2 = vld [vmem:[%s1897_s1] sm:$0xff]  ;;  %v76_v4 = vld [vmem:[%s1897_s1 + $0x18] sm:$0xff] }
   0x2   :  { %102 = vperm.xlu1 %1244, %v75_v1   ;;  %92 = vperm.xlu0 %1243, %v73_v2   ;;  %v77_v3 = vld [vmem:[%s1897_s1 + $0x20] sm:$0xff]  ;;  %v74_v5 = vld [vmem:[%s1897_s1 + $0x8] sm:$0xff]  ;;  %v80_v7 = vld [vmem:[%s1897_s1 + $0x38] sm:$0xff] }
   0x3   :  { %1245 = vset.pattern.permute.xlu2 %v1344_v0  ;;  %v78_v6 = vld [vmem:[%s1897_s1 + $0x28] sm:$0xff]  ;;  %v79_v8 = vld [vmem:[%s1897_s1 + $0x30] sm:$0xff]  ;;  %v81_v9 = vld [vmem:[%s1897_s1 + $0x40] sm:$0xff] }
   0x4   :  { %112 = vperm.xlu2 %1245, %v77_v3   ;;  %v83_v10 = vld [vmem:[%s1897_s1 + $0x50] sm:$0xff]  ;;  %v82_v11 = vld [vmem:[%s1897_s1 + $0x48] sm:$0xff]  ;;  %v84_v12 = vld [vmem:[%s1897_s1 + $0x58] sm:$0xff] }
   0x5   :  { %v86_v13 = vld [vmem:[%s1897_s1 + $0x68] sm:$0xff]  ;;  %v85_v14 = vld [vmem:[%s1897_s1 + $0x60] sm:$0xff]  ;;  %v87_v15 = vld [vmem:[%s1897_s1 + $0x70] sm:$0xff] }
   0x6   :  { %v88_v16 = vld [vmem:[%s1897_s1 + $0x78] sm:$0xff]  ;;  %v1202_v17 = vld [vmem:[%s1899_s0 + $0x8] sm:$0xff]   ;;  %v1131_v18 = vld [vmem:[%s1899_s0] sm:$0xff]  }
   0x7   :  { %v1434_v19 = vld [vmem:[%s1898_s2] ss:$0 sm:$0xff]  ;;  %v1203_v20 = vld [vmem:[%s1899_s0 + $0x10] sm:$0xff]   ;;  %v1136_v22 = vunpack.c.l.bf16 %v1202_v17  ;;  %v1132_v23 = vunpack.c.l.bf16 %v1131_v18  ;;  %v1133_v35 = vunpack.c.h.bf16 %v1131_v18  ;;  %v1137_v44 = vunpack.c.h.bf16 %v1202_v17  ;;  %v1204_v46 = vld [vmem:[%s1899_s0 + $0x18] sm:$0xff]  }
   0x8   :  { %v1140_v27 = vunpack.c.l.bf16 %v1203_v20  ;;  %v1145_v50 = vunpack.c.h.bf16 %v1204_v46  ;;  %v1144_v51 = vunpack.c.l.bf16 %v1204_v46  ;;  %v1141_v58 = vunpack.c.h.bf16 %v1203_v20  ;;  %v1465_v63 = vld [vmem:[%s1899_s0 + $0x28] sm:$0xff]   ;;  %v1205_v3 = vld [vmem:[%s1899_s0 + $0x20] sm:$0xff]   ;;  %v1207_v20 = vld [vmem:[%s1899_s0 + $0x30] sm:$0xff]  }
   0xa   :  { %107 = vperm.xlu1 %1244, %v76_v4   ;;  %97 = vperm.xlu0 %1243, %v74_v5   ;;  %v1152_v4 = vunpack.c.l.bf16 %v1465_v63  ;;  %v1149_v5 = vunpack.c.h.bf16 %v1205_v3 }
   0xc   :  { %117 = vperm.xlu2 %1245, %v78_v6  }
  0x12   :  { %127 = vperm.xlu1 %1244, %v80_v7   ;;  %122 = vperm.xlu0 %1243, %v79_v8  }
  0x14   :  { %132 = vperm.xlu2 %1245, %v81_v9  }
  0x1a   :  { %142 = vperm.xlu1 %1244, %v83_v10   ;;  %137 = vperm.xlu0 %1243, %v82_v11  }
  0x1c   :  { %147 = vperm.xlu2 %1245, %v84_v12  }
  0x22   :  { %157 = vperm.xlu1 %1244, %v86_v13   ;;  %152 = vperm.xlu0 %1243, %v85_v14   ;;  %v1148_v14 = vunpack.c.l.bf16 %v1205_v3 }
  0x24   :  { %162 = vperm.xlu2 %1245, %v87_v15  }
  0x2a   :  { %167 = vperm.xlu0 %1243, %v88_v16   ;;  %v1345_v16 = vmov -1e+30  }
  0x2b   :  { %27 = vst.msk [vmem:[#allocation3 + $0x10] sm:$0xff] %vm24_vm0, %v1345_v16 }
  0x2c   :  { %25 = vst.msk [vmem:[#allocation3] sm:$0xff] %vm24_vm0, %v1345_v16 }
  0x2d   :  { %26 = vst.msk [vmem:[#allocation3 + $0x8] sm:$0xff] %vm24_vm0, %v1345_v16 }
  0x2e   :  { %28 = vst.msk [vmem:[#allocation3 + $0x18] sm:$0xff] %vm24_vm0, %v1345_v16 }
  0x2f   :  { %29 = vst.msk [vmem:[#allocation3 + $0x20] sm:$0xff] %vm24_vm0, %v1345_v16 }
  0x30   :  { %30 = vst.msk [vmem:[#allocation3 + $0x28] sm:$0xff] %vm24_vm0, %v1345_v16 }
  0x31   :  { %31 = vst.msk [vmem:[#allocation3 + $0x30] sm:$0xff] %vm24_vm0, %v1345_v16 }
  0x32   :  { %32 = vst.msk [vmem:[#allocation3 + $0x38] sm:$0xff] %vm24_vm0, %v1345_v16 }
  0x33   :  { %33 = vst.msk [vmem:[#allocation3 + $0x40] sm:$0xff] %vm24_vm0, %v1345_v16 }
  0x34   :  { %34 = vst.msk [vmem:[#allocation3 + $0x48] sm:$0xff] %vm24_vm0, %v1345_v16 }
  0x35   :  { %35 = vst.msk [vmem:[#allocation3 + $0x50] sm:$0xff] %vm24_vm0, %v1345_v16 }
  0x36   :  { %36 = vst.msk [vmem:[#allocation3 + $0x58] sm:$0xff] %vm24_vm0, %v1345_v16 }
  0x37   :  { %37 = vst.msk [vmem:[#allocation3 + $0x60] sm:$0xff] %vm24_vm0, %v1345_v16 }
  0x38   :  { %38 = vst.msk [vmem:[#allocation3 + $0x68] sm:$0xff] %vm24_vm0, %v1345_v16 }
  0x39   :  { %39 = vst.msk [vmem:[#allocation3 + $0x70] sm:$0xff] %vm24_vm0, %v1345_v16 }
  0x3a   :  { %40 = vst.msk [vmem:[#allocation3 + $0x78] sm:$0xff] %vm24_vm0, %v1345_v16  ;;  %v1574_v16 = vld [vmem:[#allocation3 + $0x18] sm:$0xff] }
  0x5e   :  { %v113_v21 = vpop.permute.xlu2 %112 }
  0x5f   :  { %v177_v26 = vadd.f32 %v1434_v19, %v113_v21 }
  0x61   :  { %v225_v32 = vadd.f32 %v1140_v27, %v177_v26  ;;  %v1157_v26 = vunpack.c.h.bf16 %v1207_v20  ;;  %v1156_v27 = vunpack.c.l.bf16 %v1207_v20 }
  0x63   :  { %v241_v41 = vmul.f32 0.2, %v225_v32 }
  0x65   :  { %v1453_v48 = vmax.f32 %v225_v32, %v241_v41 }
  0x66   :  { %v118_v42 = vpop.permute.xlu2 %117 }
  0x67   :  { %v178_v57 = vadd.f32 %v1434_v19, %v118_v42 }
  0x69   :  { %v226_v2 = vadd.f32 %v1141_v58, %v178_v57 }
  0x6b   :  { %v242_v15 = vmul.f32 0.2, %v226_v2 }
  0x6e   :  { %v133_v62 = vpop.permute.xlu2 %132 }
  0x6f   :  { %v181_v13 = vadd.f32 %v1434_v19, %v133_v62 }
  0x74   :  { %v103_v24 = vpop.permute.xlu1 %102  ;;  %v93_v25 = vpop.permute.xlu0 %92 }
  0x75   :  { %v175_v28 = vadd.f32 %v1434_v19, %v103_v24  ;;  %v173_v29 = vadd.f32 %v1434_v19, %v93_v25  ;;  %v1490_v25 = vmax.f32 %v226_v2, %v242_v15  ;;  %v1572_v15 = vld [vmem:[#allocation3 + $0x30] sm:$0xff] }
  0x76   :  { %v148_v24 = vpop.permute.xlu2 %147 }
  0x77   :  { %v223_v30 = vadd.f32 %v1136_v22, %v175_v28  ;;  %v221_v31 = vadd.f32 %v1132_v23, %v173_v29  ;;  %v229_v23 = vadd.f32 %v1148_v14, %v181_v13 }
  0x79   :  { %v239_v33 = vmul.f32 0.2, %v223_v30  ;;  %v237_v34 = vmul.f32 0.2, %v221_v31 }
  0x7b   :  { %v1442_v36 = vmax.f32 %v223_v30, %v239_v33  ;;  %v1444_v37 = vmax.f32 %v221_v31, %v237_v34  ;;  %v245_v34 = vmul.f32 0.2, %v229_v23 }
  0x7c   :  { %v108_v38 = vpop.permute.xlu1 %107  ;;  %v98_v39 = vpop.permute.xlu0 %97 }
  0x7d   :  { %v174_v40 = vadd.f32 %v1434_v19, %v98_v39  ;;  %289 = vmax.xlane.f32.xlu0 %v1442_v36  ;;  %285 = vmax.xlane.f32.xlu1 %v1444_v37  ;;  %v176_v43 = vadd.f32 %v1434_v19, %v108_v38  ;;  %v1153_v38 = vunpack.c.h.bf16 %v1465_v63 }
  0x7f   :  { %v222_v45 = vadd.f32 %v1133_v35, %v174_v40  ;;  %v224_v49 = vadd.f32 %v1137_v44, %v176_v43  ;;  %v184_v35 = vadd.f32 %v1434_v19, %v148_v24  ;;  %v1208_v43 = vld [vmem:[%s1899_s0 + $0x38] sm:$0xff]   ;;  %v1514_v44 = vmax.f32 %v229_v23, %v245_v34 }
  0x80   :  { %v1161_v46 = vunpack.c.h.bf16 %v1208_v43 }
  0x81   :  { %v238_v47 = vmul.f32 0.2, %v222_v45  ;;  %v240_v61 = vmul.f32 0.2, %v224_v49 }
  0x83   :  { %v1455_v52 = vmax.f32 %v222_v45, %v238_v47  ;;  %v1473_v7 = vmax.f32 %v224_v49, %v240_v61  ;;  %v232_v45 = vadd.f32 %v1153_v38, %v184_v35 }
  0x84   :  { %v128_v53 = vpop.permute.xlu1 %127  ;;  %v123_v54 = vpop.permute.xlu0 %122 }
  0x85   :  { %v180_v55 = vadd.f32 %v1434_v19, %v128_v53  ;;  %v179_v56 = vadd.f32 %v1434_v19, %v123_v54  ;;  %287 = vmax.xlane.f32.xlu2 %v1455_v52  ;;  %293 = vmax.xlane.f32.xlu1 %v1453_v48  ;;  %v248_v57 = vmul.f32 0.2, %v232_v45 }
  0x87   :  { %v228_v59 = vadd.f32 %v1145_v50, %v180_v55  ;;  %v227_v60 = vadd.f32 %v1144_v51, %v179_v56  ;;  %v163_v50 = vpop.permute.xlu2 %162  ;;  %v1160_v55 = vunpack.c.l.bf16 %v1208_v43  ;;  %v1531_v61 = vmax.f32 %v232_v45, %v248_v57  ;;  %v1633_v57 = vld [vmem:[#allocation3 + $0x58] sm:$0xff] }
  0x88   :  { %v187_v54 = vadd.f32 %v1434_v19, %v163_v50 }
  0x89   :  { %v243_v0 = vmul.f32 0.2, %v227_v60  ;;  %v244_v1 = vmul.f32 0.2, %v228_v59 }
  0x8b   :  { %v1471_v6 = vmax.f32 %v227_v60, %v243_v0  ;;  %v1475_v8 = vmax.f32 %v228_v59, %v244_v1  ;;  %v235_v59 = vadd.f32 %v1160_v55, %v187_v54  ;;  %v1346_v0 = vmov 0.0   ;;  %v1554_v1 = vld [vmem:[#allocation3] sm:$0xff] }
  0x8c   :  { %v143_v9 = vpop.permute.xlu1 %142  ;;  %v138_v10 = vpop.permute.xlu0 %137  ;;  %41 = vst.msk [vmem:[#allocation4] sm:$0xff] %vm24_vm0, %v1346_v0 }
  0x8d   :  { %v183_v11 = vadd.f32 %v1434_v19, %v143_v9  ;;  %v182_v12 = vadd.f32 %v1434_v19, %v138_v10  ;;  %297 = vmax.xlane.f32.xlu0 %v1471_v6  ;;  %291 = vmax.xlane.f32.xlu2 %v1473_v7  ;;  %v251_v62 = vmul.f32 0.2, %v235_v59  ;;  %42 = vst.msk [vmem:[#allocation4 + $0x8] sm:$0xff] %vm24_vm0, %v1346_v0  ;;  %v1563_v9 = vld [vmem:[#allocation3 + $0x8] sm:$0xff]  ;;  %v273_v10 = vld [vmem:[#allocation3 + $0x20] sm:$0xff] }
  0x8e   :  { %299 = vmax.xlane.f32.xlu1 %v1475_v8  ;;  %43 = vst.msk [vmem:[#allocation4 + $0x10] sm:$0xff] %vm24_vm0, %v1346_v0 }
  0x8f   :  { %v231_v17 = vadd.f32 %v1152_v4, %v183_v11  ;;  %v230_v18 = vadd.f32 %v1149_v5, %v182_v12  ;;  %v1535_v63 = vmax.f32 %v235_v59, %v251_v62  ;;  %44 = vst.msk [vmem:[#allocation4 + $0x18] sm:$0xff] %vm24_vm0, %v1346_v0 }
  0x90   :  { %45 = vst.msk [vmem:[#allocation4 + $0x20] sm:$0xff] %vm24_vm0, %v1346_v0 }
  0x91   :  { %v246_v21 = vmul.f32 0.2, %v230_v18  ;;  %v247_v22 = vmul.f32 0.2, %v231_v17  ;;  %46 = vst.msk [vmem:[#allocation4 + $0x28] sm:$0xff] %vm24_vm0, %v1346_v0 }
  0x92   :  { %47 = vst.msk [vmem:[#allocation4 + $0x30] sm:$0xff] %vm24_vm0, %v1346_v0 }
  0x93   :  { %v1493_v28 = vmax.f32 %v230_v18, %v246_v21  ;;  %v1495_v29 = vmax.f32 %v231_v17, %v247_v22  ;;  %48 = vst.msk [vmem:[#allocation4 + $0x38] sm:$0xff] %vm24_vm0, %v1346_v0  ;;  %v1576_v17 = vld [vmem:[#allocation3 + $0x38] sm:$0xff] }
  0x94   :  { %v158_v30 = vpop.permute.xlu1 %157  ;;  %v153_v31 = vpop.permute.xlu0 %152  ;;  %49 = vst.msk [vmem:[#allocation4 + $0x40] sm:$0xff] %vm24_vm0, %v1346_v0 }
  0x95   :  { %v186_v32 = vadd.f32 %v1434_v19, %v158_v30  ;;  %v185_v33 = vadd.f32 %v1434_v19, %v153_v31  ;;  %303 = vmax.xlane.f32.xlu0 %v1493_v28  ;;  %295 = vmax.xlane.f32.xlu2 %v1490_v25  ;;  %50 = vst.msk [vmem:[#allocation4 + $0x48] sm:$0xff] %vm24_vm0, %v1346_v0  ;;  %v1595_v30 = vld [vmem:[#allocation3 + $0x50] sm:$0xff] }
  0x96   :  { %305 = vmax.xlane.f32.xlu1 %v1495_v29  ;;  %51 = vst.msk [vmem:[#allocation4 + $0x50] sm:$0xff] %vm24_vm0, %v1346_v0 }
  0x97   :  { %v234_v39 = vadd.f32 %v1157_v26, %v186_v32  ;;  %v233_v40 = vadd.f32 %v1156_v27, %v185_v33  ;;  %52 = vst.msk [vmem:[#allocation4 + $0x58] sm:$0xff] %vm24_vm0, %v1346_v0  ;;  %v1591_v26 = vld [vmem:[#allocation3 + $0x48] sm:$0xff] }
  0x98   :  { %53 = vst.msk [vmem:[#allocation4 + $0x60] sm:$0xff] %vm24_vm0, %v1346_v0  ;;  %v1593_v27 = vld [vmem:[#allocation3 + $0x28] sm:$0xff] }
  0x99   :  { %v249_v41 = vmul.f32 0.2, %v233_v40  ;;  %v250_v42 = vmul.f32 0.2, %v234_v39  ;;  %54 = vst.msk [vmem:[#allocation4 + $0x68] sm:$0xff] %vm24_vm0, %v1346_v0 }
  0x9a   :  { %55 = vst.msk [vmem:[#allocation4 + $0x70] sm:$0xff] %vm24_vm0, %v1346_v0 }
  0x9b   :  { %v1517_v47 = vmax.f32 %v233_v40, %v249_v41  ;;  %v1519_v49 = vmax.f32 %v234_v39, %v250_v42  ;;  %56 = vst.msk [vmem:[#allocation4 + $0x78] sm:$0xff] %vm24_vm0, %v1346_v0  ;;  %v1615_v40 = vld [vmem:[#allocation3 + $0x60] sm:$0xff]  ;;  %v1619_v42 = vld [vmem:[#allocation3 + $0x68] sm:$0xff] }
  0x9c   :  { %v168_v51 = vpop.permute.xlu0 %167  ;;  %v1617_v41 = vld [vmem:[#allocation3 + $0x40] sm:$0xff] }
  0x9d   :  { %v188_v53 = vadd.f32 %v1434_v19, %v168_v51  ;;  %309 = vmax.xlane.f32.xlu0 %v1517_v47  ;;  %301 = vmax.xlane.f32.xlu2 %v1514_v44  ;;  %v271_v19 = vld [vmem:[#allocation3 + $0x10] sm:$0xff] }
  0x9e   :  { %311 = vmax.xlane.f32.xlu1 %v1519_v49 }
  0x9f   :  { %v236_v56 = vadd.f32 %v1161_v46, %v188_v53 }
  0xa1   :  { %v252_v58 = vmul.f32 0.2, %v236_v56 }
  0xa3   :  { %v1529_v60 = vmax.f32 %v236_v56, %v252_v58  ;;  %v1631_v56 = vld [vmem:[#allocation3 + $0x78] sm:$0xff] }
  0xa5   :  { %315 = vmax.xlane.f32.xlu0 %v1529_v60  ;;  %307 = vmax.xlane.f32.xlu2 %v1531_v61 }
  0xad   :  { %313 = vmax.xlane.f32.xlu2 %v1535_v63 }
  0xf0   :  { %v290_v2 = vpop.xlane.xlu0 %289  ;;  %v286_v3 = vpop.xlane.xlu1 %285 }
  0xf1   :  { %v319_v4 = vmax.f32 %v271_v19, %v290_v2  ;;  %v1557_v5 = vmax.f32 %v1554_v1, %v286_v3 }
  0xf3   :  { %873 = vst.msk [vmem:[#allocation3 + $0x10] sm:$0xff] %vm24_vm0, %v319_v4  ;;  %393 = vperm.xlu0 %1243, %v319_v4   ;;  %383 = vperm.xlu1 %1244, %v1557_v5   ;;  %v335_v39 = vsub.f32 %v271_v19, %v319_v4  ;;  %v333_v3 = vsub.f32 %v1554_v1, %v1557_v5 }
  0xf4   :  { %871 = vst.msk [vmem:[#allocation3] sm:$0xff] %vm24_vm0, %v1557_v5 }
  0xf5   :  { %v353_v46 = vmul.f32 1.442695, %v335_v39  ;;  %v349_v1 = vmul.f32 1.442695, %v333_v3  ;;  %v1125_v3 = vld [vmem:[%s1900_s3 + $0x18] sm:$0xff] }
  0xf7   :  { %1248 = vpow2.f32 %v353_v46  ;;  %v1128_v46 = vld [vmem:[%s1900_s3 + $0x30] sm:$0xff] }
  0xf8   :  { %v288_v11 = vpop.xlane.xlu2 %287  ;;  %v294_v12 = vpop.xlane.xlu1 %293 }
  0xf9   :  { %v1566_v13 = vmax.f32 %v1563_v9, %v288_v11  ;;  %v321_v14 = vmax.f32 %v273_v10, %v294_v12  ;;  %v1655_v11 = vld [vmem:[#allocation3 + $0x70] sm:$0xff] }
  0xfb   :  { %872 = vst.msk [vmem:[#allocation3 + $0x8] sm:$0xff] %vm24_vm0, %v1566_v13  ;;  %388 = vperm.xlu2 %1245, %v1566_v13   ;;  %403 = vperm.xlu0 %1243, %v321_v14   ;;  %v337_v55 = vsub.f32 %v273_v10, %v321_v14  ;;  %v334_v4 = vsub.f32 %v1563_v9, %v1566_v13 }
  0xfc   :  { %875 = vst.msk [vmem:[#allocation3 + $0x20] sm:$0xff] %vm24_vm0, %v321_v14 }
  0xfd   :  { %v357_v62 = vmul.f32 1.442695, %v337_v55  ;;  %v1641_v2 = vpop.eup %1248  ;;  %v351_v5 = vmul.f32 1.442695, %v334_v4 }
  0xff   :  { %1250 = vpow2.f32 %v357_v62 }
 0x100   :  { %v298_v18 = vpop.xlane.xlu0 %297  ;;  %v292_v20 = vpop.xlane.xlu2 %291  ;;  %1252 = vpow2.f32 %v349_v1 }
 0x101   :  { %v1579_v21 = vmax.f32 %v1572_v15, %v298_v18  ;;  %v1582_v22 = vmax.f32 %v1574_v16, %v292_v20  ;;  %v300_v23 = vpop.xlane.xlu1 %299  ;;  %1254 = vpow2.f32 %v351_v5 }
 0x102   :  { %v324_v24 = vmax.f32 %v1576_v17, %v300_v23 }
 0x103   :  { %877 = vst.msk [vmem:[#allocation3 + $0x30] sm:$0xff] %vm24_vm0, %v1579_v21  ;;  %398 = vperm.xlu1 %1244, %v1582_v22   ;;  %v336_v9 = vsub.f32 %v1574_v16, %v1582_v22 }
 0x104   :  { %874 = vst.msk [vmem:[#allocation3 + $0x18] sm:$0xff] %vm24_vm0, %v1582_v22  ;;  %418 = vperm.xlu0 %1243, %v324_v24   ;;  %v340_v10 = vsub.f32 %v1576_v17, %v324_v24 }
 0x105   :  { %878 = vst.msk [vmem:[#allocation3 + $0x38] sm:$0xff] %vm24_vm0, %v324_v24  ;;  %v1660_v20 = vpop.eup %1250  ;;  %v355_v23 = vmul.f32 1.442695, %v336_v9 }
 0x106   :  { %v363_v14 = vmul.f32 1.442695, %v340_v10  ;;  %v1673_v16 = vpop.eup %1252 }
 0x108   :  { %v304_v31 = vpop.xlane.xlu0 %303  ;;  %v296_v32 = vpop.xlane.xlu2 %295  ;;  %1256 = vpow2.f32 %v363_v14 }
 0x109   :  { %v1598_v33 = vmax.f32 %v1591_v26, %v304_v31  ;;  %v1601_v34 = vmax.f32 %v1593_v27, %v296_v32  ;;  %v306_v35 = vpop.xlane.xlu1 %305  ;;  %v1675_v31 = vpop.eup %1254  ;;  %1258 = vpow2.f32 %v355_v23 }
 0x10a   :  { %v1604_v38 = vmax.f32 %v1595_v30, %v306_v35  ;;  %v339_v35 = vsub.f32 %v1572_v15, %v1579_v21 }
 0x10b   :  { %880 = vst.msk [vmem:[#allocation3 + $0x48] sm:$0xff] %vm24_vm0, %v1598_v33  ;;  %408 = vperm.xlu2 %1245, %v1601_v34   ;;  %413 = vperm.xlu1 %1244, %v1579_v21   ;;  %v338_v13 = vsub.f32 %v1593_v27, %v1601_v34  ;;  %v342_v21 = vsub.f32 %v1591_v26, %v1598_v33 }
 0x10c   :  { %876 = vst.msk [vmem:[#allocation3 + $0x28] sm:$0xff] %vm24_vm0, %v1601_v34  ;;  %433 = vperm.xlu0 %1243, %v1604_v38   ;;  %v343_v17 = vsub.f32 %v1595_v30, %v1604_v38  ;;  %v361_v34 = vmul.f32 1.442695, %v339_v35 }
 0x10d   :  { %881 = vst.msk [vmem:[#allocation3 + $0x50] sm:$0xff] %vm24_vm0, %v1604_v38  ;;  %v359_v24 = vmul.f32 1.442695, %v338_v13  ;;  %v367_v26 = vmul.f32 1.442695, %v342_v21 }
 0x10e   :  { %v369_v22 = vmul.f32 1.442695, %v343_v17  ;;  %v1677_v32 = vpop.eup %1256 }
 0x10f   :  { %1260 = vpow2.f32 %v359_v24  ;;  %v1686_v39 = vpop.eup %1258 }
 0x110   :  { %v310_v43 = vpop.xlane.xlu0 %309  ;;  %v302_v45 = vpop.xlane.xlu2 %301  ;;  %1262 = vpow2.f32 %v369_v22 }
 0x111   :  { %v1622_v50 = vmax.f32 %v1615_v40, %v310_v43  ;;  %v325_v51 = vmax.f32 %v1617_v41, %v302_v45  ;;  %v312_v53 = vpop.xlane.xlu1 %311  ;;  %1264 = vpow2.f32 %v361_v34 }
 0x112   :  { %v330_v54 = vmax.f32 %v1619_v42, %v312_v53 }
 0x113   :  { %883 = vst.msk [vmem:[#allocation3 + $0x60] sm:$0xff] %vm24_vm0, %v1622_v50  ;;  %423 = vperm.xlu2 %1245, %v325_v51   ;;  %428 = vperm.xlu1 %1244, %v1598_v33   ;;  %v341_v27 = vsub.f32 %v1617_v41, %v325_v51  ;;  %v1129_v41 = vld [vmem:[%s1900_s3 + $0x38] sm:$0xff] }
 0x114   :  { %879 = vst.msk [vmem:[#allocation3 + $0x40] sm:$0xff] %vm24_vm0, %v325_v51  ;;  %448 = vperm.xlu0 %1243, %v330_v54   ;;  %v346_v30 = vsub.f32 %v1619_v42, %v330_v54  ;;  %790 = vmatpush.bf16.msra.mxu0 %v1129_v41 }
 0x115   :  { %884 = vst.msk [vmem:[#allocation3 + $0x68] sm:$0xff] %vm24_vm0, %v330_v54  ;;  %v365_v38 = vmul.f32 1.442695, %v341_v27  ;;  %v1688_v45 = vpop.eup %1260  ;;  %1216 = vmatpush.bf16.msra.mxu1 %v1129_v41  ;;  %1217 = vmatpush.bf16.msra.mxu2 %v1129_v41  ;;  %v1127_v54 = vld [vmem:[%s1900_s3 + $0x28] sm:$0xff] }
 0x116   :  { %v375_v43 = vmul.f32 1.442695, %v346_v30  ;;  %v1690_v15 = vpop.eup %1262  ;;  %1218 = vmatpush.bf16.msra.mxu3 %v1129_v41 }
 0x117   :  { %1266 = vpow2.f32 %v365_v38  ;;  %v1705_v51 = vpop.eup %1264 }
 0x118   :  { %v316_v58 = vpop.xlane.xlu0 %315  ;;  %v308_v59 = vpop.xlane.xlu2 %307  ;;  %1268 = vpow2.f32 %v375_v43  ;;  %791 = vmatpush.bf16.msra.mxu0 %v1128_v46 }
 0x119   :  { %v1636_v0 = vmax.f32 %v1631_v56, %v316_v58  ;;  %v1639_v19 = vmax.f32 %v1633_v57, %v308_v59  ;;  %1219 = vmatpush.bf16.msra.mxu1 %v1128_v46  ;;  %1270 = vpow2.f32 %v367_v26  ;;  %1220 = vmatpush.bf16.msra.mxu2 %v1128_v46  ;;  %v1126_v59 = vld [vmem:[%s1900_s3 + $0x20] sm:$0xff] }
 0x11a   :  { %1221 = vmatpush.bf16.msra.mxu3 %v1128_v46 }
 0x11b   :  { %886 = vst.msk [vmem:[#allocation3 + $0x78] sm:$0xff] %vm24_vm0, %v1636_v0  ;;  %438 = vperm.xlu2 %1245, %v1639_v19   ;;  %443 = vperm.xlu1 %1244, %v1622_v50   ;;  %v344_v42 = vsub.f32 %v1633_v57, %v1639_v19  ;;  %v345_v57 = vsub.f32 %v1615_v40, %v1622_v50 }
 0x11c   :  { %882 = vst.msk [vmem:[#allocation3 + $0x58] sm:$0xff] %vm24_vm0, %v1639_v19  ;;  %634 = vperm.xlu0 %1243, %v1641_v2   ;;  %792 = vmatpush.bf16.msra.mxu0 %v1127_v54  ;;  %v348_v4 = vsub.f32 %v1631_v56, %v1636_v0  ;;  %v1123_v56 = vld [vmem:[%s1900_s3 + $0x8] sm:$0xff] }
 0x11d   :  { %v371_v33 = vmul.f32 1.442695, %v344_v42  ;;  %v1707_v53 = vpop.eup %1266  ;;  %1222 = vmatpush.bf16.msra.mxu1 %v1127_v54  ;;  %v373_v62 = vmul.f32 1.442695, %v345_v57  ;;  %1223 = vmatpush.bf16.msra.mxu2 %v1127_v54 }
 0x11e   :  { %v1712_v55 = vpop.eup %1268  ;;  %1224 = vmatpush.bf16.msra.mxu3 %v1127_v54  ;;  %v379_v10 = vmul.f32 1.442695, %v348_v4 }
 0x11f   :  { %1272 = vpow2.f32 %v371_v33  ;;  %v1724_v50 = vpop.eup %1270 }
 0x120   :  { %v314_v12 = vpop.xlane.xlu2 %313  ;;  %793 = vmatpush.bf16.msra.mxu0 %v1126_v59  ;;  %1274 = vpow2.f32 %v373_v62 }
 0x121   :  { %v1658_v18 = vmax.f32 %v1655_v11, %v314_v12  ;;  %1225 = vmatpush.bf16.msra.mxu1 %v1126_v59  ;;  %1226 = vmatpush.bf16.msra.mxu2 %v1126_v59 }
 0x122   :  { %1227 = vmatpush.bf16.msra.mxu3 %v1126_v59 }
 0x123   :  { %885 = vst.msk [vmem:[#allocation3 + $0x70] sm:$0xff] %vm24_vm0, %v1658_v18  ;;  %453 = vperm.xlu2 %1245, %v1658_v18   ;;  %458 = vperm.xlu1 %1244, %v1636_v0   ;;  %v347_v58 = vsub.f32 %v1655_v11, %v1658_v18  ;;  %v1124_v11 = vld [vmem:[%s1900_s3 + $0x10] sm:$0xff]  ;;  %v1122_v0 = vld [vmem:[%s1900_s3] sm:$0xff] }
 0x124   :  { %644 = vperm.xlu0 %1243, %v1660_v20   ;;  %794 = vmatpush.bf16.msra.mxu0 %v1125_v3 }
 0x125   :  { %v377_v40 = vmul.f32 1.442695, %v347_v58  ;;  %v1726_v19 = vpop.eup %1272  ;;  %1228 = vmatpush.bf16.msra.mxu1 %v1125_v3  ;;  %1229 = vmatpush.bf16.msra.mxu2 %v1125_v3 }
 0x126   :  { %v1738_v1 = vpop.eup %1274  ;;  %1230 = vmatpush.bf16.msra.mxu3 %v1125_v3 }
 0x127   :  { %1276 = vpow2.f32 %v377_v40 }
 0x128   :  { %795 = vmatpush.bf16.msra.mxu0 %v1124_v11  ;;  %1278 = vpow2.f32 %v379_v10 }
 0x129   :  { %1231 = vmatpush.bf16.msra.mxu1 %v1124_v11  ;;  %1232 = vmatpush.bf16.msra.mxu2 %v1124_v11 }
 0x12a   :  { %1233 = vmatpush.bf16.msra.mxu3 %v1124_v11 }
 0x12b   :  { %629 = vperm.xlu1 %1244, %v1675_v31   ;;  %624 = vperm.xlu2 %1245, %v1673_v16  }
 0x12c   :  { %659 = vperm.xlu0 %1243, %v1677_v32   ;;  %796 = vmatpush.bf16.msra.mxu0 %v1123_v56 }
 0x12d   :  { %v1740_v5 = vpop.eup %1276  ;;  %1234 = vmatpush.bf16.msra.mxu1 %v1123_v56  ;;  %1235 = vmatpush.bf16.msra.mxu2 %v1123_v56 }
 0x12e   :  { %1236 = vmatpush.bf16.msra.mxu3 %v1123_v56  ;;  %v1750_v12 = vpop.eup %1278 }
 0x130   :  { %797 = vmatpush.bf16.msra.mxu0 %v1122_v0 }
 0x131   :  { %1237 = vmatpush.bf16.msra.mxu1 %v1122_v0  ;;  %1238 = vmatpush.bf16.msra.mxu2 %v1122_v0 }
 0x132   :  { %1239 = vmatpush.bf16.msra.mxu3 %v1122_v0 }
 0x133   :  { %649 = vperm.xlu1 %1244, %v1688_v45   ;;  %639 = vperm.xlu2 %1245, %v1686_v39  }
 0x134   :  { %674 = vperm.xlu0 %1243, %v1690_v15  }
 0x13b   :  { %664 = vperm.xlu1 %1244, %v1707_v53   ;;  %654 = vperm.xlu2 %1245, %v1705_v51  }
 0x13c   :  { %689 = vperm.xlu0 %1243, %v1712_v55  }
 0x143   :  { %679 = vperm.xlu1 %1244, %v1726_v19   ;;  %669 = vperm.xlu2 %1245, %v1724_v50  }
 0x14b   :  { %694 = vperm.xlu1 %1244, %v1740_v5   ;;  %684 = vperm.xlu2 %1245, %v1738_v1  }
 0x153   :  { %699 = vperm.xlu2 %1245, %v1750_v12  }
 0x155   :  { %v389_v14 = vpop.permute.xlu2 %388 }
 0x156   :  { %v462_v18 = vsub.f32 %v1455_v52, %v389_v14 }
 0x158   :  { %v479_v24 = vmul.f32 1.442695, %v462_v18 }
 0x15a   :  { %1280 = vpow2.f32 %v479_v24 }
 0x160   :  { %v1281_v41 = vpop.eup %1280 }
 0x165   :  { %v394_v9 = vpop.permute.xlu0 %393  ;;  %v409_v13 = vpop.permute.xlu2 %408 }
 0x166   :  { %v463_v17 = vsub.f32 %v1442_v36, %v394_v9  ;;  %v384_v23 = vpop.permute.xlu1 %383  ;;  %v466_v30 = vsub.f32 %v1490_v25, %v409_v13 }
 0x167   :  { %v461_v22 = vsub.f32 %v1444_v37, %v384_v23 }
 0x168   :  { %v481_v27 = vmul.f32 1.442695, %v463_v17  ;;  %v487_v38 = vmul.f32 1.442695, %v466_v30 }
 0x169   :  { %v477_v35 = vmul.f32 1.442695, %v461_v22 }
 0x16b   :  { %1282 = vpow2.f32 %v477_v35 }
 0x16c   :  { %1284 = vpow2.f32 %v481_v27 }
 0x16d   :  { %v404_v34 = vpop.permute.xlu0 %403  ;;  %v424_v52 = vpop.permute.xlu2 %423  ;;  %1286 = vpow2.f32 %v487_v38 }
 0x16e   :  { %v465_v43 = vsub.f32 %v1453_v48, %v404_v34  ;;  %v469_v25 = vsub.f32 %v1514_v44, %v424_v52 }
 0x170   :  { %v485_v21 = vmul.f32 1.442695, %v465_v43  ;;  %v493_v59 = vmul.f32 1.442695, %v469_v25 }
 0x171   :  { %v1283_v42 = vpop.eup %1282 }
 0x172   :  { %1288 = vpow2.f32 %v485_v21  ;;  %541 = vadd.xlane.f32.xlu0 %v1283_v42  ;;  %v718_v36 = vpack.c.bf16 %v1281_v41, %v1283_v42  ;;  %v1285_v37 = vpop.eup %1284 }
 0x173   :  { %v1287_v54 = vpop.eup %1286 }
 0x174   :  { %798 = vmatmul.bf16.vlgmr.msra.gmra.mxu0 %v718_v36 }
 0x175   :  { %545 = vadd.xlane.f32.xlu1 %v1285_v37  ;;  %v399_v26 = vpop.permute.xlu1 %398  ;;  %v439_v58 = vpop.permute.xlu2 %438 }
 0x176   :  { %v419_v33 = vpop.permute.xlu0 %418  ;;  %v464_v46 = vsub.f32 %v1473_v7, %v399_v26  ;;  %v472_v4 = vsub.f32 %v1531_v61, %v439_v58 }
 0x177   :  { %v468_v40 = vsub.f32 %v1475_v8, %v419_v33 }
 0x178   :  { %v483_v57 = vmul.f32 1.442695, %v464_v46  ;;  %v1289_v48 = vpop.eup %1288  ;;  %v499_v0 = vmul.f32 1.442695, %v472_v4 }
 0x179   :  { %v720_v62 = vpack.c.bf16 %v1287_v54, %v1289_v48  ;;  %v491_v7 = vmul.f32 1.442695, %v468_v40 }
 0x17a   :  { %1290 = vpow2.f32 %v483_v57 }
 0x17b   :  { %808 = vmatmul.bf16.vlgmr.msra.gmra.mxu1 %v720_v62  ;;  %1292 = vpow2.f32 %v493_v59 }
 0x17c   :  { %543 = vadd.xlane.f32.xlu2 %v1281_v41  ;;  %1294 = vpow2.f32 %v491_v7 }
 0x17d   :  { %551 = vadd.xlane.f32.xlu1 %v1287_v54  ;;  %v414_v3 = vpop.permute.xlu1 %413  ;;  %v454_v14 = vpop.permute.xlu2 %453 }
 0x17e   :  { %v434_v44 = vpop.permute.xlu0 %433  ;;  %v467_v10 = vsub.f32 %v1471_v6, %v414_v3  ;;  %v475_v61 = vsub.f32 %v1535_v63, %v454_v14  ;;  %v509_v14 = vld [vmem:[#allocation4] sm:$0xff] }
 0x17f   :  { %v471_v9 = vsub.f32 %v1495_v29, %v434_v44 }
 0x180   :  { %v489_v11 = vmul.f32 1.442695, %v467_v10  ;;  %v1291_v56 = vpop.eup %1290  ;;  %v505_v30 = vmul.f32 1.442695, %v475_v61 }
 0x181   :  { %547 = vadd.xlane.f32.xlu0 %v1291_v56  ;;  %v719_v18 = vpack.c.bf16 %v1291_v56, %v1285_v37  ;;  %v1293_v8 = vpop.eup %1292  ;;  %v497_v22 = vmul.f32 1.442695, %v471_v9 }
 0x182   :  { %1296 = vpow2.f32 %v489_v11  ;;  %v1295_v24 = vpop.eup %1294 }
 0x183   :  { %1298 = vpow2.f32 %v499_v0 }
 0x184   :  { %549 = vadd.xlane.f32.xlu2 %v1289_v48  ;;  %803 = vmatmul.bf16.gmra.mxu0 %v719_v18  ;;  %v511_v18 = vld [vmem:[#allocation4 + $0x10] sm:$0xff] }
 0x185   :  { %557 = vadd.xlane.f32.xlu1 %v1293_v8  ;;  %v429_v13 = vpop.permute.xlu1 %428  ;;  %v1769_v57 = vpop.permute.xlu2 %624 }
 0x186   :  { %v449_v6 = vpop.permute.xlu0 %448  ;;  %v470_v17 = vsub.f32 %v1493_v28, %v429_v13 }
 0x187   :  { %v474_v35 = vsub.f32 %v1519_v49, %v449_v6  ;;  %v527_v6 = vmul.f32 %v1641_v2, %v511_v18  ;;  %v512_v2 = vld [vmem:[#allocation4 + $0x18] sm:$0xff] }
 0x188   :  { %v495_v23 = vmul.f32 1.442695, %v470_v17  ;;  %v1297_v27 = vpop.eup %1296 }
 0x189   :  { %553 = vadd.xlane.f32.xlu0 %v1297_v27  ;;  %v721_v34 = vpack.c.bf16 %v1295_v24, %v1297_v27  ;;  %v1299_v29 = vpop.eup %1298  ;;  %v503_v38 = vmul.f32 1.442695, %v474_v35 }
 0x18a   :  { %1300 = vpow2.f32 %v495_v23 }
 0x18b   :  { %1302 = vpow2.f32 %v497_v22  ;;  %813 = vmatmul.bf16.gmra.mxu1 %v721_v34  ;;  %v514_v22 = vld [vmem:[#allocation4 + $0x28] sm:$0xff] }
 0x18c   :  { %555 = vadd.xlane.f32.xlu2 %v1295_v24  ;;  %1304 = vpow2.f32 %v505_v30  ;;  %v510_v24 = vld [vmem:[#allocation4 + $0x8] sm:$0xff]  ;;  %v530_v30 = vmul.f32 %v1688_v45, %v514_v22 }
 0x18d   :  { %563 = vadd.xlane.f32.xlu1 %v1299_v29  ;;  %v444_v63 = vpop.permute.xlu1 %443  ;;  %1306 = vpow2.f32 %v503_v38  ;;  %v526_v35 = vmul.f32 %v1675_v31, %v510_v24 }
 0x18e   :  { %v473_v28 = vsub.f32 %v1517_v47, %v444_v63  ;;  %v1771_v48 = vpop.permute.xlu0 %634 }
 0x190   :  { %v1301_v43 = vpop.eup %1300  ;;  %v501_v52 = vmul.f32 1.442695, %v473_v28  ;;  %v513_v28 = vld [vmem:[#allocation4 + $0x20] sm:$0xff] }
 0x191   :  { %v722_v21 = vpack.c.bf16 %v1301_v43, %v1293_v8  ;;  %v1303_v49 = vpop.eup %1302  ;;  %559 = vadd.xlane.f32.xlu0 %v1301_v43  ;;  %v525_v8 = vmul.f32 %v1673_v16, %v509_v14  ;;  %v517_v43 = vld [vmem:[#allocation4 + $0x40] sm:$0xff] }
 0x192   :  { %1308 = vpow2.f32 %v501_v52  ;;  %v1305_v41 = vpop.eup %1304  ;;  %v723_v46 = vpack.c.bf16 %v1299_v29, %v1303_v49  ;;  %v528_v52 = vmul.f32 %v1686_v39, %v512_v2  ;;  %v515_v39 = vld [vmem:[#allocation4 + $0x30] sm:$0xff] }
 0x193   :  { %818 = vmatmul.bf16.vlgmr.msra.gmra.mxu2 %v722_v21  ;;  %v1307_v37 = vpop.eup %1306  ;;  %v529_v21 = vmul.f32 %v1660_v20, %v513_v28  ;;  %v516_v20 = vld [vmem:[#allocation4 + $0x38] sm:$0xff] }
 0x194   :  { %561 = vadd.xlane.f32.xlu2 %v1303_v49  ;;  %v532_v14 = vmul.f32 %v1677_v32, %v516_v20 }
 0x195   :  { %569 = vadd.xlane.f32.xlu1 %v1305_v41  ;;  %v459_v42 = vpop.permute.xlu1 %458 }
 0x196   :  { %v476_v36 = vsub.f32 %v1529_v60, %v459_v42  ;;  %v1775_v60 = vpop.permute.xlu2 %639  ;;  %v1777_v59 = vpop.permute.xlu0 %644  ;;  %v533_v42 = vmul.f32 %v1707_v53, %v517_v43  ;;  %v531_v53 = vmul.f32 %v1705_v51, %v515_v39  ;;  %v518_v51 = vld [vmem:[#allocation4 + $0x48] sm:$0xff] }
 0x198   :  { %v1309_v26 = vpop.eup %1308  ;;  %v507_v25 = vmul.f32 1.442695, %v476_v36 }
 0x199   :  { %v724_v33 = vpack.c.bf16 %v1307_v37, %v1309_v26  ;;  %565 = vadd.xlane.f32.xlu0 %v1309_v26 }
 0x19a   :  { %1310 = vpow2.f32 %v507_v25 }
 0x19b   :  { %828 = vmatmul.bf16.vlgmr.msra.gmra.mxu3 %v724_v33 }
 0x19c   :  { %567 = vadd.xlane.f32.xlu2 %v1307_v37 }
 0x19d   :  { %v1773_v58 = vpop.permute.xlu1 %629 }
 0x19e   :  { %v1781_v40 = vpop.permute.xlu2 %654  ;;  %v1783_v3 = vpop.permute.xlu0 %659 }
 0x1a0   :  { %v1311_v47 = vpop.eup %1310 }
 0x1a1   :  { %571 = vadd.xlane.f32.xlu0 %v1311_v47  ;;  %v725_v54 = vpack.c.bf16 %v1311_v47, %v1305_v41 }
 0x1a3   :  { %823 = vmatmul.bf16.gmra.mxu2 %v723_v46  ;;  %v520_v46 = vld [vmem:[#allocation4 + $0x58] sm:$0xff] }
 0x1a5   :  { %v1779_v62 = vpop.permute.xlu1 %649 }
 0x1a6   :  { %v1787_v44 = vpop.permute.xlu2 %669  ;;  %v1789_v10 = vpop.permute.xlu0 %674 }
 0x1ab   :  { %833 = vmatmul.bf16.gmra.mxu3 %v725_v54 }
 0x1ad   :  { %v1785_v4 = vpop.permute.xlu1 %664 }
 0x1ae   :  { %v1793_v11 = vpop.permute.xlu2 %684  ;;  %v1795_v56 = vpop.permute.xlu0 %689 }
 0x1b5   :  { %v1791_v7 = vpop.permute.xlu1 %679 }
 0x1b6   :  { %v1800_v13 = vpop.permute.xlu2 %699 }
 0x1bd   :  { %v1797_v0 = vpop.permute.xlu1 %694 }
 0x1e5   :  { %v542_v9 = vpop.xlane.xlu0 %541 }
 0x1e6   :  { %v573_v61 = vadd.f32 %v542_v9, %v525_v8  ;;  %v536_v9 = vmul.f32 %v1726_v19, %v520_v46  ;;  %v519_v19 = vld [vmem:[#allocation4 + $0x50] sm:$0xff] }
 0x1e8   :  { %v546_v17 = vpop.xlane.xlu1 %545  ;;  %590 = vst.msk [vmem:[#allocation4] sm:$0xff] %vm24_vm0, %v573_v61 }
 0x1e9   :  { %v575_v23 = vadd.f32 %v546_v17, %v527_v6 }
 0x1eb   :  { %592 = vst.msk [vmem:[#allocation4 + $0x10] sm:$0xff] %vm24_vm0, %v575_v23 }
 0x1ef   :  { %v544_v27 = vpop.xlane.xlu2 %543  ;;  %v906_v29 = vld [vmem:[#allocation4] sm:$0xff] }
 0x1f0   :  { %v574_v16 = vadd.f32 %v544_v27, %v526_v35  ;;  %v552_v34 = vpop.xlane.xlu1 %551  ;;  %1312 = vrcp.f32 %v906_v29  ;;  %v523_v27 = vld [vmem:[#allocation4 + $0x70] sm:$0xff] }
 0x1f1   :  { %v578_v38 = vadd.f32 %v552_v34, %v530_v30  ;;  %v534_v30 = vmul.f32 %v1724_v50, %v518_v51  ;;  %v535_v34 = vmul.f32 %v1690_v15, %v519_v19  ;;  %v521_v15 = vld [vmem:[#allocation4 + $0x60] sm:$0xff] }
 0x1f2   :  { %591 = vst.msk [vmem:[#allocation4 + $0x8] sm:$0xff] %vm24_vm0, %v574_v16  ;;  %v908_v63 = vld [vmem:[#allocation4 + $0x10] sm:$0xff] }
 0x1f3   :  { %595 = vst.msk [vmem:[#allocation4 + $0x28] sm:$0xff] %vm24_vm0, %v578_v38  ;;  %1314 = vrcp.f32 %v908_v63  ;;  %v539_v63 = vmul.f32 %v1740_v5, %v523_v27  ;;  %v522_v5 = vld [vmem:[#allocation4 + $0x68] sm:$0xff] }
 0x1f4   :  { %v548_v31 = vpop.xlane.xlu0 %547 }
 0x1f5   :  { %v576_v49 = vadd.f32 %v548_v31, %v528_v52 }
 0x1f6   :  { %v1313_v45 = vpop.eup %1312 }
 0x1f7   :  { %v550_v41 = vpop.xlane.xlu2 %549  ;;  %940 = vperm.xlu0 %1243, %v1313_v45   ;;  %593 = vst.msk [vmem:[#allocation4 + $0x18] sm:$0xff] %vm24_vm0, %v576_v49 }
 0x1f8   :  { %v577_v36 = vadd.f32 %v550_v41, %v529_v21  ;;  %v558_v37 = vpop.xlane.xlu1 %557  ;;  %v537_v41 = vmul.f32 %v1738_v1, %v521_v15  ;;  %v524_v1 = vld [vmem:[#allocation4 + $0x78] sm:$0xff] }
 0x1f9   :  { %v1315_v26 = vpop.eup %1314  ;;  %v581_v25 = vadd.f32 %v558_v37, %v533_v42  ;;  %v907_v33 = vld [vmem:[#allocation4 + $0x8] sm:$0xff] }
 0x1fa   :  { %594 = vst.msk [vmem:[#allocation4 + $0x20] sm:$0xff] %vm24_vm0, %v577_v36  ;;  %950 = vperm.xlu2 %1245, %v1315_v26   ;;  %1316 = vrcp.f32 %v907_v33  ;;  %v911_v47 = vld [vmem:[#allocation4 + $0x28] sm:$0xff]  ;;  %v538_v36 = vmul.f32 %v1712_v55, %v522_v5  ;;  %v540_v55 = vmul.f32 %v1750_v12, %v524_v1  ;;  %v705_v5 = vmul.f32 0.0, %v1775_v60 }
 0x1fb   :  { %598 = vst.msk [vmem:[#allocation4 + $0x40] sm:$0xff] %vm24_vm0, %v581_v25  ;;  %1318 = vrcp.f32 %v911_v47 }
 0x1fc   :  { %v554_v54 = vpop.xlane.xlu0 %553 }
 0x1fd   :  { %v579_v18 = vadd.f32 %v554_v54, %v531_v53 }
 0x1fe   :  { %v909_v23 = vld [vmem:[#allocation4 + $0x18] sm:$0xff] }
 0x1ff   :  { %v556_v8 = vpop.xlane.xlu2 %555  ;;  %596 = vst.msk [vmem:[#allocation4 + $0x30] sm:$0xff] %vm24_vm0, %v579_v18  ;;  %1320 = vrcp.f32 %v909_v23 }
 0x200   :  { %v1317_v61 = vpop.eup %1316  ;;  %v580_v6 = vadd.f32 %v556_v8, %v532_v14  ;;  %v564_v17 = vpop.xlane.xlu1 %563 }
 0x201   :  { %v1319_v24 = vpop.eup %1318  ;;  %v584_v22 = vadd.f32 %v564_v17, %v536_v9  ;;  %945 = vperm.xlu1 %1244, %v1317_v61   ;;  %v910_v35 = vld [vmem:[#allocation4 + $0x20] sm:$0xff] }
 0x202   :  { %597 = vst.msk [vmem:[#allocation4 + $0x38] sm:$0xff] %vm24_vm0, %v580_v6  ;;  %965 = vperm.xlu2 %1245, %v1319_v24   ;;  %1322 = vrcp.f32 %v910_v35  ;;  %v914_v32 = vld [vmem:[#allocation4 + $0x40] sm:$0xff]  ;;  %v809_v35 = vpop.f32.mrf.mxu1 }
 0x203   :  { %601 = vst.msk [vmem:[#allocation4 + $0x58] sm:$0xff] %vm24_vm0, %v584_v22  ;;  %1324 = vrcp.f32 %v914_v32  ;;  %v799_v22 = vpop.f32.mrf.mxu0 }
 0x204   :  { %v560_v16 = vpop.xlane.xlu0 %559 }
 0x205   :  { %v1321_v29 = vpop.eup %1320  ;;  %v582_v38 = vadd.f32 %v560_v16, %v534_v30  ;;  %v702_v16 = vmul.f32 0.0, %v1769_v57  ;;  %v707_v57 = vmul.f32 0.0, %v1779_v62 }
 0x206   :  { %955 = vperm.xlu0 %1243, %v1321_v29   ;;  %v912_v31 = vld [vmem:[#allocation4 + $0x30] sm:$0xff]  ;;  %v703_v29 = vmul.f32 0.0, %v1773_v58 }
 0x207   :  { %v562_v2 = vpop.xlane.xlu2 %561  ;;  %599 = vst.msk [vmem:[#allocation4 + $0x48] sm:$0xff] %vm24_vm0, %v582_v38  ;;  %1326 = vrcp.f32 %v912_v31  ;;  %v839_v38 = vadd.f32 %v799_v22, %v702_v16  ;;  %v1840_v31 = vld [vmem:[%s1901_s4] ss:$0 sm:$0xff] }
 0x208   :  { %v1323_v28 = vpop.eup %1322  ;;  %v583_v43 = vadd.f32 %v562_v2, %v535_v34  ;;  %v570_v52 = vpop.xlane.xlu1 %569 }
 0x209   :  { %v1325_v21 = vpop.eup %1324  ;;  %v587_v45 = vadd.f32 %v570_v52, %v539_v63  ;;  %960 = vperm.xlu1 %1244, %v1323_v28   ;;  %v913_v50 = vld [vmem:[#allocation4 + $0x38] sm:$0xff] }
 0x20a   :  { %600 = vst.msk [vmem:[#allocation4 + $0x50] sm:$0xff] %vm24_vm0, %v583_v43  ;;  %980 = vperm.xlu2 %1245, %v1325_v21   ;;  %1328 = vrcp.f32 %v913_v50  ;;  %v917_v49 = vld [vmem:[#allocation4 + $0x58] sm:$0xff]  ;;  %v811_v27 = vpop.f32.mrf.mxu1 }
 0x20b   :  { %604 = vst.msk [vmem:[#allocation4 + $0x70] sm:$0xff] %vm24_vm0, %v587_v45  ;;  %1330 = vrcp.f32 %v917_v49  ;;  %v801_v51 = vpop.f32.mrf.mxu0  ;;  %v704_v45 = vmul.f32 0.0, %v1771_v48 }
 0x20c   :  { %v566_v42 = vpop.xlane.xlu0 %565  ;;  %v840_v63 = vadd.f32 %v801_v51, %v703_v29  ;;  %v712_v29 = vmul.f32 0.0, %v1789_v10 }
 0x20d   :  { %v1327_v37 = vpop.eup %1326  ;;  %v585_v26 = vadd.f32 %v566_v42, %v537_v41  ;;  %v706_v42 = vmul.f32 0.0, %v1777_v59 }
 0x20e   :  { %970 = vperm.xlu0 %1243, %v1327_v37   ;;  %v915_v47 = vld [vmem:[#allocation4 + $0x48] sm:$0xff] }
 0x20f   :  { %v568_v25 = vpop.xlane.xlu2 %567  ;;  %602 = vst.msk [vmem:[#allocation4 + $0x60] sm:$0xff] %vm24_vm0, %v585_v26  ;;  %1332 = vrcp.f32 %v915_v47 }
 0x210   :  { %v1329_v33 = vpop.eup %1328  ;;  %v586_v39 = vadd.f32 %v568_v25, %v538_v36  ;;  %v844_v36 = vadd.f32 %v811_v27, %v707_v57 }
 0x211   :  { %v1331_v20 = vpop.eup %1330  ;;  %975 = vperm.xlu1 %1244, %v1329_v33   ;;  %v916_v46 = vld [vmem:[#allocation4 + $0x50] sm:$0xff] }
 0x212   :  { %603 = vst.msk [vmem:[#allocation4 + $0x68] sm:$0xff] %vm24_vm0, %v586_v39  ;;  %995 = vperm.xlu2 %1245, %v1331_v20   ;;  %1334 = vrcp.f32 %v916_v46  ;;  %v920_v53 = vld [vmem:[#allocation4 + $0x70] sm:$0xff]  ;;  %v814_v50 = vpop.f32.mrf.mxu1  ;;  %v843_v39 = vadd.f32 %v809_v35, %v706_v42  ;;  %v710_v35 = vmul.f32 0.0, %v1785_v4 }
 0x213   :  { %1336 = vrcp.f32 %v920_v53  ;;  %v804_v30 = vpop.f32.mrf.mxu0 }
 0x214   :  { %v572_v54 = vpop.xlane.xlu0 %571  ;;  %v841_v41 = vadd.f32 %v804_v30, %v704_v45  ;;  %v711_v30 = vmul.f32 0.0, %v1787_v44 }
 0x215   :  { %v1333_v14 = vpop.eup %1332  ;;  %v588_v18 = vadd.f32 %v572_v54, %v540_v55 }
 0x216   :  { %985 = vperm.xlu0 %1243, %v1333_v14   ;;  %v918_v9 = vld [vmem:[#allocation4 + $0x60] sm:$0xff]  ;;  %v1833_v32 = vpop.f32.mrf.mxu2  ;;  %v708_v14 = vmul.f32 0.0, %v1781_v40 }
 0x217   :  { %605 = vst.msk [vmem:[#allocation4 + $0x78] sm:$0xff] %vm24_vm0, %v588_v18  ;;  %1338 = vrcp.f32 %v918_v9  ;;  %v709_v9 = vmul.f32 0.0, %v1783_v3  ;;  %v713_v3 = vmul.f32 0.0, %v1791_v7  ;;  %v847_v16 = vadd.f32 %v1833_v32, %v710_v35 }
 0x218   :  { %v1335_v8 = vpop.eup %1334 }
 0x219   :  { %v1337_v61 = vpop.eup %1336  ;;  %990 = vperm.xlu1 %1244, %v1335_v8   ;;  %v919_v6 = vld [vmem:[#allocation4 + $0x68] sm:$0xff] }
 0x21a   :  { %1010 = vperm.xlu2 %1245, %v1337_v61   ;;  %1340 = vrcp.f32 %v919_v6  ;;  %v816_v18 = vpop.f32.mrf.mxu1  ;;  %v845_v6 = vadd.f32 %v814_v50, %v708_v14 }
 0x21b   :  { %v806_v15 = vpop.f32.mrf.mxu0 }
 0x21c   :  { %v842_v25 = vadd.f32 %v806_v15, %v705_v5  ;;  %v714_v15 = vmul.f32 0.0, %v1793_v11  ;;  %v716_v11 = vmul.f32 0.0, %v1797_v0 }
 0x21d   :  { %v1339_v17 = vpop.eup %1338 }
 0x21e   :  { %1000 = vperm.xlu0 %1243, %v1339_v17   ;;  %v921_v24 = vld [vmem:[#allocation4 + $0x78] sm:$0xff]  ;;  %v821_v2 = vpop.f32.mrf.mxu2  ;;  %v829_v37 = vpop.f32.mrf.mxu3  ;;  %v846_v17 = vadd.f32 %v816_v18, %v709_v9 }
 0x21f   :  { %1342 = vrcp.f32 %v921_v24 }
 0x220   :  { %v1341_v23 = vpop.eup %1340 }
 0x221   :  { %1005 = vperm.xlu1 %1244, %v1341_v23  }
 0x225   :  { %v1343_v12 = vpop.eup %1342 }
 0x226   :  { %1015 = vperm.xlu0 %1243, %v1343_v12   ;;  %v824_v47 = vpop.f32.mrf.mxu2  ;;  %v831_v23 = vpop.f32.mrf.mxu3 }
 0x22e   :  { %v826_v51 = vpop.f32.mrf.mxu2  ;;  %v834_v50 = vpop.f32.mrf.mxu3 }
 0x254   :  { %v951_v19 = vpop.permute.xlu2 %950 }
 0x255   :  { %v1020_v33 = vmul.f32 %v951_v19, %v841_v41  ;;  %v851_v41 = vadd.f32 %v829_v37, %v714_v15 }
 0x257   :  { %v1040_v60 = vadd.f32 %v1840_v31, %v1020_v33 }
 0x25c   :  { %v966_v43 = vpop.permute.xlu2 %965 }
 0x25d   :  { %v1023_v48 = vmul.f32 %v966_v43, %v844_v36 }
 0x25f   :  { %v1043_v55 = vadd.f32 %v1840_v31, %v1023_v48 }
 0x264   :  { %v981_v53 = vpop.permute.xlu2 %980 }
 0x265   :  { %v1026_v43 = vmul.f32 %v981_v53, %v847_v16 }
 0x267   :  { %v1046_v32 = vadd.f32 %v1840_v31, %v1026_v43 }
 0x269   :  { %v941_v34 = vpop.permute.xlu0 %940 }
 0x26a   :  { %v1018_v28 = vmul.f32 %v941_v34, %v839_v38  ;;  %v850_v38 = vadd.f32 %v826_v51, %v713_v3 }
 0x26c   :  { %v1038_v58 = vadd.f32 %v1840_v31, %v1018_v28  ;;  %v996_v34 = vpop.permute.xlu2 %995  ;;  %v848_v28 = vadd.f32 %v821_v2, %v711_v30 }
 0x26d   :  { %v1029_v4 = vmul.f32 %v996_v34, %v850_v38 }
 0x26f   :  { %v1049_v10 = vadd.f32 %v1840_v31, %v1029_v4 }
 0x273   :  { %v946_v52 = vpop.permute.xlu1 %945 }
 0x274   :  { %v1019_v21 = vmul.f32 %v946_v52, %v840_v63  ;;  %v849_v52 = vadd.f32 %v824_v47, %v712_v29  ;;  %v1011_v48 = vpop.permute.xlu2 %1010  ;;  %v853_v47 = vadd.f32 %v834_v50, %v716_v11 }
 0x276   :  { %v1039_v49 = vadd.f32 %v1840_v31, %v1019_v21 }
 0x278   :  { %v1165_v26 = vpack.c.bf16 %v1039_v49, %v1038_v58  ;;  %v956_v62 = vpop.permute.xlu0 %955  ;;  %v715_v49 = vmul.f32 0.0, %v1795_v56 }
 0x279   :  { %v1021_v20 = vmul.f32 %v956_v62, %v842_v25  ;;  %v717_v62 = vmul.f32 0.0, %v1800_v13 }
 0x27a   :  { %1166 = vst [vmem:[%s1902_s5] sm:$0xff] %v1165_v26   ;;  %v852_v42 = vadd.f32 %v831_v23, %v715_v49 }
 0x27b   :  { %v961_v46 = vpop.permute.xlu1 %960  ;;  %v1041_v59 = vadd.f32 %v1840_v31, %v1021_v20 }
 0x27c   :  { %v1022_v1 = vmul.f32 %v961_v46, %v843_v39  ;;  %v836_v39 = vpop.f32.mrf.mxu3 }
 0x27d   :  { %v1170_v8 = vpack.c.bf16 %v1041_v59, %v1040_v60  ;;  %v854_v46 = vadd.f32 %v836_v39, %v717_v62 }
 0x27e   :  { %v1042_v54 = vadd.f32 %v1840_v31, %v1022_v1  ;;  %v1032_v1 = vmul.f32 %v1011_v48, %v853_v47 }
 0x27f   :  { %1209 = vst [vmem:[%s1902_s5 + $0x8] sm:$0xff] %v1170_v8  }
 0x280   :  { %v1175_v61 = vpack.c.bf16 %v1043_v55, %v1042_v54  ;;  %v971_v24 = vpop.permute.xlu0 %970  ;;  %v1052_v0 = vadd.f32 %v1840_v31, %v1032_v1 }
 0x281   :  { %v1024_v12 = vmul.f32 %v971_v24, %v845_v6 }
 0x282   :  { %1210 = vst [vmem:[%s1902_s5 + $0x10] sm:$0xff] %v1175_v61  }
 0x283   :  { %v976_v22 = vpop.permute.xlu1 %975  ;;  %v1044_v19 = vadd.f32 %v1840_v31, %v1024_v12 }
 0x284   :  { %v1025_v40 = vmul.f32 %v976_v22, %v846_v17 }
 0x286   :  { %v1045_v27 = vadd.f32 %v1840_v31, %v1025_v40 }
 0x288   :  { %v1180_v63 = vpack.c.bf16 %v1045_v27, %v1044_v19  ;;  %v986_v7 = vpop.permute.xlu0 %985 }
 0x289   :  { %v1027_v21 = vmul.f32 %v986_v7, %v848_v28 }
 0x28a   :  { %1211 = vst [vmem:[%s1902_s5 + $0x18] sm:$0xff] %v1180_v63  }
 0x28b   :  { %v991_v45 = vpop.permute.xlu1 %990  ;;  %v1047_v57 = vadd.f32 %v1840_v31, %v1027_v21 }
 0x28c   :  { %v1028_v44 = vmul.f32 %v991_v45, %v849_v52 }
 0x28d   :  { %v1185_v58 = vpack.c.bf16 %v1047_v57, %v1046_v32 }
 0x28e   :  { %v1048_v2 = vadd.f32 %v1840_v31, %v1028_v44 }
 0x28f   :  { %1212 = vst [vmem:[%s1902_s5 + $0x20] sm:$0xff] %v1185_v58  }
 0x290   :  { %v1190_v5 = vpack.c.bf16 %v1049_v10, %v1048_v2  ;;  %v1001_v36 = vpop.permute.xlu0 %1000 }
 0x291   :  { %v1030_v26 = vmul.f32 %v1001_v36, %v851_v41 }
 0x292   :  { %1213 = vst [vmem:[%s1902_s5 + $0x28] sm:$0xff] %v1190_v5  }
 0x293   :  { %v1006_v25 = vpop.permute.xlu1 %1005  ;;  %v1050_v56 = vadd.f32 %v1840_v31, %v1030_v26 }
 0x294   :  { %v1031_v33 = vmul.f32 %v1006_v25, %v852_v42 }
 0x296   :  { %v1051_v37 = vadd.f32 %v1840_v31, %v1031_v33 }
 0x298   :  { %v1195_v20 = vpack.c.bf16 %v1051_v37, %v1050_v56  ;;  %v1016_v60 = vpop.permute.xlu0 %1015 }
 0x299   :  { %v1033_v53 = vmul.f32 %v1016_v60, %v854_v46 }
 0x29a   :  { %1214 = vst [vmem:[%s1902_s5 + $0x30] sm:$0xff] %v1195_v20  }
 0x29b   :  { %v1053_v59 = vadd.f32 %v1840_v31, %v1033_v53 }
 0x29d   :  { %v1200_v55 = vpack.c.bf16 %v1053_v59, %v1052_v0 }
 0x29f   :  { %1215 = vst [vmem:[%s1902_s5 + $0x38] sm:$0xff] %v1200_v55  }

// kernel: caugramer_forward.8
= control target key start
LH: loop header
LB: loop body
LE: loop exit
PB: predicated region body
PF: predicated region fallthrough
CT: control target
= control target key end

     0   :  { %s1234_s2 = inlined_call_operand.vmem [shape: bf16[128,128], index: 2, kind: input, shape index: {}]   ;;  %s1235_s3 = inlined_call_operand.vmem [shape: bf16[128,128], index: 3, kind: input, shape index: {}]   ;;  %s1236_s4 = inlined_call_operand.vmem [shape: bf16[128,128], index: 4, kind: input, shape index: {}]   ;;  %s1237_s5 = inlined_call_operand.vmem [shape: f32[1,128], index: 5, kind: input, shape index: {}]   ;;  %s1238_s0 = inlined_call_operand.vmem [shape: bf16[128,128], index: 0, kind: input, shape index: {}]   ;;  %s1239_s1 = inlined_call_operand.vmem [shape: bf16[128,128], index: 1, kind: input, shape index: {}]   ;;  %s1240_s6 = inlined_call_operand.vmem [shape: f32[1,128], index: 6, kind: input, shape index: {}]   ;;  %s1241_s7 = inlined_call_operand.vmem [shape: f32[1,128], index: 7, kind: input, shape index: {}]   ;;  %s1242_s9 = inlined_call_operand.vmem [shape: f32[8,128], index: 9, kind: output, shape index: {1}]   ;;  %s1243_s10 = inlined_call_operand.vmem [shape: f32[8,128], index: 10, kind: output, shape index: {2}]   ;;  %s1244_s8 = inlined_call_operand.vmem [shape: f32[8,128], index: 8, kind: output, shape index: {0}]  }
   0x1   :  { %v983_v0 = vld [vmem:[%s1234_s2 + $0x38] sm:$0xff]  ;;  %v982_v2 = vld [vmem:[%s1234_s2 + $0x30] sm:$0xff]  ;;  %v981_v4 = vld [vmem:[%s1234_s2 + $0x28] sm:$0xff] }
   0x2   :  { %v991_v1 = vld [vmem:[%s1235_s3 + $0x38] sm:$0xff]  ;;  %180 = vmatpush.bf16.msra.mxu0 %v983_v0  ;;  %v990_v3 = vld [vmem:[%s1235_s3 + $0x30] sm:$0xff]  ;;  %1000 = vmatpush.bf16.msra.mxu3 %v983_v0  ;;  %v989_v5 = vld [vmem:[%s1235_s3 + $0x28] sm:$0xff] }
   0x3   :  { %345 = vmatpush.bf16.msra.mxu1 %v991_v1  ;;  %v1105_v6 = vld [vmem:[%s1236_s4 + $0x38] sm:$0xff]  ;;  %v1111_v7 = vld [vmem:[%s1236_s4 + $0x30] sm:$0xff]  ;;  %v980_v8 = vld [vmem:[%s1234_s2 + $0x20] sm:$0xff] }
   0x4   :  { %462 = vmatpush.bf16.msra.mxu2 %v1105_v6  ;;  %v988_v9 = vld [vmem:[%s1235_s3 + $0x20] sm:$0xff]  ;;  %v1123_v10 = vld [vmem:[%s1236_s4 + $0x28] sm:$0xff]  ;;  %v979_v11 = vld [vmem:[%s1234_s2 + $0x18] sm:$0xff] }
   0x5   :  { %v987_v12 = vld [vmem:[%s1235_s3 + $0x18] sm:$0xff]  ;;  %v996_v13 = vld [vmem:[%s1236_s4 + $0x20] sm:$0xff]  ;;  %v978_v14 = vld [vmem:[%s1234_s2 + $0x10] sm:$0xff] }
   0x6   :  { %181 = vmatpush.bf16.msra.mxu0 %v982_v2  ;;  %1001 = vmatpush.bf16.msra.mxu3 %v982_v2  ;;  %v986_v15 = vld [vmem:[%s1235_s3 + $0x10] sm:$0xff]  ;;  %v995_v16 = vld [vmem:[%s1236_s4 + $0x18] sm:$0xff]  ;;  %v977_v17 = vld [vmem:[%s1234_s2 + $0x8] sm:$0xff] }
   0x7   :  { %346 = vmatpush.bf16.msra.mxu1 %v990_v3  ;;  %v985_v18 = vld [vmem:[%s1235_s3 + $0x8] sm:$0xff]  ;;  %v994_v19 = vld [vmem:[%s1236_s4 + $0x10] sm:$0xff]  ;;  %v976_v20 = vld [vmem:[%s1234_s2] sm:$0xff] }
   0x8   :  { %463 = vmatpush.bf16.msra.mxu2 %v1111_v7  ;;  %v984_v21 = vld [vmem:[%s1235_s3] sm:$0xff]  ;;  %v993_v22 = vld [vmem:[%s1236_s4 + $0x8] sm:$0xff]  ;;  %v966_v25 = vld [vmem:[%s1238_s0 + $0x30] sm:$0xff] }
   0x9   :  { %v960_v23 = vld [vmem:[%s1238_s0] sm:$0xff]  ;;  %v967_v27 = vld [vmem:[%s1238_s0 + $0x38] sm:$0xff]  ;;  %v969_v28 = vld [vmem:[%s1239_s1 + $0x8] sm:$0xff] }
   0xa   :  { %182 = vmatpush.bf16.msra.mxu0 %v981_v4  ;;  %1002 = vmatpush.bf16.msra.mxu3 %v981_v4  ;;  %v968_v24 = vld [vmem:[%s1239_s1] sm:$0xff]  ;;  %v961_v29 = vld [vmem:[%s1238_s0 + $0x8] sm:$0xff]  ;;  %v974_v30 = vld [vmem:[%s1239_s1 + $0x30] sm:$0xff] }
   0xb   :  { %347 = vmatpush.bf16.msra.mxu1 %v989_v5  ;;  %v992_v26 = vld [vmem:[%s1236_s4] sm:$0xff]  ;;  %v970_v31 = vld [vmem:[%s1239_s1 + $0x10] sm:$0xff]  ;;  %v971_v32 = vld [vmem:[%s1239_s1 + $0x18] sm:$0xff] }
   0xc   :  { %464 = vmatpush.bf16.msra.mxu2 %v1123_v10  ;;  %v975_v33 = vld [vmem:[%s1239_s1 + $0x38] sm:$0xff]  ;;  %v972_v34 = vld [vmem:[%s1239_s1 + $0x20] sm:$0xff]  ;;  %v962_v35 = vld [vmem:[%s1238_s0 + $0x10] sm:$0xff] }
   0xd   :  { %v973_v36 = vld [vmem:[%s1239_s1 + $0x28] sm:$0xff]  ;;  %v963_v37 = vld [vmem:[%s1238_s0 + $0x18] sm:$0xff]  ;;  %v1024_v38 = vld [vmem:[%s1237_s5] ss:$0 sm:$0xff] }
   0xe   :  { %183 = vmatpush.bf16.msra.mxu0 %v980_v8  ;;  %1003 = vmatpush.bf16.msra.mxu3 %v980_v8  ;;  %v1025_v39 = vld [vmem:[%s1240_s6] ss:$0 sm:$0xff]  ;;  %v965_v51 = vld [vmem:[%s1238_s0 + $0x28] sm:$0xff] }
   0xf   :  { %348 = vmatpush.bf16.msra.mxu1 %v988_v9  ;;  %v964_v45 = vld [vmem:[%s1238_s0 + $0x20] sm:$0xff] }
  0x10   :  { %465 = vmatpush.bf16.msra.mxu2 %v996_v13 }
  0x12   :  { %184 = vmatpush.bf16.msra.mxu0 %v979_v11  ;;  %1004 = vmatpush.bf16.msra.mxu3 %v979_v11 }
  0x13   :  { %349 = vmatpush.bf16.msra.mxu1 %v987_v12 }
  0x14   :  { %466 = vmatpush.bf16.msra.mxu2 %v995_v16 }
  0x16   :  { %185 = vmatpush.bf16.msra.mxu0 %v978_v14  ;;  %1005 = vmatpush.bf16.msra.mxu3 %v978_v14 }
  0x17   :  { %350 = vmatpush.bf16.msra.mxu1 %v986_v15 }
  0x18   :  { %467 = vmatpush.bf16.msra.mxu2 %v994_v19 }
  0x1a   :  { %186 = vmatpush.bf16.msra.mxu0 %v977_v17  ;;  %1006 = vmatpush.bf16.msra.mxu3 %v977_v17 }
  0x1b   :  { %351 = vmatpush.bf16.msra.mxu1 %v985_v18 }
  0x1c   :  { %468 = vmatpush.bf16.msra.mxu2 %v993_v22 }
  0x1e   :  { %187 = vmatpush.bf16.msra.mxu0 %v976_v20  ;;  %1007 = vmatpush.bf16.msra.mxu3 %v976_v20 }
  0x1f   :  { %352 = vmatpush.bf16.msra.mxu1 %v984_v21 }
  0x20   :  { %469 = vmatpush.bf16.msra.mxu2 %v992_v26 }
  0x21   :  { %188 = vmatmul.bf16.vlgmr.msra.gmra.mxu0 %v960_v23  ;;  %218 = vmatmul.bf16.vlgmr.msra.gmra.mxu3 %v966_v25 }
  0x22   :  { %1008 = vmatpush.bf16.msrb.mxu3 %v991_v1  ;;  %353 = vmatmul.bf16.vlgmr.msra.gmra.mxu1 %v968_v24 }
  0x23   :  { %470 = vmatmul.bf16.vlgmr.msra.gmra.mxu2 %v968_v24 }
  0x26   :  { %1009 = vmatpush.bf16.msrb.mxu3 %v990_v3 }
  0x2a   :  { %1010 = vmatpush.bf16.msrb.mxu3 %v989_v5 }
  0x2e   :  { %1011 = vmatpush.bf16.msrb.mxu3 %v988_v9 }
  0x31   :  { %223 = vmatmul.bf16.gmra.mxu3 %v967_v27  ;;  %193 = vmatmul.bf16.gmra.mxu0 %v961_v29 }
  0x32   :  { %1012 = vmatpush.bf16.msrb.mxu3 %v987_v12  ;;  %358 = vmatmul.bf16.gmra.mxu1 %v969_v28 }
  0x33   :  { %475 = vmatmul.bf16.gmra.mxu2 %v969_v28 }
  0x36   :  { %1013 = vmatpush.bf16.msrb.mxu3 %v986_v15 }
  0x3a   :  { %1014 = vmatpush.bf16.msrb.mxu3 %v985_v18 }
  0x3e   :  { %1015 = vmatpush.bf16.msrb.mxu3 %v984_v21 }
  0x41   :  { %383 = vmatmul.bf16.vlgmr.msrb.gmra.mxu3 %v974_v30  ;;  %198 = vmatmul.bf16.gmra.mxu0 %v962_v35 }
  0x42   :  { %1016 = vmatpush.bf16.msra.mxu3 %v1105_v6  ;;  %363 = vmatmul.bf16.gmra.mxu1 %v970_v31 }
  0x43   :  { %480 = vmatmul.bf16.gmra.mxu2 %v970_v31 }
  0x46   :  { %1017 = vmatpush.bf16.msra.mxu3 %v1111_v7 }
  0x4a   :  { %1018 = vmatpush.bf16.msra.mxu3 %v1123_v10 }
  0x4e   :  { %1019 = vmatpush.bf16.msra.mxu3 %v996_v13 }
  0x51   :  { %388 = vmatmul.bf16.gmra.mxu3 %v975_v33  ;;  %203 = vmatmul.bf16.gmra.mxu0 %v963_v37 }
  0x52   :  { %1020 = vmatpush.bf16.msra.mxu3 %v995_v16  ;;  %368 = vmatmul.bf16.gmra.mxu1 %v971_v32 }
  0x53   :  { %485 = vmatmul.bf16.gmra.mxu2 %v971_v32 }
  0x56   :  { %1021 = vmatpush.bf16.msra.mxu3 %v994_v19 }
  0x5a   :  { %1022 = vmatpush.bf16.msra.mxu3 %v993_v22 }
  0x5e   :  { %1023 = vmatpush.bf16.msra.mxu3 %v992_v26 }
  0x61   :  { %500 = vmatmul.bf16.vlgmr.msra.gmra.mxu3 %v974_v30  ;;  %208 = vmatmul.bf16.gmra.mxu0 %v964_v45 }
  0x62   :  { %373 = vmatmul.bf16.gmra.mxu1 %v972_v34 }
  0x63   :  { %490 = vmatmul.bf16.gmra.mxu2 %v972_v34 }
  0x71   :  { %505 = vmatmul.bf16.gmra.mxu3 %v975_v33  ;;  %213 = vmatmul.bf16.gmra.mxu0 %v965_v51 }
  0x72   :  { %378 = vmatmul.bf16.gmra.mxu1 %v973_v36 }
  0x73   :  { %495 = vmatmul.bf16.gmra.mxu2 %v973_v36  ;;  %v1026_v36 = vld [vmem:[%s1241_s7] ss:$0 sm:$0xff] }
  0x9e   :  { %v189_v40 = vpop.f32.mrf.mxu0 }
  0x9f   :  { %v354_v41 = vpop.f32.mrf.mxu1  ;;  %v190_v42 = vadd.f32 %v1024_v38, %v189_v40 }
  0xa0   :  { %v355_v43 = vadd.f32 %v1025_v39, %v354_v41 }
  0xa2   :  { %v511_v44 = vmul.f32 %v355_v43, %v190_v42 }
  0xa4   :  { %527 = vadd.xlane.f32.xlu0 %v511_v44  ;;  %v219_v46 = vpop.f32.mrf.mxu3 }
  0xa6   :  { %v191_v47 = vpop.f32.mrf.mxu0  ;;  %v471_v63 = vpop.f32.mrf.mxu2 }
  0xa7   :  { %v356_v48 = vpop.f32.mrf.mxu1  ;;  %v472_v40 = vadd.f32 %v1026_v36, %v471_v63 }
  0xac   :  { %v221_v49 = vpop.f32.mrf.mxu3 }
  0xae   :  { %v194_v53 = vpop.f32.mrf.mxu0  ;;  %v473_v0 = vpop.f32.mrf.mxu2 }
  0xaf   :  { %v359_v50 = vpop.f32.mrf.mxu1  ;;  %v474_v39 = vadd.f32 %v1026_v36, %v473_v0 }
  0xb1   :  { %v749_v43 = vmul.f32 0.0, %v474_v39 }
  0xb4   :  { %v224_v52 = vpop.f32.mrf.mxu3 }
  0xb6   :  { %v196_v56 = vpop.f32.mrf.mxu0  ;;  %v476_v1 = vpop.f32.mrf.mxu2 }
  0xb7   :  { %v361_v54 = vpop.f32.mrf.mxu1  ;;  %v477_v41 = vadd.f32 %v1026_v36, %v476_v1 }
  0xb9   :  { %v750_v48 = vmul.f32 0.0, %v477_v41 }
  0xbc   :  { %v226_v55 = vpop.f32.mrf.mxu3 }
  0xbe   :  { %v478_v2 = vpop.f32.mrf.mxu2  ;;  %v199_v5 = vpop.f32.mrf.mxu0 }
  0xbf   :  { %v364_v57 = vpop.f32.mrf.mxu1  ;;  %v479_v44 = vadd.f32 %v1026_v36, %v478_v2 }
  0xc1   :  { %v751_v54 = vmul.f32 0.0, %v479_v44 }
  0xc4   :  { %v384_v58 = vpop.f32.mrf.mxu3 }
  0xc6   :  { %v481_v3 = vpop.f32.mrf.mxu2  ;;  %v201_v9 = vpop.f32.mrf.mxu0 }
  0xc7   :  { %v366_v59 = vpop.f32.mrf.mxu1  ;;  %v482_v49 = vadd.f32 %v1026_v36, %v481_v3 }
  0xc9   :  { %v752_v58 = vmul.f32 0.0, %v482_v49 }
  0xcc   :  { %v386_v60 = vpop.f32.mrf.mxu3 }
  0xce   :  { %v483_v7 = vpop.f32.mrf.mxu2  ;;  %v204_v12 = vpop.f32.mrf.mxu0 }
  0xcf   :  { %v369_v61 = vpop.f32.mrf.mxu1  ;;  %v484_v55 = vadd.f32 %v1026_v36, %v483_v7 }
  0xd4   :  { %v389_v4 = vpop.f32.mrf.mxu3 }
  0xd6   :  { %v486_v11 = vpop.f32.mrf.mxu2  ;;  %v206_v19 = vpop.f32.mrf.mxu0 }
  0xd7   :  { %v371_v62 = vpop.f32.mrf.mxu1  ;;  %v487_v60 = vadd.f32 %v1026_v36, %v486_v11 }
  0xd8   :  { %v753_v62 = vmul.f32 0.0, %v484_v55 }
  0xd9   :  { %v754_v4 = vmul.f32 0.0, %v487_v60 }
  0xdc   :  { %v391_v8 = vpop.f32.mrf.mxu3 }
  0xde   :  { %v488_v22 = vpop.f32.mrf.mxu2  ;;  %v209_v26 = vpop.f32.mrf.mxu0 }
  0xdf   :  { %v374_v6 = vpop.f32.mrf.mxu1  ;;  %v489_v1 = vadd.f32 %v1026_v36, %v488_v22 }
  0xe1   :  { %v755_v8 = vmul.f32 0.0, %v489_v1 }
  0xe4   :  { %v501_v35 = vpop.f32.mrf.mxu3 }
  0xe6   :  { %v491_v29 = vpop.f32.mrf.mxu2  ;;  %v211_v32 = vpop.f32.mrf.mxu0 }
  0xe7   :  { %v376_v10 = vpop.f32.mrf.mxu1  ;;  %v492_v3 = vadd.f32 %v1026_v36, %v491_v29 }
  0xe9   :  { %v756_v11 = vmul.f32 0.0, %v492_v3 }
  0xec   :  { %v503_v47 = vpop.f32.mrf.mxu3 }
  0xee   :  { %v493_v37 = vpop.f32.mrf.mxu2  ;;  %v214_v38 = vpop.f32.mrf.mxu0 }
  0xef   :  { %v379_v14 = vpop.f32.mrf.mxu1  ;;  %v494_v9 = vadd.f32 %v1026_v36, %v493_v37 }
  0xf4   :  { %v506_v6 = vpop.f32.mrf.mxu3 }
  0xf5   :  { %v507_v26 = vadd.f32 %v1026_v36, %v506_v6 }
  0xf6   :  { %v496_v52 = vpop.f32.mrf.mxu2  ;;  %v216_v53 = vpop.f32.mrf.mxu0 }
  0xf7   :  { %v381_v20 = vpop.f32.mrf.mxu1 }
  0xfe   :  { %v498_v10 = vpop.f32.mrf.mxu2 }
 0x117   :  { %v528_v13 = vpop.xlane.xlu0 %527 }
 0x118   :  { %v559_v15 = vmul.f32 0.17677669, %v528_v13  ;;  %v497_v13 = vadd.f32 %v1026_v36, %v496_v52 }
 0x11a   :  { %v642_v16 = vmax.f32 %v559_v15, -1e+30  ;;  %v758_v19 = vmul.f32 0.0, %v497_v13 }
 0x11c   :  { %v646_v17 = vmax.f32 %v642_v16, -1e+30  ;;  %v499_v16 = vadd.f32 %v1026_v36, %v498_v10 }
 0x11e   :  { %v650_v18 = vmax.f32 %v646_v17, -1e+30  ;;  %v759_v22 = vmul.f32 0.0, %v499_v16 }
 0x120   :  { %v654_v21 = vmax.f32 %v650_v18, -1e+30  ;;  %v502_v18 = vadd.f32 %v1026_v36, %v501_v35 }
 0x122   :  { %v656_v23 = vmax.f32 %v654_v21, -1e+30  ;;  %v504_v21 = vadd.f32 %v1026_v36, %v503_v47 }
 0x124   :  { %v657_v24 = vrot.slane %v656_v23, 4 }
 0x126   :  { %v658_v25 = vmax.f32 %v656_v23, %v657_v24  ;;  %v508_v23 = vpop.f32.mrf.mxu3  ;;  %v760_v24 = vmul.f32 0.0, %v502_v18 }
 0x127   :  { %v509_v29 = vadd.f32 %v1026_v36, %v508_v23 }
 0x128   :  { %v659_v27 = vrot.slane %v658_v25, 2 }
 0x12a   :  { %v660_v28 = vmax.f32 %v658_v25, %v659_v27  ;;  %v761_v27 = vmul.f32 0.0, %v504_v21 }
 0x12c   :  { %v661_v30 = vrot.slane %v660_v28, 1 }
 0x12e   :  { %v662_v31 = vmax.f32 %v660_v28, %v661_v30  ;;  %v762_v30 = vmul.f32 0.0, %v507_v26 }
 0x130   :  { %v663_v33 = vsub.f32 %v559_v15, %v662_v31  ;;  %786 = vst [vmem:[%s1242_s9] sm:$0xff] %v662_v31  ;;  %v757_v15 = vmul.f32 0.0, %v494_v9 }
 0x132   :  { %v679_v34 = vmul.f32 1.442695, %v663_v33  ;;  %v763_v33 = vmul.f32 0.0, %v509_v29 }
 0x134   :  { %1027 = vpow2.f32 %v679_v34 }
 0x13a   :  { %v1028_v42 = vpop.eup %1027 }
 0x13b   :  { %v742_v45 = vrot.slane %v1028_v42, 4  ;;  %v748_v46 = vmul.f32 %v1028_v42, %v472_v40 }
 0x13d   :  { %v743_v50 = vadd.f32 %v1028_v42, %v742_v45  ;;  %v764_v51 = vadd.f32 %v749_v43, %v748_v46 }
 0x13f   :  { %v744_v56 = vrot.slane %v743_v50, 2  ;;  %v765_v57 = vadd.f32 %v764_v51, %v750_v48 }
 0x141   :  { %v745_v59 = vadd.f32 %v744_v56, %v743_v50  ;;  %v766_v61 = vadd.f32 %v765_v57, %v751_v54 }
 0x143   :  { %v746_v63 = vrot.slane %v745_v59, 1  ;;  %v767_v0 = vadd.f32 %v766_v61, %v752_v58 }
 0x145   :  { %v747_v2 = vadd.f32 %v746_v63, %v745_v59  ;;  %v768_v5 = vadd.f32 %v767_v0, %v753_v62 }
 0x147   :  { %787 = vst [vmem:[%s1243_s10] sm:$0xff] %v747_v2  ;;  %v769_v7 = vadd.f32 %v768_v5, %v754_v4 }
 0x149   :  { %v770_v12 = vadd.f32 %v769_v7, %v755_v8 }
 0x14b   :  { %v771_v14 = vadd.f32 %v770_v12, %v756_v11 }
 0x14d   :  { %v772_v17 = vadd.f32 %v771_v14, %v757_v15 }
 0x14f   :  { %v773_v20 = vadd.f32 %v772_v17, %v758_v19 }
 0x151   :  { %v774_v25 = vadd.f32 %v773_v20, %v759_v22 }
 0x153   :  { %v775_v28 = vadd.f32 %v774_v25, %v760_v24 }
 0x155   :  { %v776_v31 = vadd.f32 %v775_v28, %v761_v27 }
 0x157   :  { %v777_v32 = vadd.f32 %v776_v31, %v762_v30 }
 0x159   :  { %v778_v34 = vadd.f32 %v777_v32, %v763_v33 }
 0x15b   :  { %v779_v37 = vrot.slane %v778_v34, 4 }
 0x15d   :  { %v780_v38 = vadd.f32 %v779_v37, %v778_v34 }
 0x15f   :  { %v781_v39 = vrot.slane %v780_v38, 2 }
 0x161   :  { %v782_v35 = vadd.f32 %v781_v39, %v780_v38 }
 0x163   :  { %v783_v40 = vrot.slane %v782_v35, 1 }
 0x165   :  { %v784_v41 = vadd.f32 %v783_v40, %v782_v35 }
 0x167   :  { %785 = vst [vmem:[%s1244_s8] sm:$0xff] %v784_v41 }

</bundles_post_ra>
